<compile_context>
chip_gen: v6e
topology: v6e:2x2x1
jax: 0.10.0
libtpu: 0.0.40
codegen_flags: <defaults>
</compile_context>

<pallas_src>
import functools

import jax
import jax.numpy as jnp
from jax.experimental import pallas as pl
from jax.experimental.pallas import tpu as pltpu

CP = 128  # lane width: conv output channels are padded to this


def _round_up(v, m):
    return (v + m - 1) // m * m


def _down_double_kernel(x_ref, w1_ref, s1_ref, b1_ref, w2_ref, s2_ref, b2_ref,
                        o_ref, xpad_ref, col1_ref, ypad_ref, col2_ref,
                        *, K, P, Cin, Cmid, KKC1, KKC1_pad, KKC2, KKC2_pad):
    # x_ref   : (B, H, Wh, 2*Cin)      un-pooled input, W pairs on minor axis
    # w1_ref  : (KKC1_pad, CP) bf16    conv1 weights, im2col rows, zero padded
    # w2_ref  : (KKC2_pad, CP) bf16    conv2 weights
    # s*/b*   : (1, CP) f32            folded eval-mode BN scale / bias
    # o_ref   : (B, Hh*Wh, CP) f32     lane-dense output
    # xpad_ref: (B, Hh+2P, Wh+2P, Cin) zero-halo pooled input (VMEM scratch)
    # col1_ref: (B*Hh*Wh, KKC1_pad)    conv1 im2col buffer   (VMEM scratch)
    # ypad_ref: (B, Hh+2P, Wh+2P, Cmid) zero-halo conv1 out  (VMEM scratch)
    # col2_ref: (B*Hh*Wh, KKC2_pad)    conv2 im2col buffer   (VMEM scratch)
    B, H, Wh, _ = x_ref.shape
    Hh = H // 2
    HW = Hh * Wh
    Hp = Hh + 2 * P
    Wp = Wh + 2 * P

    # ---- 2x2 max-pool (stride 2), unit-stride slices only -------------------
    x = x_ref[...]                                          # (B, H, Wh, 2*Cin)
    wmax = jnp.maximum(x[:, :, :, :Cin], x[:, :, :, Cin:])  # pool over W pairs
    xh = wmax.reshape(B, Hh, 2, Wh, Cin)
    pooled = jnp.maximum(xh[:, :, 0], xh[:, :, 1])          # (B, Hh, Wh, Cin)

    # ---- zero ONLY the P-wide halo strips; interior rewritten below ---------
    xpad_ref[:, 0:P, :, :] = jnp.zeros((B, P, Wp, Cin), jnp.float32)
    xpad_ref[:, Hp - P:Hp, :, :] = jnp.zeros((B, P, Wp, Cin), jnp.float32)
    xpad_ref[:, P:P + Hh, 0:P, :] = jnp.zeros((B, Hh, P, Cin), jnp.float32)
    xpad_ref[:, P:P + Hh, Wp - P:Wp, :] = jnp.zeros((B, Hh, P, Cin), jnp.float32)
    xpad_ref[:, P:P + Hh, P:P + Wh, :] = pooled

    # Zero the padded contraction tail (weight rows there are zero, but stale
    # VMEM could hold NaN/Inf which would poison the matmul).
    if KKC1_pad > KKC1:
        col1_ref[:, KKC1:KKC1_pad] = jnp.zeros((B * HW, KKC1_pad - KKC1),
                                               jnp.float32)
    if KKC2_pad > KKC2:
        col2_ref[:, KKC2:KKC2_pad] = jnp.zeros((B * HW, KKC2_pad - KKC2),
                                               jnp.float32)

    # ---- conv1: im2col from ref slices, single bf16 MXU matmul ---------------
    for b in range(B):
        r0 = b * HW
        for kh in range(K):
            for kw in range(K):
                j = (kh * K + kw) * Cin
                col1_ref[r0:r0 + HW, j:j + Cin] = (
                    xpad_ref[b, kh:kh + Hh, kw:kw + Wh, :].reshape(HW, Cin))
    patches1 = col1_ref[...].astype(jnp.bfloat16)
    acc1 = jnp.dot(patches1, w1_ref[...], preferred_element_type=jnp.float32)
    y = jnp.maximum(acc1, 0.0) * s1_ref[...] + b1_ref[...]  # ReLU -> folded BN

    # ---- stage conv1 result (real Cmid channels) into padded scratch ---------
    ypad_ref[:, 0:P, :, :] = jnp.zeros((B, P, Wp, Cmid), jnp.float32)
    ypad_ref[:, Hp - P:Hp, :, :] = jnp.zeros((B, P, Wp, Cmid), jnp.float32)
    ypad_ref[:, P:P + Hh, 0:P, :] = jnp.zeros((B, Hh, P, Cmid), jnp.float32)
    ypad_ref[:, P:P + Hh, Wp - P:Wp, :] = jnp.zeros((B, Hh, P, Cmid), jnp.float32)
    for b in range(B):
        r0 = b * HW
        ypad_ref[b, P:P + Hh, P:P + Wh, :] = (
            y[r0:r0 + HW, :Cmid].reshape(Hh, Wh, Cmid))

    # ---- conv2: same single-matmul structure ----------------------------------
    for b in range(B):
        r0 = b * HW
        for kh in range(K):
            for kw in range(K):
                j = (kh * K + kw) * Cmid
                col2_ref[r0:r0 + HW, j:j + Cmid] = (
                    ypad_ref[b, kh:kh + Hh, kw:kw + Wh, :].reshape(HW, Cmid))
    patches2 = col2_ref[...].astype(jnp.bfloat16)
    acc2 = jnp.dot(patches2, w2_ref[...], preferred_element_type=jnp.float32)
    z = jnp.maximum(acc2, 0.0) * s2_ref[...] + b2_ref[...]  # ReLU -> folded BN

    # ---- lane-dense store (minor dim = CP = 128, unmasked) --------------------
    o_ref[...] = z.reshape(B, HW, CP)


def _pick_batch_block(N, HW):
    """Largest divisor B of N reaching ~256 matmul rows while keeping >= 2 grid
    steps (so both v7x TensorCores get work)."""
    best = 1
    for b in range(1, N + 1):
        if N % b != 0:
            continue
        if N >= 2 and N // b < 2:
            break
        best = b
        if b * HW >= 256:
            break
    return best


def down_double(x_nchw, w1, g1, beta1, m1, v1, w2, g2, beta2, m2, v2,
                kernel_size=5, eps=1e-5):
    """Forward pass of DownDouble: MaxPool2d(2) then (Conv->ReLU->BN) x 2."""
    K = int(kernel_size)
    P = K // 2
    # TODO(synk): in a real pipeline the producer should emit NHWC directly;
    # this transpose is an extra HBM pass outside the kernel.
    x = jnp.transpose(x_nchw, (0, 2, 3, 1)).astype(jnp.float32)   # NHWC
    N, H, W, Cin = x.shape
    assert H % 2 == 0 and W % 2 == 0, "spatial dims must be even for MaxPool2d(2)"
    Hh, Wh = H // 2, W // 2
    HW = Hh * Wh
    Cmid = w1.shape[0]
    Cout = w2.shape[0]
    assert Cmid <= CP and Cout <= CP

    B = _pick_batch_block(N, HW)

    KKC1 = K * K * Cin
    KKC2 = K * K * Cmid
    KKC1_pad = _round_up(KKC1, 128)
    KKC2_pad = _round_up(KKC2, 128)

    # Group W pairs onto the minor axis (layout plumbing for the in-kernel pool).
    x_g = x.reshape(N, H, Wh, 2 * Cin)

    # im2col weight layout: OIHW -> (KH, KW, I, O) -> (K*K*I, O); pad rows to
    # the lane-aligned contraction and cols to CP; bf16 MXU operands.
    def prep_w(w, kkc, kkc_pad, cout):
        wk = jnp.transpose(w.astype(jnp.float32), (2, 3, 1, 0)).reshape(kkc, cout)
        wk = jnp.pad(wk, ((0, kkc_pad - kkc), (0, CP - cout)))
        return wk.astype(jnp.bfloat16)

    w1_k = prep_w(w1, KKC1, KKC1_pad, Cmid)
    w2_k = prep_w(w2, KKC2, KKC2_pad, Cout)

    # Fold eval-mode BN into per-channel scale/bias (applied AFTER the ReLU,
    # matching the module order Conv -> ReLU -> BatchNorm).
    def fold_bn(g, b, m, v, c):
        inv = (g / jnp.sqrt(v + eps)).astype(jnp.float32)
        s = jnp.pad(inv, (0, CP - c)).reshape(1, CP)
        bb = jnp.pad((b - m * inv).astype(jnp.float32), (0, CP - c)).reshape(1, CP)
        return s, bb

    s1, b1 = fold_bn(g1, beta1, m1, v1, Cmid)
    s2, b2 = fold_bn(g2, beta2, m2, v2, Cout)

    kernel = functools.partial(
        _down_double_kernel, K=K, P=P, Cin=Cin, Cmid=Cmid,
        KKC1=KKC1, KKC1_pad=KKC1_pad, KKC2=KKC2, KKC2_pad=KKC2_pad)

    out = pl.pallas_call(
        kernel,
        out_shape=jax.ShapeDtypeStruct((N, HW, CP), jnp.float32),
        grid=(N // B,),
        in_specs=[
            pl.BlockSpec((B, H, Wh, 2 * Cin), lambda n: (n, 0, 0, 0)),
            pl.BlockSpec((KKC1_pad, CP), lambda n: (0, 0)),
            pl.BlockSpec((1, CP), lambda n: (0, 0)),
            pl.BlockSpec((1, CP), lambda n: (0, 0)),
            pl.BlockSpec((KKC2_pad, CP), lambda n: (0, 0)),
            pl.BlockSpec((1, CP), lambda n: (0, 0)),
            pl.BlockSpec((1, CP), lambda n: (0, 0)),
        ],
        out_specs=pl.BlockSpec((B, HW, CP), lambda n: (n, 0, 0)),
        scratch_shapes=[
            pltpu.VMEM((B, Hh + 2 * P, Wh + 2 * P, Cin), jnp.float32),
            pltpu.VMEM((B * HW, KKC1_pad), jnp.float32),
            pltpu.VMEM((B, Hh + 2 * P, Wh + 2 * P, Cmid), jnp.float32),
            pltpu.VMEM((B * HW, KKC2_pad), jnp.float32),
        ],
        compiler_params=pltpu.CompilerParams(
            dimension_semantics=("parallel",)),
    )(x_g, w1_k, s1, b1, w2_k, s2, b2)

    # Undo channel padding and return to NCHW.
    out = out[:, :, :Cout].reshape(N, Hh, Wh, Cout)
    return jnp.transpose(out, (0, 3, 1, 2))


def _reference(x, w1, g1, beta1, m1, v1, w2, g2, beta2, m2, v2,
               kernel_size=5, eps=1e-5):
    """Pure-JAX f32 reference: maxpool(2) -> (conv -> relu -> eval BN) x 2."""
    K = kernel_size
    P = K // 2
    N, C, H, W = x.shape
    xp = x.reshape(N, C, H // 2, 2, W // 2, 2).max(axis=(3, 5))

    def conv(t, w):
        return jax.lax.conv_general_dilated(
            t, w, window_strides=(1, 1), padding=((P, P), (P, P)),
            dimension_numbers=("NCHW", "OIHW", "NCHW"))

    def bn(t, g, b, m, v):
        inv = g / jnp.sqrt(v + eps)
        return t * inv[None, :, None, None] + (b - m * inv)[None, :, None, None]

    y = bn(jnp.maximum(conv(xp, w1), 0.0), g1, beta1, m1, v1)
    return bn(jnp.maximum(conv(y, w2), 0.0), g2, beta2, m2, v2)


if __name__ == "__main__":
    key = jax.random.PRNGKey(0)
    N, Cin, H, W = 2, 4, 16, 16
    Cmid = Cout = 8      # DoubleConv default: mid_channels = out_channels

    for KS in (5, 3):    # exercise both DownDouble branches (DoubleConv5 / DoubleConv3)
        ks = jax.random.split(jax.random.fold_in(key, KS), 11)
        x = jax.random.normal(ks[0], (N, Cin, H, W), jnp.float32)

        w1 = 0.1 * jax.random.normal(ks[1], (Cmid, Cin, KS, KS), jnp.float32)
        g1 = 1.0 + 0.1 * jax.random.normal(ks[2], (Cmid,), jnp.float32)
        beta1 = 0.1 * jax.random.normal(ks[3], (Cmid,), jnp.float32)
        m1 = 0.05 * jax.random.normal(ks[4], (Cmid,), jnp.float32)
        v1 = 1.0 + 0.1 * jax.random.uniform(ks[5], (Cmid,), jnp.float32)

        w2 = 0.1 * jax.random.normal(ks[6], (Cout, Cmid, KS, KS), jnp.float32)
        g2 = 1.0 + 0.1 * jax.random.normal(ks[7], (Cout,), jnp.float32)
        beta2 = 0.1 * jax.random.normal(ks[8], (Cout,), jnp.float32)
        m2 = 0.05 * jax.random.normal(ks[9], (Cout,), jnp.float32)
        v2 = 1.0 + 0.1 * jax.random.uniform(ks[10], (Cout,), jnp.float32)

        out = down_double(x, w1, g1, beta1, m1, v1, w2, g2, beta2, m2, v2,
                          kernel_size=KS)
        out = jax.block_until_ready(out)

        ref = _reference(x, w1, g1, beta1, m1, v1, w2, g2, beta2, m2, v2,
                         kernel_size=KS)
        assert out.shape == (N, Cout, H // 2, W // 2), out.shape
        err = float(jnp.max(jnp.abs(out - ref)))
        scale = float(jnp.max(jnp.abs(ref)))
        # bf16 MXU operands (f32 accumulate) -> relative tolerance vs f32 ref.
        assert err <= 3e-2 * (1.0 + scale), (KS, err, scale)

    print("KERNEL_OK")
</pallas_src>

<mosaic_0001>
module attributes {stable_mosaic.version = 11 : i64} {
  func.func @_down_double_kernel(%arg0: i32, %arg1: memref<1x16x8x8xf32, #tpu.memory_space<vmem>>, %arg2: memref<128x128xbf16, #tpu.memory_space<vmem>>, %arg3: memref<1x128xf32, #tpu.memory_space<vmem>>, %arg4: memref<1x128xf32, #tpu.memory_space<vmem>>, %arg5: memref<256x128xbf16, #tpu.memory_space<vmem>>, %arg6: memref<1x128xf32, #tpu.memory_space<vmem>>, %arg7: memref<1x128xf32, #tpu.memory_space<vmem>>, %arg8: memref<1x64x128xf32, #tpu.memory_space<vmem>>, %arg9: memref<1x12x12x4xf32, #tpu.memory_space<vmem>>, %arg10: memref<64x128xf32, #tpu.memory_space<vmem>>, %arg11: memref<1x12x12x8xf32, #tpu.memory_space<vmem>>, %arg12: memref<64x256xf32, #tpu.memory_space<vmem>>) attributes {dimension_semantics = [#tpu.dimension_semantics<parallel>], iteration_bounds = array<i64: 2>, scalar_prefetch = 0 : i64, scratch_operands = 4 : i64, tpu.core_type = #tpu.core_type<tc>, window_params = [{transform_indices = @transform_0, window_bounds = array<i64: 1, 16, 8, 8>}, {pipeline_mode = #tpu.pipeline_mode<synchronous>, transform_indices = @transform_1, window_bounds = array<i64: 128, 128>}, {pipeline_mode = #tpu.pipeline_mode<synchronous>, transform_indices = @transform_2, window_bounds = array<i64: 1, 128>}, {pipeline_mode = #tpu.pipeline_mode<synchronous>, transform_indices = @transform_3, window_bounds = array<i64: 1, 128>}, {pipeline_mode = #tpu.pipeline_mode<synchronous>, transform_indices = @transform_4, window_bounds = array<i64: 256, 128>}, {pipeline_mode = #tpu.pipeline_mode<synchronous>, transform_indices = @transform_5, window_bounds = array<i64: 1, 128>}, {pipeline_mode = #tpu.pipeline_mode<synchronous>, transform_indices = @transform_6, window_bounds = array<i64: 1, 128>}, {transform_indices = @transform_7, window_bounds = array<i64: 1, 64, 128>}]} {
    %c0 = arith.constant 0 : index
    %c0_0 = arith.constant 0 : index
    %c0_1 = arith.constant 0 : index
    %c0_2 = arith.constant 0 : index
    %0 = vector.load %arg1[%c0, %c0_0, %c0_1, %c0_2] : memref<1x16x8x8xf32, #tpu.memory_space<vmem>>, vector<1x16x8x8xf32>
    %1 = vector.extract_strided_slice %0 {offsets = [0, 0, 0, 0], sizes = [1, 16, 8, 4], strides = [1, 1, 1, 1]} : vector<1x16x8x8xf32> to vector<1x16x8x4xf32>
    %2 = vector.extract_strided_slice %0 {offsets = [0, 0, 0, 4], sizes = [1, 16, 8, 4], strides = [1, 1, 1, 1]} : vector<1x16x8x8xf32> to vector<1x16x8x4xf32>
    %3 = arith.maximumf %1, %2 : vector<1x16x8x4xf32>
    %4 = vector.shape_cast %3 : vector<1x16x8x4xf32> to vector<1x8x2x8x4xf32>
    %5 = vector.extract_strided_slice %4 {offsets = [0, 0, 0, 0, 0], sizes = [1, 8, 1, 8, 4], strides = [1, 1, 1, 1, 1]} : vector<1x8x2x8x4xf32> to vector<1x8x1x8x4xf32>
    %6 = vector.shape_cast %5 : vector<1x8x1x8x4xf32> to vector<1x8x8x4xf32>
    %7 = vector.extract_strided_slice %4 {offsets = [0, 0, 1, 0, 0], sizes = [1, 8, 1, 8, 4], strides = [1, 1, 1, 1, 1]} : vector<1x8x2x8x4xf32> to vector<1x8x1x8x4xf32>
    %8 = vector.shape_cast %7 : vector<1x8x1x8x4xf32> to vector<1x8x8x4xf32>
    %9 = arith.maximumf %6, %8 : vector<1x8x8x4xf32>
    %cst = arith.constant 0.000000e+00 : f32
    %10 = vector.broadcast %cst : f32 to vector<1x2x12x4xf32>
    %c0_3 = arith.constant 0 : index
    %c0_4 = arith.constant 0 : index
    %c0_5 = arith.constant 0 : index
    %c0_6 = arith.constant 0 : index
    %11 = vector.load %arg9[%c0_3, %c0_4, %c0_5, %c0_6] : memref<1x12x12x4xf32, #tpu.memory_space<vmem>>, vector<1x2x12x4xf32>
    tpu.vector_store %arg9[%c0_3, %c0_4, %c0_5, %c0_6], %10 {strides = array<i32>} : memref<1x12x12x4xf32, #tpu.memory_space<vmem>>, vector<1x2x12x4xf32>,
    %cst_7 = arith.constant 0.000000e+00 : f32
    %12 = vector.broadcast %cst_7 : f32 to vector<1x2x12x4xf32>
    %c0_8 = arith.constant 0 : index
    %c10 = arith.constant 10 : index
    %c0_9 = arith.constant 0 : index
    %c0_10 = arith.constant 0 : index
    %13 = vector.load %arg9[%c0_8, %c10, %c0_9, %c0_10] : memref<1x12x12x4xf32, #tpu.memory_space<vmem>>, vector<1x2x12x4xf32>
    tpu.vector_store %arg9[%c0_8, %c10, %c0_9, %c0_10], %12 {strides = array<i32>} : memref<1x12x12x4xf32, #tpu.memory_space<vmem>>, vector<1x2x12x4xf32>,
    %cst_11 = arith.constant 0.000000e+00 : f32
    %14 = vector.broadcast %cst_11 : f32 to vector<1x8x2x4xf32>
    %c0_12 = arith.constant 0 : index
    %c2 = arith.constant 2 : index
    %c0_13 = arith.constant 0 : index
    %c0_14 = arith.constant 0 : index
    %15 = vector.load %arg9[%c0_12, %c2, %c0_13, %c0_14] : memref<1x12x12x4xf32, #tpu.memory_space<vmem>>, vector<1x8x2x4xf32>
    tpu.vector_store %arg9[%c0_12, %c2, %c0_13, %c0_14], %14 {strides = array<i32>} : memref<1x12x12x4xf32, #tpu.memory_space<vmem>>, vector<1x8x2x4xf32>,
    %cst_15 = arith.constant 0.000000e+00 : f32
    %16 = vector.broadcast %cst_15 : f32 to vector<1x8x2x4xf32>
    %c0_16 = arith.constant 0 : index
    %c2_17 = arith.constant 2 : index
    %c10_18 = arith.constant 10 : index
    %c0_19 = arith.constant 0 : index
    %17 = vector.load %arg9[%c0_16, %c2_17, %c10_18, %c0_19] : memref<1x12x12x4xf32, #tpu.memory_space<vmem>>, vector<1x8x2x4xf32>
    tpu.vector_store %arg9[%c0_16, %c2_17, %c10_18, %c0_19], %16 {strides = array<i32>} : memref<1x12x12x4xf32, #tpu.memory_space<vmem>>, vector<1x8x2x4xf32>,
    %c0_20 = arith.constant 0 : index
    %c2_21 = arith.constant 2 : index
    %c2_22 = arith.constant 2 : index
    %c0_23 = arith.constant 0 : index
    %18 = vector.load %arg9[%c0_20, %c2_21, %c2_22, %c0_23] : memref<1x12x12x4xf32, #tpu.memory_space<vmem>>, vector<1x8x8x4xf32>
    tpu.vector_store %arg9[%c0_20, %c2_21, %c2_22, %c0_23], %9 {strides = array<i32>} : memref<1x12x12x4xf32, #tpu.memory_space<vmem>>, vector<1x8x8x4xf32>,
    %cst_24 = arith.constant 0.000000e+00 : f32
    %19 = vector.broadcast %cst_24 : f32 to vector<64x28xf32>
    %c0_25 = arith.constant 0 : index
    %c100 = arith.constant 100 : index
    %20 = vector.load %arg10[%c0_25, %c100] : memref<64x128xf32, #tpu.memory_space<vmem>>, vector<64x28xf32>
    tpu.vector_store %arg10[%c0_25, %c100], %19 {strides = array<i32>} : memref<64x128xf32, #tpu.memory_space<vmem>>, vector<64x28xf32>,
    %cst_26 = arith.constant 0.000000e+00 : f32
    %21 = vector.broadcast %cst_26 : f32 to vector<64x56xf32>
    %c0_27 = arith.constant 0 : index
    %c200 = arith.constant 200 : index
    %22 = vector.load %arg12[%c0_27, %c200] : memref<64x256xf32, #tpu.memory_space<vmem>>, vector<64x56xf32>
    tpu.vector_store %arg12[%c0_27, %c200], %21 {strides = array<i32>} : memref<64x256xf32, #tpu.memory_space<vmem>>, vector<64x56xf32>,
    %c0_28 = arith.constant 0 : index
    %c0_29 = arith.constant 0 : index
    %c0_30 = arith.constant 0 : index
    %c0_31 = arith.constant 0 : index
    %23 = vector.load %arg9[%c0_28, %c0_29, %c0_30, %c0_31] : memref<1x12x12x4xf32, #tpu.memory_space<vmem>>, vector<1x8x8x4xf32>
    %24 = vector.shape_cast %23 : vector<1x8x8x4xf32> to vector<8x8x4xf32>
    %25 = vector.shape_cast %24 : vector<8x8x4xf32> to vector<64x4xf32>
    %c0_32 = arith.constant 0 : index
    %c0_33 = arith.constant 0 : index
    %26 = vector.load %arg10[%c0_32, %c0_33] : memref<64x128xf32, #tpu.memory_space<vmem>>, vector<64x4xf32>
    tpu.vector_store %arg10[%c0_32, %c0_33], %25 {strides = array<i32>} : memref<64x128xf32, #tpu.memory_space<vmem>>, vector<64x4xf32>,
    %c0_34 = arith.constant 0 : index
    %c0_35 = arith.constant 0 : index
    %c1 = arith.constant 1 : index
    %c0_36 = arith.constant 0 : index
    %27 = vector.load %arg9[%c0_34, %c0_35, %c1, %c0_36] : memref<1x12x12x4xf32, #tpu.memory_space<vmem>>, vector<1x8x8x4xf32>
    %28 = vector.shape_cast %27 : vector<1x8x8x4xf32> to vector<8x8x4xf32>
    %29 = vector.shape_cast %28 : vector<8x8x4xf32> to vector<64x4xf32>
    %c0_37 = arith.constant 0 : index
    %c4 = arith.constant 4 : index
    %30 = vector.load %arg10[%c0_37, %c4] : memref<64x128xf32, #tpu.memory_space<vmem>>, vector<64x4xf32>
    tpu.vector_store %arg10[%c0_37, %c4], %29 {strides = array<i32>} : memref<64x128xf32, #tpu.memory_space<vmem>>, vector<64x4xf32>,
    %c0_38 = arith.constant 0 : index
    %c0_39 = arith.constant 0 : index
    %c2_40 = arith.constant 2 : index
    %c0_41 = arith.constant 0 : index
    %31 = vector.load %arg9[%c0_38, %c0_39, %c2_40, %c0_41] : memref<1x12x12x4xf32, #tpu.memory_space<vmem>>, vector<1x8x8x4xf32>
    %32 = vector.shape_cast %31 : vector<1x8x8x4xf32> to vector<8x8x4xf32>
    %33 = vector.shape_cast %32 : vector<8x8x4xf32> to vector<64x4xf32>
    %c0_42 = arith.constant 0 : index
    %c8 = arith.constant 8 : index
    %34 = vector.load %arg10[%c0_42, %c8] : memref<64x128xf32, #tpu.memory_space<vmem>>, vector<64x4xf32>
    tpu.vector_store %arg10[%c0_42, %c8], %33 {strides = array<i32>} : memref<64x128xf32, #tpu.memory_space<vmem>>, vector<64x4xf32>,
    %c0_43 = arith.constant 0 : index
    %c0_44 = arith.constant 0 : index
    %c3 = arith.constant 3 : index
    %c0_45 = arith.constant 0 : index
    %35 = vector.load %arg9[%c0_43, %c0_44, %c3, %c0_45] : memref<1x12x12x4xf32, #tpu.memory_space<vmem>>, vector<1x8x8x4xf32>
    %36 = vector.shape_cast %35 : vector<1x8x8x4xf32> to vector<8x8x4xf32>
    %37 = vector.shape_cast %36 : vector<8x8x4xf32> to vector<64x4xf32>
    %c0_46 = arith.constant 0 : index
    %c12 = arith.constant 12 : index
    %38 = vector.load %arg10[%c0_46, %c12] : memref<64x128xf32, #tpu.memory_space<vmem>>, vector<64x4xf32>
    tpu.vector_store %arg10[%c0_46, %c12], %37 {strides = array<i32>} : memref<64x128xf32, #tpu.memory_space<vmem>>, vector<64x4xf32>,
    %c0_47 = arith.constant 0 : index
    %c0_48 = arith.constant 0 : index
    %c4_49 = arith.constant 4 : index
    %c0_50 = arith.constant 0 : index
    %39 = vector.load %arg9[%c0_47, %c0_48, %c4_49, %c0_50] : memref<1x12x12x4xf32, #tpu.memory_space<vmem>>, vector<1x8x8x4xf32>
    %40 = vector.shape_cast %39 : vector<1x8x8x4xf32> to vector<8x8x4xf32>
    %41 = vector.shape_cast %40 : vector<8x8x4xf32> to vector<64x4xf32>
    %c0_51 = arith.constant 0 : index
    %c16 = arith.constant 16 : index
    %42 = vector.load %arg10[%c0_51, %c16] : memref<64x128xf32, #tpu.memory_space<vmem>>, vector<64x4xf32>
    tpu.vector_store %arg10[%c0_51, %c16], %41 {strides = array<i32>} : memref<64x128xf32, #tpu.memory_space<vmem>>, vector<64x4xf32>,
    %c0_52 = arith.constant 0 : index
    %c1_53 = arith.constant 1 : index
    %c0_54 = arith.constant 0 : index
    %c0_55 = arith.constant 0 : index
    %43 = vector.load %arg9[%c0_52, %c1_53, %c0_54, %c0_55] : memref<1x12x12x4xf32, #tpu.memory_space<vmem>>, vector<1x8x8x4xf32>
    %44 = vector.shape_cast %43 : vector<1x8x8x4xf32> to vector<8x8x4xf32>
    %45 = vector.shape_cast %44 : vector<8x8x4xf32> to vector<64x4xf32>
    %c0_56 = arith.constant 0 : index
    %c20 = arith.constant 20 : index
    %46 = vector.load %arg10[%c0_56, %c20] : memref<64x128xf32, #tpu.memory_space<vmem>>, vector<64x4xf32>
    tpu.vector_store %arg10[%c0_56, %c20], %45 {strides = array<i32>} : memref<64x128xf32, #tpu.memory_space<vmem>>, vector<64x4xf32>,
    %c0_57 = arith.constant 0 : index
    %c1_58 = arith.constant 1 : index
    %c1_59 = arith.constant 1 : index
    %c0_60 = arith.constant 0 : index
    %47 = vector.load %arg9[%c0_57, %c1_58, %c1_59, %c0_60] : memref<1x12x12x4xf32, #tpu.memory_space<vmem>>, vector<1x8x8x4xf32>
    %48 = vector.shape_cast %47 : vector<1x8x8x4xf32> to vector<8x8x4xf32>
    %49 = vector.shape_cast %48 : vector<8x8x4xf32> to vector<64x4xf32>
    %c0_61 = arith.constant 0 : index
    %c24 = arith.constant 24 : index
    %50 = vector.load %arg10[%c0_61, %c24] : memref<64x128xf32, #tpu.memory_space<vmem>>, vector<64x4xf32>
    tpu.vector_store %arg10[%c0_61, %c24], %49 {strides = array<i32>} : memref<64x128xf32, #tpu.memory_space<vmem>>, vector<64x4xf32>,
    %c0_62 = arith.constant 0 : index
    %c1_63 = arith.constant 1 : index
    %c2_64 = arith.constant 2 : index
    %c0_65 = arith.constant 0 : index
    %51 = vector.load %arg9[%c0_62, %c1_63, %c2_64, %c0_65] : memref<1x12x12x4xf32, #tpu.memory_space<vmem>>, vector<1x8x8x4xf32>
    %52 = vector.shape_cast %51 : vector<1x8x8x4xf32> to vector<8x8x4xf32>
    %53 = vector.shape_cast %52 : vector<8x8x4xf32> to vector<64x4xf32>
    %c0_66 = arith.constant 0 : index
    %c28 = arith.constant 28 : index
    %54 = vector.load %arg10[%c0_66, %c28] : memref<64x128xf32, #tpu.memory_space<vmem>>, vector<64x4xf32>
    tpu.vector_store %arg10[%c0_66, %c28], %53 {strides = array<i32>} : memref<64x128xf32, #tpu.memory_space<vmem>>, vector<64x4xf32>,
    %c0_67 = arith.constant 0 : index
    %c1_68 = arith.constant 1 : index
    %c3_69 = arith.constant 3 : index
    %c0_70 = arith.constant 0 : index
    %55 = vector.load %arg9[%c0_67, %c1_68, %c3_69, %c0_70] : memref<1x12x12x4xf32, #tpu.memory_space<vmem>>, vector<1x8x8x4xf32>
    %56 = vector.shape_cast %55 : vector<1x8x8x4xf32> to vector<8x8x4xf32>
    %57 = vector.shape_cast %56 : vector<8x8x4xf32> to vector<64x4xf32>
    %c0_71 = arith.constant 0 : index
    %c32 = arith.constant 32 : index
    %58 = vector.load %arg10[%c0_71, %c32] : memref<64x128xf32, #tpu.memory_space<vmem>>, vector<64x4xf32>
    tpu.vector_store %arg10[%c0_71, %c32], %57 {strides = array<i32>} : memref<64x128xf32, #tpu.memory_space<vmem>>, vector<64x4xf32>,
    %c0_72 = arith.constant 0 : index
    %c1_73 = arith.constant 1 : index
    %c4_74 = arith.constant 4 : index
    %c0_75 = arith.constant 0 : index
    %59 = vector.load %arg9[%c0_72, %c1_73, %c4_74, %c0_75] : memref<1x12x12x4xf32, #tpu.memory_space<vmem>>, vector<1x8x8x4xf32>
    %60 = vector.shape_cast %59 : vector<1x8x8x4xf32> to vector<8x8x4xf32>
    %61 = vector.shape_cast %60 : vector<8x8x4xf32> to vector<64x4xf32>
    %c0_76 = arith.constant 0 : index
    %c36 = arith.constant 36 : index
    %62 = vector.load %arg10[%c0_76, %c36] : memref<64x128xf32, #tpu.memory_space<vmem>>, vector<64x4xf32>
    tpu.vector_store %arg10[%c0_76, %c36], %61 {strides = array<i32>} : memref<64x128xf32, #tpu.memory_space<vmem>>, vector<64x4xf32>,
    %c0_77 = arith.constant 0 : index
    %c2_78 = arith.constant 2 : index
    %c0_79 = arith.constant 0 : index
    %c0_80 = arith.constant 0 : index
    %63 = vector.load %arg9[%c0_77, %c2_78, %c0_79, %c0_80] : memref<1x12x12x4xf32, #tpu.memory_space<vmem>>, vector<1x8x8x4xf32>
    %64 = vector.shape_cast %63 : vector<1x8x8x4xf32> to vector<8x8x4xf32>
    %65 = vector.shape_cast %64 : vector<8x8x4xf32> to vector<64x4xf32>
    %c0_81 = arith.constant 0 : index
    %c40 = arith.constant 40 : index
    %66 = vector.load %arg10[%c0_81, %c40] : memref<64x128xf32, #tpu.memory_space<vmem>>, vector<64x4xf32>
    tpu.vector_store %arg10[%c0_81, %c40], %65 {strides = array<i32>} : memref<64x128xf32, #tpu.memory_space<vmem>>, vector<64x4xf32>,
    %c0_82 = arith.constant 0 : index
    %c2_83 = arith.constant 2 : index
    %c1_84 = arith.constant 1 : index
    %c0_85 = arith.constant 0 : index
    %67 = vector.load %arg9[%c0_82, %c2_83, %c1_84, %c0_85] : memref<1x12x12x4xf32, #tpu.memory_space<vmem>>, vector<1x8x8x4xf32>
    %68 = vector.shape_cast %67 : vector<1x8x8x4xf32> to vector<8x8x4xf32>
    %69 = vector.shape_cast %68 : vector<8x8x4xf32> to vector<64x4xf32>
    %c0_86 = arith.constant 0 : index
    %c44 = arith.constant 44 : index
    %70 = vector.load %arg10[%c0_86, %c44] : memref<64x128xf32, #tpu.memory_space<vmem>>, vector<64x4xf32>
    tpu.vector_store %arg10[%c0_86, %c44], %69 {strides = array<i32>} : memref<64x128xf32, #tpu.memory_space<vmem>>, vector<64x4xf32>,
    %c0_87 = arith.constant 0 : index
    %c2_88 = arith.constant 2 : index
    %c2_89 = arith.constant 2 : index
    %c0_90 = arith.constant 0 : index
    %71 = vector.load %arg9[%c0_87, %c2_88, %c2_89, %c0_90] : memref<1x12x12x4xf32, #tpu.memory_space<vmem>>, vector<1x8x8x4xf32>
    %72 = vector.shape_cast %71 : vector<1x8x8x4xf32> to vector<8x8x4xf32>
    %73 = vector.shape_cast %72 : vector<8x8x4xf32> to vector<64x4xf32>
    %c0_91 = arith.constant 0 : index
    %c48 = arith.constant 48 : index
    %74 = vector.load %arg10[%c0_91, %c48] : memref<64x128xf32, #tpu.memory_space<vmem>>, vector<64x4xf32>
    tpu.vector_store %arg10[%c0_91, %c48], %73 {strides = array<i32>} : memref<64x128xf32, #tpu.memory_space<vmem>>, vector<64x4xf32>,
    %c0_92 = arith.constant 0 : index
    %c2_93 = arith.constant 2 : index
    %c3_94 = arith.constant 3 : index
    %c0_95 = arith.constant 0 : index
    %75 = vector.load %arg9[%c0_92, %c2_93, %c3_94, %c0_95] : memref<1x12x12x4xf32, #tpu.memory_space<vmem>>, vector<1x8x8x4xf32>
    %76 = vector.shape_cast %75 : vector<1x8x8x4xf32> to vector<8x8x4xf32>
    %77 = vector.shape_cast %76 : vector<8x8x4xf32> to vector<64x4xf32>
    %c0_96 = arith.constant 0 : index
    %c52 = arith.constant 52 : index
    %78 = vector.load %arg10[%c0_96, %c52] : memref<64x128xf32, #tpu.memory_space<vmem>>, vector<64x4xf32>
    tpu.vector_store %arg10[%c0_96, %c52], %77 {strides = array<i32>} : memref<64x128xf32, #tpu.memory_space<vmem>>, vector<64x4xf32>,
    %c0_97 = arith.constant 0 : index
    %c2_98 = arith.constant 2 : index
    %c4_99 = arith.constant 4 : index
    %c0_100 = arith.constant 0 : index
    %79 = vector.load %arg9[%c0_97, %c2_98, %c4_99, %c0_100] : memref<1x12x12x4xf32, #tpu.memory_space<vmem>>, vector<1x8x8x4xf32>
    %80 = vector.shape_cast %79 : vector<1x8x8x4xf32> to vector<8x8x4xf32>
    %81 = vector.shape_cast %80 : vector<8x8x4xf32> to vector<64x4xf32>
    %c0_101 = arith.constant 0 : index
    %c56 = arith.constant 56 : index
    %82 = vector.load %arg10[%c0_101, %c56] : memref<64x128xf32, #tpu.memory_space<vmem>>, vector<64x4xf32>
    tpu.vector_store %arg10[%c0_101, %c56], %81 {strides = array<i32>} : memref<64x128xf32, #tpu.memory_space<vmem>>, vector<64x4xf32>,
    %c0_102 = arith.constant 0 : index
    %c3_103 = arith.constant 3 : index
    %c0_104 = arith.constant 0 : index
    %c0_105 = arith.constant 0 : index
    %83 = vector.load %arg9[%c0_102, %c3_103, %c0_104, %c0_105] : memref<1x12x12x4xf32, #tpu.memory_space<vmem>>, vector<1x8x8x4xf32>
    %84 = vector.shape_cast %83 : vector<1x8x8x4xf32> to vector<8x8x4xf32>
    %85 = vector.shape_cast %84 : vector<8x8x4xf32> to vector<64x4xf32>
    %c0_106 = arith.constant 0 : index
    %c60 = arith.constant 60 : index
    %86 = vector.load %arg10[%c0_106, %c60] : memref<64x128xf32, #tpu.memory_space<vmem>>, vector<64x4xf32>
    tpu.vector_store %arg10[%c0_106, %c60], %85 {strides = array<i32>} : memref<64x128xf32, #tpu.memory_space<vmem>>, vector<64x4xf32>,
    %c0_107 = arith.constant 0 : index
    %c3_108 = arith.constant 3 : index
    %c1_109 = arith.constant 1 : index
    %c0_110 = arith.constant 0 : index
    %87 = vector.load %arg9[%c0_107, %c3_108, %c1_109, %c0_110] : memref<1x12x12x4xf32, #tpu.memory_space<vmem>>, vector<1x8x8x4xf32>
    %88 = vector.shape_cast %87 : vector<1x8x8x4xf32> to vector<8x8x4xf32>
    %89 = vector.shape_cast %88 : vector<8x8x4xf32> to vector<64x4xf32>
    %c0_111 = arith.constant 0 : index
    %c64 = arith.constant 64 : index
    %90 = vector.load %arg10[%c0_111, %c64] : memref<64x128xf32, #tpu.memory_space<vmem>>, vector<64x4xf32>
    tpu.vector_store %arg10[%c0_111, %c64], %89 {strides = array<i32>} : memref<64x128xf32, #tpu.memory_space<vmem>>, vector<64x4xf32>,
    %c0_112 = arith.constant 0 : index
    %c3_113 = arith.constant 3 : index
    %c2_114 = arith.constant 2 : index
    %c0_115 = arith.constant 0 : index
    %91 = vector.load %arg9[%c0_112, %c3_113, %c2_114, %c0_115] : memref<1x12x12x4xf32, #tpu.memory_space<vmem>>, vector<1x8x8x4xf32>
    %92 = vector.shape_cast %91 : vector<1x8x8x4xf32> to vector<8x8x4xf32>
    %93 = vector.shape_cast %92 : vector<8x8x4xf32> to vector<64x4xf32>
    %c0_116 = arith.constant 0 : index
    %c68 = arith.constant 68 : index
    %94 = vector.load %arg10[%c0_116, %c68] : memref<64x128xf32, #tpu.memory_space<vmem>>, vector<64x4xf32>
    tpu.vector_store %arg10[%c0_116, %c68], %93 {strides = array<i32>} : memref<64x128xf32, #tpu.memory_space<vmem>>, vector<64x4xf32>,
    %c0_117 = arith.constant 0 : index
    %c3_118 = arith.constant 3 : index
    %c3_119 = arith.constant 3 : index
    %c0_120 = arith.constant 0 : index
    %95 = vector.load %arg9[%c0_117, %c3_118, %c3_119, %c0_120] : memref<1x12x12x4xf32, #tpu.memory_space<vmem>>, vector<1x8x8x4xf32>
    %96 = vector.shape_cast %95 : vector<1x8x8x4xf32> to vector<8x8x4xf32>
    %97 = vector.shape_cast %96 : vector<8x8x4xf32> to vector<64x4xf32>
    %c0_121 = arith.constant 0 : index
    %c72 = arith.constant 72 : index
    %98 = vector.load %arg10[%c0_121, %c72] : memref<64x128xf32, #tpu.memory_space<vmem>>, vector<64x4xf32>
    tpu.vector_store %arg10[%c0_121, %c72], %97 {strides = array<i32>} : memref<64x128xf32, #tpu.memory_space<vmem>>, vector<64x4xf32>,
    %c0_122 = arith.constant 0 : index
    %c3_123 = arith.constant 3 : index
    %c4_124 = arith.constant 4 : index
    %c0_125 = arith.constant 0 : index
    %99 = vector.load %arg9[%c0_122, %c3_123, %c4_124, %c0_125] : memref<1x12x12x4xf32, #tpu.memory_space<vmem>>, vector<1x8x8x4xf32>
    %100 = vector.shape_cast %99 : vector<1x8x8x4xf32> to vector<8x8x4xf32>
    %101 = vector.shape_cast %100 : vector<8x8x4xf32> to vector<64x4xf32>
    %c0_126 = arith.constant 0 : index
    %c76 = arith.constant 76 : index
    %102 = vector.load %arg10[%c0_126, %c76] : memref<64x128xf32, #tpu.memory_space<vmem>>, vector<64x4xf32>
    tpu.vector_store %arg10[%c0_126, %c76], %101 {strides = array<i32>} : memref<64x128xf32, #tpu.memory_space<vmem>>, vector<64x4xf32>,
    %c0_127 = arith.constant 0 : index
    %c4_128 = arith.constant 4 : index
    %c0_129 = arith.constant 0 : index
    %c0_130 = arith.constant 0 : index
    %103 = vector.load %arg9[%c0_127, %c4_128, %c0_129, %c0_130] : memref<1x12x12x4xf32, #tpu.memory_space<vmem>>, vector<1x8x8x4xf32>
    %104 = vector.shape_cast %103 : vector<1x8x8x4xf32> to vector<8x8x4xf32>
    %105 = vector.shape_cast %104 : vector<8x8x4xf32> to vector<64x4xf32>
    %c0_131 = arith.constant 0 : index
    %c80 = arith.constant 80 : index
    %106 = vector.load %arg10[%c0_131, %c80] : memref<64x128xf32, #tpu.memory_space<vmem>>, vector<64x4xf32>
    tpu.vector_store %arg10[%c0_131, %c80], %105 {strides = array<i32>} : memref<64x128xf32, #tpu.memory_space<vmem>>, vector<64x4xf32>,
    %c0_132 = arith.constant 0 : index
    %c4_133 = arith.constant 4 : index
    %c1_134 = arith.constant 1 : index
    %c0_135 = arith.constant 0 : index
    %107 = vector.load %arg9[%c0_132, %c4_133, %c1_134, %c0_135] : memref<1x12x12x4xf32, #tpu.memory_space<vmem>>, vector<1x8x8x4xf32>
    %108 = vector.shape_cast %107 : vector<1x8x8x4xf32> to vector<8x8x4xf32>
    %109 = vector.shape_cast %108 : vector<8x8x4xf32> to vector<64x4xf32>
    %c0_136 = arith.constant 0 : index
    %c84 = arith.constant 84 : index
    %110 = vector.load %arg10[%c0_136, %c84] : memref<64x128xf32, #tpu.memory_space<vmem>>, vector<64x4xf32>
    tpu.vector_store %arg10[%c0_136, %c84], %109 {strides = array<i32>} : memref<64x128xf32, #tpu.memory_space<vmem>>, vector<64x4xf32>,
    %c0_137 = arith.constant 0 : index
    %c4_138 = arith.constant 4 : index
    %c2_139 = arith.constant 2 : index
    %c0_140 = arith.constant 0 : index
    %111 = vector.load %arg9[%c0_137, %c4_138, %c2_139, %c0_140] : memref<1x12x12x4xf32, #tpu.memory_space<vmem>>, vector<1x8x8x4xf32>
    %112 = vector.shape_cast %111 : vector<1x8x8x4xf32> to vector<8x8x4xf32>
    %113 = vector.shape_cast %112 : vector<8x8x4xf32> to vector<64x4xf32>
    %c0_141 = arith.constant 0 : index
    %c88 = arith.constant 88 : index
    %114 = vector.load %arg10[%c0_141, %c88] : memref<64x128xf32, #tpu.memory_space<vmem>>, vector<64x4xf32>
    tpu.vector_store %arg10[%c0_141, %c88], %113 {strides = array<i32>} : memref<64x128xf32, #tpu.memory_space<vmem>>, vector<64x4xf32>,
    %c0_142 = arith.constant 0 : index
    %c4_143 = arith.constant 4 : index
    %c3_144 = arith.constant 3 : index
    %c0_145 = arith.constant 0 : index
    %115 = vector.load %arg9[%c0_142, %c4_143, %c3_144, %c0_145] : memref<1x12x12x4xf32, #tpu.memory_space<vmem>>, vector<1x8x8x4xf32>
    %116 = vector.shape_cast %115 : vector<1x8x8x4xf32> to vector<8x8x4xf32>
    %117 = vector.shape_cast %116 : vector<8x8x4xf32> to vector<64x4xf32>
    %c0_146 = arith.constant 0 : index
    %c92 = arith.constant 92 : index
    %118 = vector.load %arg10[%c0_146, %c92] : memref<64x128xf32, #tpu.memory_space<vmem>>, vector<64x4xf32>
    tpu.vector_store %arg10[%c0_146, %c92], %117 {strides = array<i32>} : memref<64x128xf32, #tpu.memory_space<vmem>>, vector<64x4xf32>,
    %c0_147 = arith.constant 0 : index
    %c4_148 = arith.constant 4 : index
    %c4_149 = arith.constant 4 : index
    %c0_150 = arith.constant 0 : index
    %119 = vector.load %arg9[%c0_147, %c4_148, %c4_149, %c0_150] : memref<1x12x12x4xf32, #tpu.memory_space<vmem>>, vector<1x8x8x4xf32>
    %120 = vector.shape_cast %119 : vector<1x8x8x4xf32> to vector<8x8x4xf32>
    %121 = vector.shape_cast %120 : vector<8x8x4xf32> to vector<64x4xf32>
    %c0_151 = arith.constant 0 : index
    %c96 = arith.constant 96 : index
    %122 = vector.load %arg10[%c0_151, %c96] : memref<64x128xf32, #tpu.memory_space<vmem>>, vector<64x4xf32>
    tpu.vector_store %arg10[%c0_151, %c96], %121 {strides = array<i32>} : memref<64x128xf32, #tpu.memory_space<vmem>>, vector<64x4xf32>,
    %c0_152 = arith.constant 0 : index
    %c0_153 = arith.constant 0 : index
    %123 = vector.load %arg10[%c0_152, %c0_153] : memref<64x128xf32, #tpu.memory_space<vmem>>, vector<64x128xf32>
    %124 = arith.truncf %123 : vector<64x128xf32> to vector<64x128xbf16>
    %c0_154 = arith.constant 0 : index
    %c0_155 = arith.constant 0 : index
    %125 = vector.load %arg2[%c0_154, %c0_155] : memref<128x128xbf16, #tpu.memory_space<vmem>>, vector<128x128xbf16>
    %cst_156 = arith.constant dense<0.000000e+00> : vector<64x128xf32>
    %126 = tpu.matmul %124, %125, %cst_156 {dimension_numbers = #tpu.dot_dimension_numbers<[1], [0], [0], [1], [0, 0, 1, 1], [], []>} : vector<64x128xbf16>, vector<128x128xbf16>, vector<64x128xf32> -> vector<64x128xf32>
    %cst_157 = arith.constant 0.000000e+00 : f32
    %127 = vector.broadcast %cst_157 : f32 to vector<64x128xf32>
    %128 = arith.maximumf %126, %127 : vector<64x128xf32>
    %c0_158 = arith.constant 0 : index
    %c0_159 = arith.constant 0 : index
    %129 = vector.load %arg3[%c0_158, %c0_159] : memref<1x128xf32, #tpu.memory_space<vmem>>, vector<1x128xf32>
    %130 = vector.broadcast %129 : vector<1x128xf32> to vector<64x128xf32>
    %131 = arith.mulf %128, %130 : vector<64x128xf32>
    %c0_160 = arith.constant 0 : index
    %c0_161 = arith.constant 0 : index
    %132 = vector.load %arg4[%c0_160, %c0_161] : memref<1x128xf32, #tpu.memory_space<vmem>>, vector<1x128xf32>
    %133 = vector.broadcast %132 : vector<1x128xf32> to vector<64x128xf32>
    %134 = arith.addf %131, %133 : vector<64x128xf32>
    %cst_162 = arith.constant 0.000000e+00 : f32
    %135 = vector.broadcast %cst_162 : f32 to vector<1x2x12x8xf32>
    %c0_163 = arith.constant 0 : index
    %c0_164 = arith.constant 0 : index
    %c0_165 = arith.constant 0 : index
    %c0_166 = arith.constant 0 : index
    %136 = vector.load %arg11[%c0_163, %c0_164, %c0_165, %c0_166] : memref<1x12x12x8xf32, #tpu.memory_space<vmem>>, vector<1x2x12x8xf32>
    tpu.vector_store %arg11[%c0_163, %c0_164, %c0_165, %c0_166], %135 {strides = array<i32>} : memref<1x12x12x8xf32, #tpu.memory_space<vmem>>, vector<1x2x12x8xf32>,
    %cst_167 = arith.constant 0.000000e+00 : f32
    %137 = vector.broadcast %cst_167 : f32 to vector<1x2x12x8xf32>
    %c0_168 = arith.constant 0 : index
    %c10_169 = arith.constant 10 : index
    %c0_170 = arith.constant 0 : index
    %c0_171 = arith.constant 0 : index
    %138 = vector.load %arg11[%c0_168, %c10_169, %c0_170, %c0_171] : memref<1x12x12x8xf32, #tpu.memory_space<vmem>>, vector<1x2x12x8xf32>
    tpu.vector_store %arg11[%c0_168, %c10_169, %c0_170, %c0_171], %137 {strides = array<i32>} : memref<1x12x12x8xf32, #tpu.memory_space<vmem>>, vector<1x2x12x8xf32>,
    %cst_172 = arith.constant 0.000000e+00 : f32
    %139 = vector.broadcast %cst_172 : f32 to vector<1x8x2x8xf32>
    %c0_173 = arith.constant 0 : index
    %c2_174 = arith.constant 2 : index
    %c0_175 = arith.constant 0 : index
    %c0_176 = arith.constant 0 : index
    %140 = vector.load %arg11[%c0_173, %c2_174, %c0_175, %c0_176] : memref<1x12x12x8xf32, #tpu.memory_space<vmem>>, vector<1x8x2x8xf32>
    tpu.vector_store %arg11[%c0_173, %c2_174, %c0_175, %c0_176], %139 {strides = array<i32>} : memref<1x12x12x8xf32, #tpu.memory_space<vmem>>, vector<1x8x2x8xf32>,
    %cst_177 = arith.constant 0.000000e+00 : f32
    %141 = vector.broadcast %cst_177 : f32 to vector<1x8x2x8xf32>
    %c0_178 = arith.constant 0 : index
    %c2_179 = arith.constant 2 : index
    %c10_180 = arith.constant 10 : index
    %c0_181 = arith.constant 0 : index
    %142 = vector.load %arg11[%c0_178, %c2_179, %c10_180, %c0_181] : memref<1x12x12x8xf32, #tpu.memory_space<vmem>>, vector<1x8x2x8xf32>
    tpu.vector_store %arg11[%c0_178, %c2_179, %c10_180, %c0_181], %141 {strides = array<i32>} : memref<1x12x12x8xf32, #tpu.memory_space<vmem>>, vector<1x8x2x8xf32>,
    %143 = vector.extract_strided_slice %134 {offsets = [0, 0], sizes = [64, 8], strides = [1, 1]} : vector<64x128xf32> to vector<64x8xf32>
    %144 = vector.shape_cast %143 : vector<64x8xf32> to vector<8x8x8xf32>
    %c0_182 = arith.constant 0 : index
    %c2_183 = arith.constant 2 : index
    %c2_184 = arith.constant 2 : index
    %c0_185 = arith.constant 0 : index
    %145 = vector.load %arg11[%c0_182, %c2_183, %c2_184, %c0_185] : memref<1x12x12x8xf32, #tpu.memory_space<vmem>>, vector<1x8x8x8xf32>
    %146 = vector.shape_cast %145 : vector<1x8x8x8xf32> to vector<8x8x8xf32>
    %147 = vector.shape_cast %144 : vector<8x8x8xf32> to vector<1x8x8x8xf32>
    tpu.vector_store %arg11[%c0_182, %c2_183, %c2_184, %c0_185], %147 {strides = array<i32>} : memref<1x12x12x8xf32, #tpu.memory_space<vmem>>, vector<1x8x8x8xf32>,
    %c0_186 = arith.constant 0 : index
    %c0_187 = arith.constant 0 : index
    %c0_188 = arith.constant 0 : index
    %c0_189 = arith.constant 0 : index
    %148 = vector.load %arg11[%c0_186, %c0_187, %c0_188, %c0_189] : memref<1x12x12x8xf32, #tpu.memory_space<vmem>>, vector<1x8x8x8xf32>
    %149 = vector.shape_cast %148 : vector<1x8x8x8xf32> to vector<8x8x8xf32>
    %150 = vector.shape_cast %149 : vector<8x8x8xf32> to vector<64x8xf32>
    %c0_190 = arith.constant 0 : index
    %c0_191 = arith.constant 0 : index
    %151 = vector.load %arg12[%c0_190, %c0_191] : memref<64x256xf32, #tpu.memory_space<vmem>>, vector<64x8xf32>
    tpu.vector_store %arg12[%c0_190, %c0_191], %150 {strides = array<i32>} : memref<64x256xf32, #tpu.memory_space<vmem>>, vector<64x8xf32>,
    %c0_192 = arith.constant 0 : index
    %c0_193 = arith.constant 0 : index
    %c1_194 = arith.constant 1 : index
    %c0_195 = arith.constant 0 : index
    %152 = vector.load %arg11[%c0_192, %c0_193, %c1_194, %c0_195] : memref<1x12x12x8xf32, #tpu.memory_space<vmem>>, vector<1x8x8x8xf32>
    %153 = vector.shape_cast %152 : vector<1x8x8x8xf32> to vector<8x8x8xf32>
    %154 = vector.shape_cast %153 : vector<8x8x8xf32> to vector<64x8xf32>
    %c0_196 = arith.constant 0 : index
    %c8_197 = arith.constant 8 : index
    %155 = vector.load %arg12[%c0_196, %c8_197] : memref<64x256xf32, #tpu.memory_space<vmem>>, vector<64x8xf32>
    tpu.vector_store %arg12[%c0_196, %c8_197], %154 {strides = array<i32>} : memref<64x256xf32, #tpu.memory_space<vmem>>, vector<64x8xf32>,
    %c0_198 = arith.constant 0 : index
    %c0_199 = arith.constant 0 : index
    %c2_200 = arith.constant 2 : index
    %c0_201 = arith.constant 0 : index
    %156 = vector.load %arg11[%c0_198, %c0_199, %c2_200, %c0_201] : memref<1x12x12x8xf32, #tpu.memory_space<vmem>>, vector<1x8x8x8xf32>
    %157 = vector.shape_cast %156 : vector<1x8x8x8xf32> to vector<8x8x8xf32>
    %158 = vector.shape_cast %157 : vector<8x8x8xf32> to vector<64x8xf32>
    %c0_202 = arith.constant 0 : index
    %c16_203 = arith.constant 16 : index
    %159 = vector.load %arg12[%c0_202, %c16_203] : memref<64x256xf32, #tpu.memory_space<vmem>>, vector<64x8xf32>
    tpu.vector_store %arg12[%c0_202, %c16_203], %158 {strides = array<i32>} : memref<64x256xf32, #tpu.memory_space<vmem>>, vector<64x8xf32>,
    %c0_204 = arith.constant 0 : index
    %c0_205 = arith.constant 0 : index
    %c3_206 = arith.constant 3 : index
    %c0_207 = arith.constant 0 : index
    %160 = vector.load %arg11[%c0_204, %c0_205, %c3_206, %c0_207] : memref<1x12x12x8xf32, #tpu.memory_space<vmem>>, vector<1x8x8x8xf32>
    %161 = vector.shape_cast %160 : vector<1x8x8x8xf32> to vector<8x8x8xf32>
    %162 = vector.shape_cast %161 : vector<8x8x8xf32> to vector<64x8xf32>
    %c0_208 = arith.constant 0 : index
    %c24_209 = arith.constant 24 : index
    %163 = vector.load %arg12[%c0_208, %c24_209] : memref<64x256xf32, #tpu.memory_space<vmem>>, vector<64x8xf32>
    tpu.vector_store %arg12[%c0_208, %c24_209], %162 {strides = array<i32>} : memref<64x256xf32, #tpu.memory_space<vmem>>, vector<64x8xf32>,
    %c0_210 = arith.constant 0 : index
    %c0_211 = arith.constant 0 : index
    %c4_212 = arith.constant 4 : index
    %c0_213 = arith.constant 0 : index
    %164 = vector.load %arg11[%c0_210, %c0_211, %c4_212, %c0_213] : memref<1x12x12x8xf32, #tpu.memory_space<vmem>>, vector<1x8x8x8xf32>
    %165 = vector.shape_cast %164 : vector<1x8x8x8xf32> to vector<8x8x8xf32>
    %166 = vector.shape_cast %165 : vector<8x8x8xf32> to vector<64x8xf32>
    %c0_214 = arith.constant 0 : index
    %c32_215 = arith.constant 32 : index
    %167 = vector.load %arg12[%c0_214, %c32_215] : memref<64x256xf32, #tpu.memory_space<vmem>>, vector<64x8xf32>
    tpu.vector_store %arg12[%c0_214, %c32_215], %166 {strides = array<i32>} : memref<64x256xf32, #tpu.memory_space<vmem>>, vector<64x8xf32>,
    %c0_216 = arith.constant 0 : index
    %c1_217 = arith.constant 1 : index
    %c0_218 = arith.constant 0 : index
    %c0_219 = arith.constant 0 : index
    %168 = vector.load %arg11[%c0_216, %c1_217, %c0_218, %c0_219] : memref<1x12x12x8xf32, #tpu.memory_space<vmem>>, vector<1x8x8x8xf32>
    %169 = vector.shape_cast %168 : vector<1x8x8x8xf32> to vector<8x8x8xf32>
    %170 = vector.shape_cast %169 : vector<8x8x8xf32> to vector<64x8xf32>
    %c0_220 = arith.constant 0 : index
    %c40_221 = arith.constant 40 : index
    %171 = vector.load %arg12[%c0_220, %c40_221] : memref<64x256xf32, #tpu.memory_space<vmem>>, vector<64x8xf32>
    tpu.vector_store %arg12[%c0_220, %c40_221], %170 {strides = array<i32>} : memref<64x256xf32, #tpu.memory_space<vmem>>, vector<64x8xf32>,
    %c0_222 = arith.constant 0 : index
    %c1_223 = arith.constant 1 : index
    %c1_224 = arith.constant 1 : index
    %c0_225 = arith.constant 0 : index
    %172 = vector.load %arg11[%c0_222, %c1_223, %c1_224, %c0_225] : memref<1x12x12x8xf32, #tpu.memory_space<vmem>>, vector<1x8x8x8xf32>
    %173 = vector.shape_cast %172 : vector<1x8x8x8xf32> to vector<8x8x8xf32>
    %174 = vector.shape_cast %173 : vector<8x8x8xf32> to vector<64x8xf32>
    %c0_226 = arith.constant 0 : index
    %c48_227 = arith.constant 48 : index
    %175 = vector.load %arg12[%c0_226, %c48_227] : memref<64x256xf32, #tpu.memory_space<vmem>>, vector<64x8xf32>
    tpu.vector_store %arg12[%c0_226, %c48_227], %174 {strides = array<i32>} : memref<64x256xf32, #tpu.memory_space<vmem>>, vector<64x8xf32>,
    %c0_228 = arith.constant 0 : index
    %c1_229 = arith.constant 1 : index
    %c2_230 = arith.constant 2 : index
    %c0_231 = arith.constant 0 : index
    %176 = vector.load %arg11[%c0_228, %c1_229, %c2_230, %c0_231] : memref<1x12x12x8xf32, #tpu.memory_space<vmem>>, vector<1x8x8x8xf32>
    %177 = vector.shape_cast %176 : vector<1x8x8x8xf32> to vector<8x8x8xf32>
    %178 = vector.shape_cast %177 : vector<8x8x8xf32> to vector<64x8xf32>
    %c0_232 = arith.constant 0 : index
    %c56_233 = arith.constant 56 : index
    %179 = vector.load %arg12[%c0_232, %c56_233] : memref<64x256xf32, #tpu.memory_space<vmem>>, vector<64x8xf32>
    tpu.vector_store %arg12[%c0_232, %c56_233], %178 {strides = array<i32>} : memref<64x256xf32, #tpu.memory_space<vmem>>, vector<64x8xf32>,
    %c0_234 = arith.constant 0 : index
    %c1_235 = arith.constant 1 : index
    %c3_236 = arith.constant 3 : index
    %c0_237 = arith.constant 0 : index
    %180 = vector.load %arg11[%c0_234, %c1_235, %c3_236, %c0_237] : memref<1x12x12x8xf32, #tpu.memory_space<vmem>>, vector<1x8x8x8xf32>
    %181 = vector.shape_cast %180 : vector<1x8x8x8xf32> to vector<8x8x8xf32>
    %182 = vector.shape_cast %181 : vector<8x8x8xf32> to vector<64x8xf32>
    %c0_238 = arith.constant 0 : index
    %c64_239 = arith.constant 64 : index
    %183 = vector.load %arg12[%c0_238, %c64_239] : memref<64x256xf32, #tpu.memory_space<vmem>>, vector<64x8xf32>
    tpu.vector_store %arg12[%c0_238, %c64_239], %182 {strides = array<i32>} : memref<64x256xf32, #tpu.memory_space<vmem>>, vector<64x8xf32>,
    %c0_240 = arith.constant 0 : index
    %c1_241 = arith.constant 1 : index
    %c4_242 = arith.constant 4 : index
    %c0_243 = arith.constant 0 : index
    %184 = vector.load %arg11[%c0_240, %c1_241, %c4_242, %c0_243] : memref<1x12x12x8xf32, #tpu.memory_space<vmem>>, vector<1x8x8x8xf32>
    %185 = vector.shape_cast %184 : vector<1x8x8x8xf32> to vector<8x8x8xf32>
    %186 = vector.shape_cast %185 : vector<8x8x8xf32> to vector<64x8xf32>
    %c0_244 = arith.constant 0 : index
    %c72_245 = arith.constant 72 : index
    %187 = vector.load %arg12[%c0_244, %c72_245] : memref<64x256xf32, #tpu.memory_space<vmem>>, vector<64x8xf32>
    tpu.vector_store %arg12[%c0_244, %c72_245], %186 {strides = array<i32>} : memref<64x256xf32, #tpu.memory_space<vmem>>, vector<64x8xf32>,
    %c0_246 = arith.constant 0 : index
    %c2_247 = arith.constant 2 : index
    %c0_248 = arith.constant 0 : index
    %c0_249 = arith.constant 0 : index
    %188 = vector.load %arg11[%c0_246, %c2_247, %c0_248, %c0_249] : memref<1x12x12x8xf32, #tpu.memory_space<vmem>>, vector<1x8x8x8xf32>
    %189 = vector.shape_cast %188 : vector<1x8x8x8xf32> to vector<8x8x8xf32>
    %190 = vector.shape_cast %189 : vector<8x8x8xf32> to vector<64x8xf32>
    %c0_250 = arith.constant 0 : index
    %c80_251 = arith.constant 80 : index
    %191 = vector.load %arg12[%c0_250, %c80_251] : memref<64x256xf32, #tpu.memory_space<vmem>>, vector<64x8xf32>
    tpu.vector_store %arg12[%c0_250, %c80_251], %190 {strides = array<i32>} : memref<64x256xf32, #tpu.memory_space<vmem>>, vector<64x8xf32>,
    %c0_252 = arith.constant 0 : index
    %c2_253 = arith.constant 2 : index
    %c1_254 = arith.constant 1 : index
    %c0_255 = arith.constant 0 : index
    %192 = vector.load %arg11[%c0_252, %c2_253, %c1_254, %c0_255] : memref<1x12x12x8xf32, #tpu.memory_space<vmem>>, vector<1x8x8x8xf32>
    %193 = vector.shape_cast %192 : vector<1x8x8x8xf32> to vector<8x8x8xf32>
    %194 = vector.shape_cast %193 : vector<8x8x8xf32> to vector<64x8xf32>
    %c0_256 = arith.constant 0 : index
    %c88_257 = arith.constant 88 : index
    %195 = vector.load %arg12[%c0_256, %c88_257] : memref<64x256xf32, #tpu.memory_space<vmem>>, vector<64x8xf32>
    tpu.vector_store %arg12[%c0_256, %c88_257], %194 {strides = array<i32>} : memref<64x256xf32, #tpu.memory_space<vmem>>, vector<64x8xf32>,
    %c0_258 = arith.constant 0 : index
    %c2_259 = arith.constant 2 : index
    %c2_260 = arith.constant 2 : index
    %c0_261 = arith.constant 0 : index
    %196 = vector.load %arg11[%c0_258, %c2_259, %c2_260, %c0_261] : memref<1x12x12x8xf32, #tpu.memory_space<vmem>>, vector<1x8x8x8xf32>
    %197 = vector.shape_cast %196 : vector<1x8x8x8xf32> to vector<8x8x8xf32>
    %198 = vector.shape_cast %197 : vector<8x8x8xf32> to vector<64x8xf32>
    %c0_262 = arith.constant 0 : index
    %c96_263 = arith.constant 96 : index
    %199 = vector.load %arg12[%c0_262, %c96_263] : memref<64x256xf32, #tpu.memory_space<vmem>>, vector<64x8xf32>
    tpu.vector_store %arg12[%c0_262, %c96_263], %198 {strides = array<i32>} : memref<64x256xf32, #tpu.memory_space<vmem>>, vector<64x8xf32>,
    %c0_264 = arith.constant 0 : index
    %c2_265 = arith.constant 2 : index
    %c3_266 = arith.constant 3 : index
    %c0_267 = arith.constant 0 : index
    %200 = vector.load %arg11[%c0_264, %c2_265, %c3_266, %c0_267] : memref<1x12x12x8xf32, #tpu.memory_space<vmem>>, vector<1x8x8x8xf32>
    %201 = vector.shape_cast %200 : vector<1x8x8x8xf32> to vector<8x8x8xf32>
    %202 = vector.shape_cast %201 : vector<8x8x8xf32> to vector<64x8xf32>
    %c0_268 = arith.constant 0 : index
    %c104 = arith.constant 104 : index
    %203 = vector.load %arg12[%c0_268, %c104] : memref<64x256xf32, #tpu.memory_space<vmem>>, vector<64x8xf32>
    tpu.vector_store %arg12[%c0_268, %c104], %202 {strides = array<i32>} : memref<64x256xf32, #tpu.memory_space<vmem>>, vector<64x8xf32>,
    %c0_269 = arith.constant 0 : index
    %c2_270 = arith.constant 2 : index
    %c4_271 = arith.constant 4 : index
    %c0_272 = arith.constant 0 : index
    %204 = vector.load %arg11[%c0_269, %c2_270, %c4_271, %c0_272] : memref<1x12x12x8xf32, #tpu.memory_space<vmem>>, vector<1x8x8x8xf32>
    %205 = vector.shape_cast %204 : vector<1x8x8x8xf32> to vector<8x8x8xf32>
    %206 = vector.shape_cast %205 : vector<8x8x8xf32> to vector<64x8xf32>
    %c0_273 = arith.constant 0 : index
    %c112 = arith.constant 112 : index
    %207 = vector.load %arg12[%c0_273, %c112] : memref<64x256xf32, #tpu.memory_space<vmem>>, vector<64x8xf32>
    tpu.vector_store %arg12[%c0_273, %c112], %206 {strides = array<i32>} : memref<64x256xf32, #tpu.memory_space<vmem>>, vector<64x8xf32>,
    %c0_274 = arith.constant 0 : index
    %c3_275 = arith.constant 3 : index
    %c0_276 = arith.constant 0 : index
    %c0_277 = arith.constant 0 : index
    %208 = vector.load %arg11[%c0_274, %c3_275, %c0_276, %c0_277] : memref<1x12x12x8xf32, #tpu.memory_space<vmem>>, vector<1x8x8x8xf32>
    %209 = vector.shape_cast %208 : vector<1x8x8x8xf32> to vector<8x8x8xf32>
    %210 = vector.shape_cast %209 : vector<8x8x8xf32> to vector<64x8xf32>
    %c0_278 = arith.constant 0 : index
    %c120 = arith.constant 120 : index
    %211 = vector.load %arg12[%c0_278, %c120] : memref<64x256xf32, #tpu.memory_space<vmem>>, vector<64x8xf32>
    tpu.vector_store %arg12[%c0_278, %c120], %210 {strides = array<i32>} : memref<64x256xf32, #tpu.memory_space<vmem>>, vector<64x8xf32>,
    %c0_279 = arith.constant 0 : index
    %c3_280 = arith.constant 3 : index
    %c1_281 = arith.constant 1 : index
    %c0_282 = arith.constant 0 : index
    %212 = vector.load %arg11[%c0_279, %c3_280, %c1_281, %c0_282] : memref<1x12x12x8xf32, #tpu.memory_space<vmem>>, vector<1x8x8x8xf32>
    %213 = vector.shape_cast %212 : vector<1x8x8x8xf32> to vector<8x8x8xf32>
    %214 = vector.shape_cast %213 : vector<8x8x8xf32> to vector<64x8xf32>
    %c0_283 = arith.constant 0 : index
    %c128 = arith.constant 128 : index
    %215 = vector.load %arg12[%c0_283, %c128] : memref<64x256xf32, #tpu.memory_space<vmem>>, vector<64x8xf32>
    tpu.vector_store %arg12[%c0_283, %c128], %214 {strides = array<i32>} : memref<64x256xf32, #tpu.memory_space<vmem>>, vector<64x8xf32>,
    %c0_284 = arith.constant 0 : index
    %c3_285 = arith.constant 3 : index
    %c2_286 = arith.constant 2 : index
    %c0_287 = arith.constant 0 : index
    %216 = vector.load %arg11[%c0_284, %c3_285, %c2_286, %c0_287] : memref<1x12x12x8xf32, #tpu.memory_space<vmem>>, vector<1x8x8x8xf32>
    %217 = vector.shape_cast %216 : vector<1x8x8x8xf32> to vector<8x8x8xf32>
    %218 = vector.shape_cast %217 : vector<8x8x8xf32> to vector<64x8xf32>
    %c0_288 = arith.constant 0 : index
    %c136 = arith.constant 136 : index
    %219 = vector.load %arg12[%c0_288, %c136] : memref<64x256xf32, #tpu.memory_space<vmem>>, vector<64x8xf32>
    tpu.vector_store %arg12[%c0_288, %c136], %218 {strides = array<i32>} : memref<64x256xf32, #tpu.memory_space<vmem>>, vector<64x8xf32>,
    %c0_289 = arith.constant 0 : index
    %c3_290 = arith.constant 3 : index
    %c3_291 = arith.constant 3 : index
    %c0_292 = arith.constant 0 : index
    %220 = vector.load %arg11[%c0_289, %c3_290, %c3_291, %c0_292] : memref<1x12x12x8xf32, #tpu.memory_space<vmem>>, vector<1x8x8x8xf32>
    %221 = vector.shape_cast %220 : vector<1x8x8x8xf32> to vector<8x8x8xf32>
    %222 = vector.shape_cast %221 : vector<8x8x8xf32> to vector<64x8xf32>
    %c0_293 = arith.constant 0 : index
    %c144 = arith.constant 144 : index
    %223 = vector.load %arg12[%c0_293, %c144] : memref<64x256xf32, #tpu.memory_space<vmem>>, vector<64x8xf32>
    tpu.vector_store %arg12[%c0_293, %c144], %222 {strides = array<i32>} : memref<64x256xf32, #tpu.memory_space<vmem>>, vector<64x8xf32>,
    %c0_294 = arith.constant 0 : index
    %c3_295 = arith.constant 3 : index
    %c4_296 = arith.constant 4 : index
    %c0_297 = arith.constant 0 : index
    %224 = vector.load %arg11[%c0_294, %c3_295, %c4_296, %c0_297] : memref<1x12x12x8xf32, #tpu.memory_space<vmem>>, vector<1x8x8x8xf32>
    %225 = vector.shape_cast %224 : vector<1x8x8x8xf32> to vector<8x8x8xf32>
    %226 = vector.shape_cast %225 : vector<8x8x8xf32> to vector<64x8xf32>
    %c0_298 = arith.constant 0 : index
    %c152 = arith.constant 152 : index
    %227 = vector.load %arg12[%c0_298, %c152] : memref<64x256xf32, #tpu.memory_space<vmem>>, vector<64x8xf32>
    tpu.vector_store %arg12[%c0_298, %c152], %226 {strides = array<i32>} : memref<64x256xf32, #tpu.memory_space<vmem>>, vector<64x8xf32>,
    %c0_299 = arith.constant 0 : index
    %c4_300 = arith.constant 4 : index
    %c0_301 = arith.constant 0 : index
    %c0_302 = arith.constant 0 : index
    %228 = vector.load %arg11[%c0_299, %c4_300, %c0_301, %c0_302] : memref<1x12x12x8xf32, #tpu.memory_space<vmem>>, vector<1x8x8x8xf32>
    %229 = vector.shape_cast %228 : vector<1x8x8x8xf32> to vector<8x8x8xf32>
    %230 = vector.shape_cast %229 : vector<8x8x8xf32> to vector<64x8xf32>
    %c0_303 = arith.constant 0 : index
    %c160 = arith.constant 160 : index
    %231 = vector.load %arg12[%c0_303, %c160] : memref<64x256xf32, #tpu.memory_space<vmem>>, vector<64x8xf32>
    tpu.vector_store %arg12[%c0_303, %c160], %230 {strides = array<i32>} : memref<64x256xf32, #tpu.memory_space<vmem>>, vector<64x8xf32>,
    %c0_304 = arith.constant 0 : index
    %c4_305 = arith.constant 4 : index
    %c1_306 = arith.constant 1 : index
    %c0_307 = arith.constant 0 : index
    %232 = vector.load %arg11[%c0_304, %c4_305, %c1_306, %c0_307] : memref<1x12x12x8xf32, #tpu.memory_space<vmem>>, vector<1x8x8x8xf32>
    %233 = vector.shape_cast %232 : vector<1x8x8x8xf32> to vector<8x8x8xf32>
    %234 = vector.shape_cast %233 : vector<8x8x8xf32> to vector<64x8xf32>
    %c0_308 = arith.constant 0 : index
    %c168 = arith.constant 168 : index
    %235 = vector.load %arg12[%c0_308, %c168] : memref<64x256xf32, #tpu.memory_space<vmem>>, vector<64x8xf32>
    tpu.vector_store %arg12[%c0_308, %c168], %234 {strides = array<i32>} : memref<64x256xf32, #tpu.memory_space<vmem>>, vector<64x8xf32>,
    %c0_309 = arith.constant 0 : index
    %c4_310 = arith.constant 4 : index
    %c2_311 = arith.constant 2 : index
    %c0_312 = arith.constant 0 : index
    %236 = vector.load %arg11[%c0_309, %c4_310, %c2_311, %c0_312] : memref<1x12x12x8xf32, #tpu.memory_space<vmem>>, vector<1x8x8x8xf32>
    %237 = vector.shape_cast %236 : vector<1x8x8x8xf32> to vector<8x8x8xf32>
    %238 = vector.shape_cast %237 : vector<8x8x8xf32> to vector<64x8xf32>
    %c0_313 = arith.constant 0 : index
    %c176 = arith.constant 176 : index
    %239 = vector.load %arg12[%c0_313, %c176] : memref<64x256xf32, #tpu.memory_space<vmem>>, vector<64x8xf32>
    tpu.vector_store %arg12[%c0_313, %c176], %238 {strides = array<i32>} : memref<64x256xf32, #tpu.memory_space<vmem>>, vector<64x8xf32>,
    %c0_314 = arith.constant 0 : index
    %c4_315 = arith.constant 4 : index
    %c3_316 = arith.constant 3 : index
    %c0_317 = arith.constant 0 : index
    %240 = vector.load %arg11[%c0_314, %c4_315, %c3_316, %c0_317] : memref<1x12x12x8xf32, #tpu.memory_space<vmem>>, vector<1x8x8x8xf32>
    %241 = vector.shape_cast %240 : vector<1x8x8x8xf32> to vector<8x8x8xf32>
    %242 = vector.shape_cast %241 : vector<8x8x8xf32> to vector<64x8xf32>
    %c0_318 = arith.constant 0 : index
    %c184 = arith.constant 184 : index
    %243 = vector.load %arg12[%c0_318, %c184] : memref<64x256xf32, #tpu.memory_space<vmem>>, vector<64x8xf32>
    tpu.vector_store %arg12[%c0_318, %c184], %242 {strides = array<i32>} : memref<64x256xf32, #tpu.memory_space<vmem>>, vector<64x8xf32>,
    %c0_319 = arith.constant 0 : index
    %c4_320 = arith.constant 4 : index
    %c4_321 = arith.constant 4 : index
    %c0_322 = arith.constant 0 : index
    %244 = vector.load %arg11[%c0_319, %c4_320, %c4_321, %c0_322] : memref<1x12x12x8xf32, #tpu.memory_space<vmem>>, vector<1x8x8x8xf32>
    %245 = vector.shape_cast %244 : vector<1x8x8x8xf32> to vector<8x8x8xf32>
    %246 = vector.shape_cast %245 : vector<8x8x8xf32> to vector<64x8xf32>
    %c0_323 = arith.constant 0 : index
    %c192 = arith.constant 192 : index
    %247 = vector.load %arg12[%c0_323, %c192] : memref<64x256xf32, #tpu.memory_space<vmem>>, vector<64x8xf32>
    tpu.vector_store %arg12[%c0_323, %c192], %246 {strides = array<i32>} : memref<64x256xf32, #tpu.memory_space<vmem>>, vector<64x8xf32>,
    %c0_324 = arith.constant 0 : index
    %c0_325 = arith.constant 0 : index
    %248 = vector.load %arg12[%c0_324, %c0_325] : memref<64x256xf32, #tpu.memory_space<vmem>>, vector<64x256xf32>
    %249 = arith.truncf %248 : vector<64x256xf32> to vector<64x256xbf16>
    %c0_326 = arith.constant 0 : index
    %c0_327 = arith.constant 0 : index
    %250 = vector.load %arg5[%c0_326, %c0_327] : memref<256x128xbf16, #tpu.memory_space<vmem>>, vector<256x128xbf16>
    %cst_328 = arith.constant dense<0.000000e+00> : vector<64x128xf32>
    %251 = tpu.matmul %249, %250, %cst_328 {dimension_numbers = #tpu.dot_dimension_numbers<[1], [0], [0], [1], [0, 0, 1, 1], [], []>} : vector<64x256xbf16>, vector<256x128xbf16>, vector<64x128xf32> -> vector<64x128xf32>
    %cst_329 = arith.constant 0.000000e+00 : f32
    %252 = vector.broadcast %cst_329 : f32 to vector<64x128xf32>
    %253 = arith.maximumf %251, %252 : vector<64x128xf32>
    %c0_330 = arith.constant 0 : index
    %c0_331 = arith.constant 0 : index
    %254 = vector.load %arg6[%c0_330, %c0_331] : memref<1x128xf32, #tpu.memory_space<vmem>>, vector<1x128xf32>
    %255 = vector.broadcast %254 : vector<1x128xf32> to vector<64x128xf32>
    %256 = arith.mulf %253, %255 : vector<64x128xf32>
    %c0_332 = arith.constant 0 : index
    %c0_333 = arith.constant 0 : index
    %257 = vector.load %arg7[%c0_332, %c0_333] : memref<1x128xf32, #tpu.memory_space<vmem>>, vector<1x128xf32>
    %258 = vector.broadcast %257 : vector<1x128xf32> to vector<64x128xf32>
    %259 = arith.addf %256, %258 : vector<64x128xf32>
    %260 = vector.shape_cast %259 : vector<64x128xf32> to vector<1x64x128xf32>
    %c0_334 = arith.constant 0 : index
    %c0_335 = arith.constant 0 : index
    %c0_336 = arith.constant 0 : index
    %261 = vector.load %arg8[%c0_334, %c0_335, %c0_336] : memref<1x64x128xf32, #tpu.memory_space<vmem>>, vector<1x64x128xf32>
    tpu.vector_store %arg8[%c0_334, %c0_335, %c0_336], %260 {strides = array<i32>} : memref<1x64x128xf32, #tpu.memory_space<vmem>>, vector<1x64x128xf32>,
    return
  }
  func.func @transform_0(%arg0: i32) -> (i32, i32, i32, i32) {
    %c0_i32 = arith.constant 0 : i32
    %c0_i32_0 = arith.constant 0 : i32
    %c0_i32_1 = arith.constant 0 : i32
    %c0_i32_2 = arith.constant 0 : i32
    return %arg0, %c0_i32, %c0_i32_0, %c0_i32_1 : i32, i32, i32, i32
  }
  func.func @transform_1(%arg0: i32) -> (i32, i32) {
    %c0_i32 = arith.constant 0 : i32
    %c0_i32_0 = arith.constant 0 : i32
    %c0_i32_1 = arith.constant 0 : i32
    return %c0_i32, %c0_i32_0 : i32, i32
  }
  func.func @transform_2(%arg0: i32) -> (i32, i32) {
    %c0_i32 = arith.constant 0 : i32
    %c0_i32_0 = arith.constant 0 : i32
    %c0_i32_1 = arith.constant 0 : i32
    return %c0_i32, %c0_i32_0 : i32, i32
  }
  func.func @transform_3(%arg0: i32) -> (i32, i32) {
    %c0_i32 = arith.constant 0 : i32
    %c0_i32_0 = arith.constant 0 : i32
    %c0_i32_1 = arith.constant 0 : i32
    return %c0_i32, %c0_i32_0 : i32, i32
  }
  func.func @transform_4(%arg0: i32) -> (i32, i32) {
    %c0_i32 = arith.constant 0 : i32
    %c0_i32_0 = arith.constant 0 : i32
    %c0_i32_1 = arith.constant 0 : i32
    return %c0_i32, %c0_i32_0 : i32, i32
  }
  func.func @transform_5(%arg0: i32) -> (i32, i32) {
    %c0_i32 = arith.constant 0 : i32
    %c0_i32_0 = arith.constant 0 : i32
    %c0_i32_1 = arith.constant 0 : i32
    return %c0_i32, %c0_i32_0 : i32, i32
  }
  func.func @transform_6(%arg0: i32) -> (i32, i32) {
    %c0_i32 = arith.constant 0 : i32
    %c0_i32_0 = arith.constant 0 : i32
    %c0_i32_1 = arith.constant 0 : i32
    return %c0_i32, %c0_i32_0 : i32, i32
  }
  func.func @transform_7(%arg0: i32) -> (i32, i32, i32) {
    %c0_i32 = arith.constant 0 : i32
    %c0_i32_0 = arith.constant 0 : i32
    %c0_i32_1 = arith.constant 0 : i32
    return %arg0, %c0_i32, %c0_i32_0 : i32, i32, i32
  }
}

</mosaic_0001>

<bundles_post_ra>
// kernel: tpu_custom_call.1
= control target key start
LH: loop header
LB: loop body
LE: loop exit
PB: predicated region body
PF: predicated region fallthrough
CT: control target
= control target key end

     0   :  { %s5441_s0 = inlined_call_operand.vmem [shape: f32[2,16,8,8], index: 0, kind: input, shape index: {}]   ;;  %s5442_s1 = inlined_call_operand.vmem [shape: bf16[128,128], index: 1, kind: input, shape index: {}]   ;;  %s5443_s2 = inlined_call_operand.vmem [shape: f32[1,128], index: 2, kind: input, shape index: {}]   ;;  %s5444_s3 = inlined_call_operand.vmem [shape: f32[1,128], index: 3, kind: input, shape index: {}]   ;;  %s5445_s4 = inlined_call_operand.vmem [shape: bf16[256,128], index: 4, kind: input, shape index: {}]   ;;  %s5446_s5 = inlined_call_operand.vmem [shape: f32[1,128], index: 5, kind: input, shape index: {}]   ;;  %s5447_s6 = inlined_call_operand.vmem [shape: f32[1,128], index: 6, kind: input, shape index: {}]   ;;  %s5448_s7 = inlined_call_operand.hbm [shape: f32[2,64,128], index: 7, kind: output, shape index: {}]  }
   0x1   :  { %5479 = sst [smem:[#allocation9_spill]] %s5441_s0 }
   0x2   :  { %5480 = sst [smem:[#allocation10_spill]] %s5442_s1 }
   0x3   :  { %5481 = sst [smem:[#allocation11_spill]] %s5443_s2 }
   0x4   :  { %5482 = sst [smem:[#allocation12_spill]] %s5444_s3 }
   0x5   :  { %12 = vsyncpa [#allocation7], 0 }
   0x6   :  { %14 = vsyncpa [#allocation7 + $0x1], 0  ;;  %s3685_s24 = smov 0   ;;  %s3687_s25 = smov 0  }
   0x7   :  { %s3689_s26 = smov 0   ;;  %s3691_s27 = smov 0  }
   0x8 LB: > { %s3706_s28 = sadd.s32 4294967295, %s3612_s27   ;;  %s3341_s29 = sadd.s32 4294967294, %s3612_s27   ;;  %s3612_s27 = sphi %s3691_s27, %s5507_s27   ;;  %s3608_s26 = sphi %s3689_s26, %s5506_s26   ;;  %s3604_s25 = sphi %s3687_s25, %s5505_s25   ;;  %s3600_s24 = sphi %s3685_s24, %s5504_s24  }
   0x9   : > { %s3710_s30 = sadd.s32 1, %s3612_s27   ;;  %s179_s8 = sadd.s32 1, %s3608_s26 }
   0xa   : > { %s176_s9 = ssub.s32 %s3612_s27, %s3710_s30  ;;  %p189_p0 = scmp.ne.s32.totalorder %s3608_s26, %s3604_s25 }
   0xb   : > { %p177_p1 = scmp.eq.s32.totalorder %s176_s9, 0  ;;  %p190_p2 = scmp.eq.s32.totalorder %s3706_s28, 1 }
   0xc   : > { %p195_p3 = scmp.ne.s32.totalorder %s3604_s25, %s3600_s24  ;;  %p196_p4 = scmp.eq.s32.totalorder %s3341_s29, 1 }
   0xd   : > { %s3721_s10 = scalar_select %p177_p1, %s3608_s26, %s179_s8  }
   0xe   : > { %p3723_p5 = por %p190_p2, %p189_p0  ;;  %p3727_p6 = por %p196_p4, %p195_p3 }
   0xf   : > { %p3344_p7 = scmp.ge.s32.totalorder %s3612_s27, 1  ;;  %p240_p8 = scmp.lt.s32.totalorder %s3612_s27, 3 }
  0x11   : > { %p241_p9 = pnand %p3344_p7, %p240_p8 }
  0x12   : > { %p272_p10 = scmp.lt.s32.totalorder (!%p241_p9), %s3706_s28, 1  ;;  %s5485_s0 = sld [smem:[#allocation9_spill]] (!%p241_p9) }
  0x13   : > { %244 = sbr.rel (%p241_p9) target bundleno = 1505 (0x5e1), region = 48  ;;  %s3615_s18 = smov (!%p241_p9), 124  }
  0x14   : > { %s3616_s19 = smov (!%p241_p9), 4   ;;  %s5457_s20 = smov (!%p241_p9), 8  }
  0x15   : > { %s3618_s21 = smov (!%p241_p9), 12   ;;  %s5453_s22 = smov (!%p241_p9), 16  }
  0x16   : > { %s3620_s23 = smov (!%p241_p9), 20   ;;  %s5451_s29 = smov (!%p241_p9), 24  }
  0x17   : > { %s3622_s8 = smov (!%p241_p9), 28   ;;  %s5449_s9 = smov (!%p241_p9), 32  }
  0x18   : > { %vm382_vm0 = vcmask 31744   ;;  %vm384_vm1 = vcmask 27648   ;;  %v3614_v0 = vmov 0.0   ;;  %vm394_vm2 = vcmask 25600   ;;  %s273_s13 = scalar_select %p272_p10, %s3706_s28, 1 }
  0x19   : > { %383 = vst.msk [vmem:[#allocation2] sm:$0xff] %vm382_vm0, %v3614_v0  ;;  %386 = vst.msk [vmem:[#allocation2 + $0x10] sm:$0xff] %vm382_vm0, %v3614_v0  ;;  %vm419_vm3 = vcmask 1048352   ;;  %vm493_vm4 = vcmask 64544   ;;  %vm542_vm5 = vcmask 97344   ;;  %vm591_vm6 = vcmask 130144  }
  0x1a   : > { %385 = vst.msk [vmem:[#allocation2 + $0x8] sm:$0xf] %vm384_vm1, %v3614_v0  ;;  %387 = vst.msk [vmem:[#allocation2 + $0x18] sm:$0xf] %vm384_vm1, %v3614_v0  ;;  %s3381_s14 = sshll.u32 %s273_s13, 7  ;;  %vm640_vm7 = vcmask 162944  }
  0x1b   : > { %389 = vst.msk [vmem:[#allocation2 + $0xa0] sm:$0xff] %vm382_vm0, %v3614_v0  ;;  %391 = vst.msk [vmem:[#allocation2 + $0xb0] sm:$0xff] %vm382_vm0, %v3614_v0  ;;  %s3782_s17 = scalar_lea.vmem %s5485_s0, %s3381_s14  ;;  %vm690_vm8 = vcmask 195744   ;;  %vm739_vm9 = vcmask 228544   ;;  %vm788_vm10 = vcmask 261344   ;;  %s3624_s13 = smov 36  }
  0x1c   : > { %390 = vst.msk [vmem:[#allocation2 + $0xa8] sm:$0xf] %vm384_vm1, %v3614_v0  ;;  %392 = vst.msk [vmem:[#allocation2 + $0xb8] sm:$0xf] %vm384_vm1, %v3614_v0  ;;  %v3785_v1 = vld [vmem:[%s3782_s17 + $0x10] sm:$0xff]  ;;  %v3788_v2 = vld [vmem:[%s3782_s17] sm:$0xff] }
  0x1d   : > { %396 = vst.msk [vmem:[#allocation2 + $0x30] sm:$0x3] %vm394_vm2, %v3614_v0  ;;  %395 = vst.msk [vmem:[#allocation2 + $0x20] sm:$0x3] %vm394_vm2, %v3614_v0  ;;  %314 = vrot.lane.b32.xlu1 %v3785_v1, %s3615_s18  ;;  %310 = vrot.lane.b32.xlu0 %v3788_v2, %s3615_s18  ;;  %v3795_v3 = vld [vmem:[%s3782_s17 + $0x18] sm:$0xff]  ;;  %v3798_v4 = vld [vmem:[%s3782_s17 + $0x8] sm:$0xff] }
  0x1e   : > { %397 = vst.msk [vmem:[#allocation2 + $0x40] sm:$0x3] %vm394_vm2, %v3614_v0  ;;  %398 = vst.msk [vmem:[#allocation2 + $0x50] sm:$0x3] %vm394_vm2, %v3614_v0  ;;  %v3805_v5 = vld [vmem:[%s3782_s17 + $0x28] sm:$0xff]  ;;  %v3808_v6 = vld [vmem:[%s3782_s17 + $0x20] sm:$0xff] }
  0x1f   : > { %399 = vst.msk [vmem:[#allocation2 + $0x60] sm:$0x3] %vm394_vm2, %v3614_v0  ;;  %400 = vst.msk [vmem:[#allocation2 + $0x70] sm:$0x3] %vm394_vm2, %v3614_v0  ;;  %v3819_v8 = vld [vmem:[%s3782_s17 + $0x38] sm:$0xff]  ;;  %v3822_v9 = vld [vmem:[%s3782_s17 + $0x30] sm:$0xff] }
  0x20   : > { %401 = vst.msk [vmem:[#allocation2 + $0x80] sm:$0x3] %vm394_vm2, %v3614_v0  ;;  %402 = vst.msk [vmem:[#allocation2 + $0x90] sm:$0x3] %vm394_vm2, %v3614_v0  ;;  %v650_v7 = vld [vmem:[#allocation2 + $0x10] sm:$0xff]  ;;  %v3830_v10 = vld [vmem:[%s3782_s17 + $0x48] sm:$0xff] }
  0x21   : > { %403 = vst.msk [vmem:[#allocation2 + $0x2a] sm:$0x3] %vm394_vm2, %v3614_v0  ;;  %404 = vst.msk [vmem:[#allocation2 + $0x3a] sm:$0x3] %vm394_vm2, %v3614_v0  ;;  %316 = vrot.lane.b32.xlu1 %v3795_v3, %s3615_s18  ;;  %312 = vrot.lane.b32.xlu0 %v3798_v4, %s3615_s18  ;;  %v3833_v11 = vld [vmem:[%s3782_s17 + $0x40] sm:$0xff]  ;;  %v3840_v12 = vld [vmem:[%s3782_s17 + $0x58] sm:$0xff] }
  0x22   : > { %405 = vst.msk [vmem:[#allocation2 + $0x4a] sm:$0x3] %vm394_vm2, %v3614_v0  ;;  %406 = vst.msk [vmem:[#allocation2 + $0x5a] sm:$0x3] %vm394_vm2, %v3614_v0  ;;  %v3843_v13 = vld [vmem:[%s3782_s17 + $0x50] sm:$0xff]  ;;  %v3850_v14 = vld [vmem:[%s3782_s17 + $0x68] sm:$0xff] }
  0x23   : > { %407 = vst.msk [vmem:[#allocation2 + $0x6a] sm:$0x3] %vm394_vm2, %v3614_v0  ;;  %408 = vst.msk [vmem:[#allocation2 + $0x7a] sm:$0x3] %vm394_vm2, %v3614_v0  ;;  %v3853_v15 = vld [vmem:[%s3782_s17 + $0x60] sm:$0xff]  ;;  %v3864_v16 = vld [vmem:[%s3782_s17 + $0x70] sm:$0xff] }
  0x24   : > { %409 = vst.msk [vmem:[#allocation2 + $0x8a] sm:$0x3] %vm394_vm2, %v3614_v0  ;;  %410 = vst.msk [vmem:[#allocation2 + $0x9a] sm:$0x3] %vm394_vm2, %v3614_v0  ;;  %v3867_v17 = vld [vmem:[%s3782_s17 + $0x78] sm:$0xff]  ;;  %v453_v18 = vld [vmem:[#allocation2 + $0x1] sm:$0xff] }
  0x25   : > { %420 = vst.msk [vmem:[#allocation3] sm:$0xff] %vm419_vm3, %v3614_v0  ;;  %421 = vst.msk [vmem:[#allocation3 + $0x8] sm:$0xff] %vm419_vm3, %v3614_v0  ;;  %320 = vrot.lane.b32.xlu1 %v3805_v5, %s3615_s18  ;;  %318 = vrot.lane.b32.xlu0 %v3808_v6, %s3615_s18  ;;  %v454_v19 = vld [vmem:[#allocation2 + $0x11] sm:$0xff]  ;;  %v502_v20 = vld [vmem:[#allocation2 + $0x2] sm:$0xff]  ;;  %s5455_s14 = smov 40   ;;  %s3626_s15 = smov 44  }
  0x26   : > { %422 = vst.msk [vmem:[#allocation3 + $0x10] sm:$0xff] %vm419_vm3, %v3614_v0  ;;  %423 = vst.msk [vmem:[#allocation3 + $0x18] sm:$0xff] %vm419_vm3, %v3614_v0  ;;  %v503_v21 = vld [vmem:[#allocation2 + $0x12] sm:$0xff]  ;;  %v551_v22 = vld [vmem:[#allocation2 + $0x3] sm:$0xff]  ;;  %s5473_s16 = smov 48   ;;  %s3628_s17 = smov 52  }
  0x27   : > { %424 = vst.msk [vmem:[#allocation3 + $0x20] sm:$0xff] %vm419_vm3, %v3614_v0  ;;  %425 = vst.msk [vmem:[#allocation3 + $0x28] sm:$0xff] %vm419_vm3, %v3614_v0  ;;  %v3877_v23 = vld [vmem:[#allocation2 + $0x13] sm:$0xff]  ;;  %v600_v24 = vld [vmem:[#allocation2 + $0x4] sm:$0xff]  ;;  %vm837_vm11 = vcmask 294144   ;;  %vm886_vm12 = vcmask 326944  }
  0x28   : > { %426 = vst.msk [vmem:[#allocation3 + $0x30] sm:$0xff] %vm419_vm3, %v3614_v0  ;;  %427 = vst.msk [vmem:[#allocation3 + $0x38] sm:$0xff] %vm419_vm3, %v3614_v0  ;;  %v3882_v25 = vld [vmem:[#allocation2 + $0x14] sm:$0xff]  ;;  %v437_v26 = vld [vmem:[#allocation2] sm:$0xff]  ;;  %vm935_vm13 = vcmask 359744   ;;  %vm984_vm14 = vcmask 392544  }
  0x29   : > { %446 = vst.msk [vmem:[#allocation3 + $0x8] sm:$0xff] %vm382_vm0, %v650_v7  ;;  %324 = vrot.lane.b32.xlu1 %v3819_v8, %s3615_s18  ;;  %322 = vrot.lane.b32.xlu0 %v3822_v9, %s3615_s18  ;;  %445 = vst.msk [vmem:[#allocation3] sm:$0xff] %vm382_vm0, %v437_v26  ;;  %vm1033_vm15 = vcmask 425344   ;;  %s5486_s1 = sld [smem:[#allocation10_spill]]  ;;  %vm1131_vm1 = vcmask 490944   ;;  %vm1181_vm2 = vcmask 523744  }
  0x2a   : > { %vm1230_vm3 = vcmask 556544   ;;  %s5495_s2 = sld [smem:[#allocation11_spill]]  ;;  %s5499_s0 = smov 56  }
  0x2b   : > { %s5496_s3 = sld [smem:[#allocation12_spill]] }
  0x2d   : > { %328 = vrot.lane.b32.xlu1 %v3830_v10, %s3615_s18  ;;  %326 = vrot.lane.b32.xlu0 %v3833_v11, %s3615_s18 }
  0x31   : > { %332 = vrot.lane.b32.xlu1 %v3840_v12, %s3615_s18  ;;  %330 = vrot.lane.b32.xlu0 %v3843_v13, %s3615_s18 }
  0x35   : > { %336 = vrot.lane.b32.xlu1 %v3850_v14, %s3615_s18  ;;  %334 = vrot.lane.b32.xlu0 %v3853_v15, %s3615_s18 }
  0x39   : > { %338 = vrot.lane.b32.xlu0 %v3864_v16, %s3615_s18  ;;  %340 = vrot.lane.b32.xlu1 %v3867_v17, %s3615_s18  ;;  %s5471_s18 = smov 56  }
  0x3d   : > { %469 = vrot.lane.b32.xlu0 %v453_v18, %s3616_s19  ;;  %471 = vrot.lane.b32.xlu1 %v454_v19, %s3616_s19 }
  0x41   : > { %518 = vrot.lane.b32.xlu0 %v502_v20, %s5457_s20  ;;  %520 = vrot.lane.b32.xlu1 %v503_v21, %s5457_s20 }
  0x45   : > { %567 = vrot.lane.b32.xlu0 %v551_v22, %s3618_s21  ;;  %569 = vrot.lane.b32.xlu1 %v3877_v23, %s3618_s21 }
  0x49   : > { %616 = vrot.lane.b32.xlu0 %v600_v24, %s5453_s22  ;;  %618 = vrot.lane.b32.xlu1 %v3882_v25, %s5453_s22 }
  0x4d   : > { %666 = vrot.lane.b32.xlu0 %v650_v7, %s3620_s23 }
  0x51   : > { %715 = vrot.lane.b32.xlu0 %v454_v19, %s5451_s29 }
  0x55   : > { %764 = vrot.lane.b32.xlu0 %v503_v21, %s3622_s8 }
  0x8f   : > { %v315_v27 = vpop.permute.xlu1 %314  ;;  %v311_v28 = vpop.permute.xlu0 %310 }
  0x90   : > { %v360_v31 = vmax.f32 %v3785_v1, %v315_v27  ;;  %v358_v32 = vmax.f32 %v3788_v2, %v311_v28 }
  0x93   : > { %v317_v29 = vpop.permute.xlu1 %316  ;;  %v313_v30 = vpop.permute.xlu0 %312 }
  0x94   : > { %v361_v33 = vmax.f32 %v3795_v3, %v317_v29  ;;  %v359_v34 = vmax.f32 %v3798_v4, %v313_v30 }
  0x96   : > { %v375_v35 = vmax.f32 %v360_v31, %v361_v33  ;;  %v374_v36 = vmax.f32 %v358_v32, %v359_v34 }
  0x97   : > { %v321_v37 = vpop.permute.xlu1 %320  ;;  %v319_v38 = vpop.permute.xlu0 %318 }
  0x98   : > { %412 = vst.msk [vmem:[#allocation2 + $0x32] sm:$0xff] %vm382_vm0, %v375_v35  ;;  %411 = vst.msk [vmem:[#allocation2 + $0x22] sm:$0xff] %vm382_vm0, %v374_v36  ;;  %v363_v39 = vmax.f32 %v3805_v5, %v321_v37  ;;  %v362_v40 = vmax.f32 %v3808_v6, %v319_v38 }
  0x9a   : > { %v376_v41 = vmax.f32 %v362_v40, %v363_v39 }
  0x9b   : > { %v325_v42 = vpop.permute.xlu1 %324  ;;  %v323_v43 = vpop.permute.xlu0 %322 }
  0x9c   : > { %413 = vst.msk [vmem:[#allocation2 + $0x42] sm:$0xff] %vm382_vm0, %v376_v41  ;;  %v365_v44 = vmax.f32 %v3819_v8, %v325_v42  ;;  %v364_v45 = vmax.f32 %v3822_v9, %v323_v43 }
  0x9e   : > { %v377_v46 = vmax.f32 %v364_v45, %v365_v44 }
  0x9f   : > { %v329_v47 = vpop.permute.xlu1 %328  ;;  %v327_v48 = vpop.permute.xlu0 %326  ;;  %v3902_v49 = vld [vmem:[#allocation2 + $0x31] sm:$0xff]  ;;  %v3904_v50 = vld [vmem:[#allocation2 + $0x21] sm:$0xff] }
  0xa0   : > { %414 = vst.msk [vmem:[#allocation2 + $0x52] sm:$0xff] %vm382_vm0, %v377_v46  ;;  %v367_v51 = vmax.f32 %v3830_v10, %v329_v47  ;;  %v366_v52 = vmax.f32 %v3833_v11, %v327_v48  ;;  %475 = vrot.lane.b32.xlu1 %v3902_v49, %s3616_s19  ;;  %473 = vrot.lane.b32.xlu0 %v3904_v50, %s3616_s19  ;;  %v3913_v53 = vld [vmem:[#allocation2 + $0x30] sm:$0xff]  ;;  %v3915_v55 = vld [vmem:[#allocation2 + $0x20] sm:$0xff] }
  0xa1   : > { %448 = vst.msk [vmem:[#allocation3 + $0x18] sm:$0xff] %vm382_vm0, %v3913_v53  ;;  %447 = vst.msk [vmem:[#allocation3 + $0x10] sm:$0xff] %vm382_vm0, %v3915_v55  ;;  %v3971_v20 = vld [vmem:[#allocation2 + $0x32] sm:$0xff]  ;;  %v3989_v29 = vld [vmem:[#allocation2 + $0x23] sm:$0xff] }
  0xa2   : > { %v378_v54 = vmax.f32 %v366_v52, %v367_v51  ;;  %v4001_v34 = vld [vmem:[#allocation2 + $0x33] sm:$0xff]  ;;  %v4017_v39 = vld [vmem:[#allocation2 + $0x24] sm:$0xff] }
  0xa3   : > { %v333_v56 = vpop.permute.xlu1 %332  ;;  %v331_v57 = vpop.permute.xlu0 %330  ;;  %v3919_v58 = vld [vmem:[#allocation2 + $0x41] sm:$0xff]  ;;  %v4028_v43 = vld [vmem:[#allocation2 + $0x34] sm:$0xff] }
  0xa4   : > { %415 = vst.msk [vmem:[#allocation2 + $0x62] sm:$0xff] %vm382_vm0, %v378_v54  ;;  %v369_v59 = vmax.f32 %v3840_v12, %v333_v56  ;;  %v368_v60 = vmax.f32 %v3843_v13, %v331_v57  ;;  %477 = vrot.lane.b32.xlu0 %v3919_v58, %s3616_s19  ;;  %v3928_v61 = vld [vmem:[#allocation2 + $0x40] sm:$0xff] }
  0xa5   : > { %449 = vst.msk [vmem:[#allocation3 + $0x20] sm:$0xff] %vm382_vm0, %v3928_v61  ;;  %v3999_v33 = vld [vmem:[#allocation2 + $0x43] sm:$0xff] }
  0xa6   : > { %v379_v62 = vmax.f32 %v368_v60, %v369_v59  ;;  %v4026_v42 = vld [vmem:[#allocation2 + $0x44] sm:$0xff] }
  0xa7   : > { %v3932_v63 = vld [vmem:[#allocation2 + $0x51] sm:$0xff]  ;;  %v337_v1 = vpop.permute.xlu1 %336  ;;  %v335_v2 = vpop.permute.xlu0 %334 }
  0xa8   : > { %416 = vst.msk [vmem:[#allocation2 + $0x72] sm:$0xff] %vm382_vm0, %v379_v62  ;;  %479 = vrot.lane.b32.xlu1 %v3932_v63, %s3616_s19  ;;  %v371_v3 = vmax.f32 %v3850_v14, %v337_v1  ;;  %v370_v4 = vmax.f32 %v3853_v15, %v335_v2  ;;  %v3939_v5 = vld [vmem:[#allocation2 + $0x50] sm:$0xff]  ;;  %v3954_v14 = vld [vmem:[#allocation2 + $0x22] sm:$0xff] }
  0xa9   : > { %450 = vst.msk [vmem:[#allocation3 + $0x28] sm:$0xff] %vm382_vm0, %v3939_v5  ;;  %v3981_v26 = vld [vmem:[#allocation2 + $0x52] sm:$0xff] }
  0xaa   : > { %v380_v6 = vmax.f32 %v370_v4, %v371_v3  ;;  %v4010_v37 = vld [vmem:[#allocation2 + $0x53] sm:$0xff] }
  0xab   : > { %v3943_v7 = vld [vmem:[#allocation2 + $0x61] sm:$0xff]  ;;  %v339_v8 = vpop.permute.xlu0 %338  ;;  %v341_v9 = vpop.permute.xlu1 %340  ;;  %v4036_v45 = vld [vmem:[#allocation2 + $0x54] sm:$0xff] }
  0xac   : > { %481 = vrot.lane.b32.xlu0 %v3943_v7, %s3616_s19  ;;  %417 = vst.msk [vmem:[#allocation2 + $0x82] sm:$0xff] %vm382_vm0, %v380_v6  ;;  %v3948_v10 = vld [vmem:[#allocation2 + $0x60] sm:$0xff]  ;;  %v372_v11 = vmax.f32 %v3864_v16, %v339_v8  ;;  %v373_v12 = vmax.f32 %v3867_v17, %v341_v9 }
  0xad   : > { %451 = vst.msk [vmem:[#allocation3 + $0x30] sm:$0xff] %vm382_vm0, %v3948_v10  ;;  %v3969_v17 = vld [vmem:[#allocation2 + $0x42] sm:$0xff] }
  0xae   : > { %v381_v13 = vmax.f32 %v372_v11, %v373_v12  ;;  %v3979_v24 = vld [vmem:[#allocation2 + $0x62] sm:$0xff] }
  0xaf   : > { %v3956_v15 = vld [vmem:[#allocation2 + $0x71] sm:$0xff]  ;;  %v470_v18 = vpop.permute.xlu0 %469  ;;  %v472_v19 = vpop.permute.xlu1 %471  ;;  %v4008_v36 = vld [vmem:[#allocation2 + $0x63] sm:$0xff] }
  0xb0   : > { %522 = vrot.lane.b32.xlu0 %v3954_v14, %s5457_s20  ;;  %483 = vrot.lane.b32.xlu1 %v3956_v15, %s3616_s19  ;;  %v3962_v16 = vld [vmem:[#allocation2 + $0x70] sm:$0xff]  ;;  %494 = vst.msk [vmem:[#allocation3] sm:$0xff] %vm493_vm4, %v470_v18  ;;  %495 = vst.msk [vmem:[#allocation3 + $0x8] sm:$0xff] %vm493_vm4, %v472_v19  ;;  %v4034_v44 = vld [vmem:[#allocation2 + $0x64] sm:$0xff]  ;;  %s3630_s19 = smov 60  }
  0xb1   : > { %418 = vst.msk [vmem:[#allocation2 + $0x92] sm:$0xff] %vm382_vm0, %v381_v13  ;;  %452 = vst.msk [vmem:[#allocation3 + $0x38] sm:$0xff] %vm382_vm0, %v3962_v16  ;;  %v3991_v30 = vld [vmem:[#allocation2 + $0x72] sm:$0xff]  ;;  %vm1082_vm0 = vcmask 458144  }
  0xb2   : > { %v4019_v40 = vld [vmem:[#allocation2 + $0x73] sm:$0xff] }
  0xb3   : > { %v519_v21 = vpop.permute.xlu0 %518  ;;  %v521_v22 = vpop.permute.xlu1 %520  ;;  %v4042_v46 = vld [vmem:[#allocation2 + $0x74] sm:$0xff]  ;;  %v4060_v47 = vld [vmem:[#allocation2 + $0x80] sm:$0xff] }
  0xb4   : > { %526 = vrot.lane.b32.xlu0 %v3969_v17, %s5457_s20  ;;  %524 = vrot.lane.b32.xlu1 %v3971_v20, %s5457_s20  ;;  %543 = vst.msk [vmem:[#allocation3] sm:$0xff] %vm542_vm5, %v519_v21  ;;  %544 = vst.msk [vmem:[#allocation3 + $0x8] sm:$0xff] %vm542_vm5, %v521_v22  ;;  %v4078_v48 = vld [vmem:[#allocation2 + $0x81] sm:$0xff] }
  0xb5   : > { %v4096_v51 = vld [vmem:[#allocation2 + $0x82] sm:$0xff] }
  0xb6   : > { %v4139_v60 = vld [vmem:[#allocation2 + $0x84] sm:$0xff] }
  0xb7   : > { %v568_v27 = vpop.permute.xlu0 %567  ;;  %v570_v28 = vpop.permute.xlu1 %569 }
  0xb8   : > { %530 = vrot.lane.b32.xlu0 %v3979_v24, %s5457_s20  ;;  %528 = vrot.lane.b32.xlu1 %v3981_v26, %s5457_s20  ;;  %592 = vst.msk [vmem:[#allocation3] sm:$0xff] %vm591_vm6, %v568_v27  ;;  %593 = vst.msk [vmem:[#allocation3 + $0x8] sm:$0xff] %vm591_vm6, %v570_v28 }
  0xbb   : > { %v617_v31 = vpop.permute.xlu0 %616  ;;  %v619_v32 = vpop.permute.xlu1 %618 }
  0xbc   : > { %571 = vrot.lane.b32.xlu0 %v3989_v29, %s3618_s21  ;;  %532 = vrot.lane.b32.xlu1 %v3991_v30, %s5457_s20  ;;  %641 = vst.msk [vmem:[#allocation3] sm:$0xff] %vm640_vm7, %v617_v31  ;;  %642 = vst.msk [vmem:[#allocation3 + $0x8] sm:$0xff] %vm640_vm7, %v619_v32 }
  0xbf   : > { %v667_v35 = vpop.permute.xlu0 %666 }
  0xc0   : > { %575 = vrot.lane.b32.xlu0 %v3999_v33, %s3618_s21  ;;  %573 = vrot.lane.b32.xlu1 %v4001_v34, %s3618_s21  ;;  %691 = vst.msk [vmem:[#allocation3] sm:$0xff] %vm690_vm8, %v667_v35 }
  0xc3   : > { %v716_v38 = vpop.permute.xlu0 %715 }
  0xc4   : > { %579 = vrot.lane.b32.xlu0 %v4008_v36, %s3618_s21  ;;  %577 = vrot.lane.b32.xlu1 %v4010_v37, %s3618_s21  ;;  %740 = vst.msk [vmem:[#allocation3] sm:$0xff] %vm739_vm9, %v716_v38 }
  0xc7   : > { %v765_v41 = vpop.permute.xlu0 %764 }
  0xc8   : > { %620 = vrot.lane.b32.xlu0 %v4017_v39, %s5453_s22  ;;  %581 = vrot.lane.b32.xlu1 %v4019_v40, %s3618_s21  ;;  %789 = vst.msk [vmem:[#allocation3] sm:$0xff] %vm788_vm10, %v765_v41  ;;  %s5469_s21 = smov 64  }
  0xcc   : > { %624 = vrot.lane.b32.xlu0 %v4026_v42, %s5453_s22  ;;  %622 = vrot.lane.b32.xlu1 %v4028_v43, %s5453_s22 }
  0xd0   : > { %628 = vrot.lane.b32.xlu0 %v4034_v44, %s5453_s22  ;;  %626 = vrot.lane.b32.xlu1 %v4036_v45, %s5453_s22 }
  0xd4   : > { %670 = vrot.lane.b32.xlu0 %v3913_v53, %s3620_s23  ;;  %630 = vrot.lane.b32.xlu1 %v4042_v46, %s5453_s22  ;;  %s5463_s22 = smov 88  }
  0xd8   : > { %674 = vrot.lane.b32.xlu0 %v3939_v5, %s3620_s23  ;;  %668 = vrot.lane.b32.xlu1 %v3915_v55, %s3620_s23 }
  0xdc   : > { %678 = vrot.lane.b32.xlu0 %v3962_v16, %s3620_s23  ;;  %672 = vrot.lane.b32.xlu1 %v3928_v61, %s3620_s23 }
  0xe0   : > { %719 = vrot.lane.b32.xlu0 %v3902_v49, %s5451_s29  ;;  %676 = vrot.lane.b32.xlu1 %v3948_v10, %s3620_s23 }
  0xe4   : > { %723 = vrot.lane.b32.xlu0 %v3932_v63, %s5451_s29  ;;  %680 = vrot.lane.b32.xlu1 %v4060_v47, %s3620_s23  ;;  %s3632_s23 = smov 68  }
  0xe8   : > { %727 = vrot.lane.b32.xlu0 %v3956_v15, %s5451_s29  ;;  %717 = vrot.lane.b32.xlu1 %v3904_v50, %s5451_s29 }
  0xec   : > { %768 = vrot.lane.b32.xlu0 %v3971_v20, %s3622_s8  ;;  %721 = vrot.lane.b32.xlu1 %v3919_v58, %s5451_s29 }
  0xf0   : > { %772 = vrot.lane.b32.xlu0 %v3981_v26, %s3622_s8  ;;  %725 = vrot.lane.b32.xlu1 %v3943_v7, %s5451_s29 }
  0xf4   : > { %776 = vrot.lane.b32.xlu0 %v3991_v30, %s3622_s8  ;;  %729 = vrot.lane.b32.xlu1 %v4078_v48, %s5451_s29  ;;  %s5459_s29 = smov 84  }
  0xf8   : > { %813 = vrot.lane.b32.xlu0 %v3877_v23, %s5449_s9  ;;  %766 = vrot.lane.b32.xlu1 %v3954_v14, %s3622_s8 }
  0xfc   : > { %817 = vrot.lane.b32.xlu0 %v4001_v34, %s5449_s9  ;;  %770 = vrot.lane.b32.xlu1 %v3969_v17, %s3622_s8 }
 0x100   : > { %821 = vrot.lane.b32.xlu0 %v4010_v37, %s5449_s9  ;;  %774 = vrot.lane.b32.xlu1 %v3979_v24, %s3622_s8 }
 0x104   : > { %825 = vrot.lane.b32.xlu0 %v4019_v40, %s5449_s9  ;;  %778 = vrot.lane.b32.xlu1 %v4096_v51, %s3622_s8  ;;  %s5467_s8 = smov 72  }
 0x108   : > { %862 = vrot.lane.b32.xlu0 %v3882_v25, %s3624_s13  ;;  %815 = vrot.lane.b32.xlu1 %v3989_v29, %s5449_s9  ;;  %v4116_v25 = vld [vmem:[#allocation2 + $0x83] sm:$0xff] }
 0x10c   : > { %866 = vrot.lane.b32.xlu0 %v4028_v43, %s3624_s13  ;;  %819 = vrot.lane.b32.xlu1 %v3999_v33, %s5449_s9 }
 0x110   : > { %870 = vrot.lane.b32.xlu0 %v4036_v45, %s3624_s13  ;;  %823 = vrot.lane.b32.xlu1 %v4008_v36, %s5449_s9 }
 0x112   : > { %v476_v23 = vpop.permute.xlu1 %475  ;;  %v474_v52 = vpop.permute.xlu0 %473 }
 0x113   : > { %497 = vst.msk [vmem:[#allocation3 + $0x18] sm:$0xff] %vm493_vm4, %v476_v23  ;;  %496 = vst.msk [vmem:[#allocation3 + $0x10] sm:$0xff] %vm493_vm4, %v474_v52 }
 0x114   : > { %874 = vrot.lane.b32.xlu0 %v4042_v46, %s3624_s13  ;;  %827 = vrot.lane.b32.xlu1 %v4116_v25, %s5449_s9  ;;  %s5461_s9 = smov 80  }
 0x116   : > { %v478_v54 = vpop.permute.xlu0 %477 }
 0x117   : > { %498 = vst.msk [vmem:[#allocation3 + $0x20] sm:$0xff] %vm493_vm4, %v478_v54 }
 0x118   : > { %911 = vrot.lane.b32.xlu0 %v3915_v55, %s5455_s14  ;;  %864 = vrot.lane.b32.xlu1 %v4017_v39, %s3624_s13 }
 0x11a   : > { %v480_v56 = vpop.permute.xlu1 %479 }
 0x11b   : > { %499 = vst.msk [vmem:[#allocation3 + $0x28] sm:$0xff] %vm493_vm4, %v480_v56 }
 0x11c   : > { %915 = vrot.lane.b32.xlu0 %v3928_v61, %s5455_s14  ;;  %868 = vrot.lane.b32.xlu1 %v4026_v42, %s3624_s13 }
 0x11e   : > { %v482_v57 = vpop.permute.xlu0 %481 }
 0x11f   : > { %500 = vst.msk [vmem:[#allocation3 + $0x30] sm:$0xff] %vm493_vm4, %v482_v57 }
 0x120   : > { %960 = vrot.lane.b32.xlu0 %v3904_v50, %s3626_s15  ;;  %872 = vrot.lane.b32.xlu1 %v4034_v44, %s3624_s13 }
 0x122   : > { %v484_v55 = vpop.permute.xlu1 %483  ;;  %v523_v59 = vpop.permute.xlu0 %522 }
 0x123   : > { %501 = vst.msk [vmem:[#allocation3 + $0x38] sm:$0xff] %vm493_vm4, %v484_v55  ;;  %vm1279_vm4 = vcmask 589344  }
 0x124   : > { %545 = vst.msk [vmem:[#allocation3 + $0x10] sm:$0xff] %vm542_vm5, %v523_v59  ;;  %964 = vrot.lane.b32.xlu0 %v3919_v58, %s3626_s15  ;;  %876 = vrot.lane.b32.xlu1 %v4139_v60, %s3624_s13  ;;  %s3634_s13 = smov 76  }
 0x126   : > { %v525_v62 = vpop.permute.xlu1 %524  ;;  %v527_v1 = vpop.permute.xlu0 %526 }
 0x127   : > { %546 = vst.msk [vmem:[#allocation3 + $0x18] sm:$0xff] %vm542_vm5, %v525_v62  ;;  %547 = vst.msk [vmem:[#allocation3 + $0x20] sm:$0xff] %vm542_vm5, %v527_v1 }
 0x128   : > { %1009 = vrot.lane.b32.xlu0 %v3954_v14, %s5473_s16  ;;  %913 = vrot.lane.b32.xlu1 %v3913_v53, %s5455_s14 }
 0x12a   : > { %v529_v50 = vpop.permute.xlu1 %528  ;;  %v531_v2 = vpop.permute.xlu0 %530 }
 0x12b   : > { %548 = vst.msk [vmem:[#allocation3 + $0x28] sm:$0xff] %vm542_vm5, %v529_v50  ;;  %549 = vst.msk [vmem:[#allocation3 + $0x30] sm:$0xff] %vm542_vm5, %v531_v2 }
 0x12c   : > { %1013 = vrot.lane.b32.xlu0 %v3969_v17, %s5473_s16  ;;  %917 = vrot.lane.b32.xlu1 %v3939_v5, %s5455_s14 }
 0x12e   : > { %v533_v3 = vpop.permute.xlu1 %532  ;;  %v572_v4 = vpop.permute.xlu0 %571 }
 0x12f   : > { %550 = vst.msk [vmem:[#allocation3 + $0x38] sm:$0xff] %vm542_vm5, %v533_v3  ;;  %vm1328_vm5 = vcmask 622144  }
 0x130   : > { %594 = vst.msk [vmem:[#allocation3 + $0x10] sm:$0xff] %vm591_vm6, %v572_v4  ;;  %1058 = vrot.lane.b32.xlu0 %v3989_v29, %s3628_s17  ;;  %962 = vrot.lane.b32.xlu1 %v3902_v49, %s3626_s15 }
 0x132   : > { %v574_v6 = vpop.permute.xlu1 %573  ;;  %v576_v8 = vpop.permute.xlu0 %575 }
 0x133   : > { %595 = vst.msk [vmem:[#allocation3 + $0x18] sm:$0xff] %vm591_vm6, %v574_v6  ;;  %596 = vst.msk [vmem:[#allocation3 + $0x20] sm:$0xff] %vm591_vm6, %v576_v8 }
 0x134   : > { %1062 = vrot.lane.b32.xlu0 %v3999_v33, %s3628_s17  ;;  %966 = vrot.lane.b32.xlu1 %v3932_v63, %s3626_s15 }
 0x136   : > { %v578_v9 = vpop.permute.xlu1 %577  ;;  %v580_v11 = vpop.permute.xlu0 %579 }
 0x137   : > { %597 = vst.msk [vmem:[#allocation3 + $0x28] sm:$0xff] %vm591_vm6, %v578_v9  ;;  %598 = vst.msk [vmem:[#allocation3 + $0x30] sm:$0xff] %vm591_vm6, %v580_v11 }
 0x138   : > { %1107 = vrot.lane.b32.xlu0 %v4017_v39, %s5471_s18  ;;  %1011 = vrot.lane.b32.xlu1 %v3971_v20, %s5473_s16 }
 0x13a   : > { %v582_v12 = vpop.permute.xlu1 %581  ;;  %v621_v13 = vpop.permute.xlu0 %620 }
 0x13b   : > { %599 = vst.msk [vmem:[#allocation3 + $0x38] sm:$0xff] %vm591_vm6, %v582_v12  ;;  %vm1377_vm6 = vcmask 654944  }
 0x13c   : > { %643 = vst.msk [vmem:[#allocation3 + $0x10] sm:$0xff] %vm640_vm7, %v621_v13  ;;  %1111 = vrot.lane.b32.xlu0 %v4026_v42, %s5471_s18  ;;  %1015 = vrot.lane.b32.xlu1 %v3981_v26, %s5473_s16 }
 0x13e   : > { %v623_v14 = vpop.permute.xlu1 %622  ;;  %v625_v18 = vpop.permute.xlu0 %624 }
 0x13f   : > { %644 = vst.msk [vmem:[#allocation3 + $0x18] sm:$0xff] %vm640_vm7, %v623_v14  ;;  %645 = vst.msk [vmem:[#allocation3 + $0x20] sm:$0xff] %vm640_vm7, %v625_v18 }
 0x140   : > { %1157 = vrot.lane.b32.xlu0 %v3913_v53, %s3630_s19  ;;  %1060 = vrot.lane.b32.xlu1 %v4001_v34, %s3628_s17 }
 0x142   : > { %v627_v19 = vpop.permute.xlu1 %626  ;;  %v629_v21 = vpop.permute.xlu0 %628 }
 0x143   : > { %646 = vst.msk [vmem:[#allocation3 + $0x28] sm:$0xff] %vm640_vm7, %v627_v19  ;;  %647 = vst.msk [vmem:[#allocation3 + $0x30] sm:$0xff] %vm640_vm7, %v629_v21 }
 0x144   : > { %1064 = vrot.lane.b32.xlu1 %v4010_v37, %s3628_s17  ;;  %1161 = vrot.lane.b32.xlu0 %v3939_v5, %s3630_s19 }
 0x146   : > { %v631_v22 = vpop.permute.xlu1 %630  ;;  %v671_v27 = vpop.permute.xlu0 %670 }
 0x147   : > { %648 = vst.msk [vmem:[#allocation3 + $0x38] sm:$0xff] %vm640_vm7, %v631_v22  ;;  %v3529_v22 = vld [vmem:[%s5486_s1 + $0x30] sm:$0xff]   ;;  %vm1427_vm7 = vcmask 687744  }
 0x148   : > { %693 = vst.msk [vmem:[#allocation3 + $0x10] sm:$0xff] %vm690_vm8, %v671_v27  ;;  %1109 = vrot.lane.b32.xlu1 %v4028_v43, %s5471_s18  ;;  %1206 = vrot.lane.b32.xlu0 %v3902_v49, %s5469_s21 }
 0x14a   : > { %v669_v53 = vpop.permute.xlu1 %668  ;;  %v675_v28 = vpop.permute.xlu0 %674 }
 0x14b   : > { %692 = vst.msk [vmem:[#allocation3 + $0x8] sm:$0xff] %vm690_vm8, %v669_v53  ;;  %695 = vst.msk [vmem:[#allocation3 + $0x20] sm:$0xff] %vm690_vm8, %v675_v28  ;;  %v3530_v28 = vld [vmem:[%s5486_s1 + $0x28] sm:$0xff]  }
 0x14c   : > { %1113 = vrot.lane.b32.xlu1 %v4036_v45, %s5471_s18  ;;  %1210 = vrot.lane.b32.xlu0 %v3932_v63, %s5469_s21 }
 0x14e   : > { %v673_v29 = vpop.permute.xlu1 %672  ;;  %v679_v31 = vpop.permute.xlu0 %678 }
 0x14f   : > { %694 = vst.msk [vmem:[#allocation3 + $0x18] sm:$0xff] %vm690_vm8, %v673_v29  ;;  %697 = vst.msk [vmem:[#allocation3 + $0x30] sm:$0xff] %vm690_vm8, %v679_v31  ;;  %v4352_v29 = vld [vmem:[#allocation2 + $0x92] sm:$0xff]  ;;  %v3531_v31 = vld [vmem:[%s5486_s1 + $0x20] sm:$0xff]  }
 0x150   : > { %1159 = vrot.lane.b32.xlu1 %v3928_v61, %s3630_s19  ;;  %1255 = vrot.lane.b32.xlu0 %v3971_v20, %s3632_s23 }
 0x152   : > { %v677_v49 = vpop.permute.xlu1 %676  ;;  %v720_v32 = vpop.permute.xlu0 %719 }
 0x153   : > { %696 = vst.msk [vmem:[#allocation3 + $0x28] sm:$0xff] %vm690_vm8, %v677_v49  ;;  %v3532_v49 = vld [vmem:[%s5486_s1 + $0x18] sm:$0xff]  }
 0x154   : > { %742 = vst.msk [vmem:[#allocation3 + $0x10] sm:$0xff] %vm739_vm9, %v720_v32  ;;  %1163 = vrot.lane.b32.xlu1 %v3948_v10, %s3630_s19  ;;  %1259 = vrot.lane.b32.xlu0 %v3981_v26, %s3632_s23 }
 0x156   : > { %v681_v35 = vpop.permute.xlu1 %680  ;;  %v724_v38 = vpop.permute.xlu0 %723 }
 0x157   : > { %698 = vst.msk [vmem:[#allocation3 + $0x38] sm:$0xff] %vm690_vm8, %v681_v35  ;;  %vm1476_vm8 = vcmask 720544  }
 0x158   : > { %744 = vst.msk [vmem:[#allocation3 + $0x20] sm:$0xff] %vm739_vm9, %v724_v38  ;;  %1208 = vrot.lane.b32.xlu1 %v3919_v58, %s5469_s21  ;;  %1304 = vrot.lane.b32.xlu0 %v4001_v34, %s5467_s8  ;;  %v3533_v38 = vld [vmem:[%s5486_s1 + $0x10] sm:$0xff]  }
 0x15a   : > { %v718_v20 = vpop.permute.xlu1 %717  ;;  %v728_v39 = vpop.permute.xlu0 %727 }
 0x15b   : > { %741 = vst.msk [vmem:[#allocation3 + $0x8] sm:$0xff] %vm739_vm9, %v718_v20  ;;  %746 = vst.msk [vmem:[#allocation3 + $0x30] sm:$0xff] %vm739_vm9, %v728_v39 }
 0x15c   : > { %1212 = vrot.lane.b32.xlu1 %v3943_v7, %s5469_s21  ;;  %1308 = vrot.lane.b32.xlu0 %v4010_v37, %s5467_s8 }
 0x15e   : > { %v722_v41 = vpop.permute.xlu1 %721  ;;  %v769_v23 = vpop.permute.xlu0 %768 }
 0x15f   : > { %743 = vst.msk [vmem:[#allocation3 + $0x18] sm:$0xff] %vm739_vm9, %v722_v41  ;;  %v3534_v41 = vld [vmem:[%s5486_s1 + $0x8] sm:$0xff]  }
 0x160   : > { %791 = vst.msk [vmem:[#allocation3 + $0x10] sm:$0xff] %vm788_vm10, %v769_v23  ;;  %1257 = vrot.lane.b32.xlu1 %v3969_v17, %s3632_s23  ;;  %1353 = vrot.lane.b32.xlu0 %v4028_v43, %s3634_s13  ;;  %v4390_v23 = vld [vmem:[#allocation2 + $0x93] sm:$0xff] }
 0x162   : > { %v726_v34 = vpop.permute.xlu1 %725  ;;  %v773_v52 = vpop.permute.xlu0 %772 }
 0x163   : > { %745 = vst.msk [vmem:[#allocation3 + $0x28] sm:$0xff] %vm739_vm9, %v726_v34  ;;  %v3535_v34 = vld [vmem:[%s5486_s1] sm:$0xff]  }
 0x164   : > { %793 = vst.msk [vmem:[#allocation3 + $0x20] sm:$0xff] %vm788_vm10, %v773_v52  ;;  %1261 = vrot.lane.b32.xlu1 %v3979_v24, %s3632_s23  ;;  %1357 = vrot.lane.b32.xlu0 %v4036_v45, %s3634_s13 }
 0x166   : > { %v730_v54 = vpop.permute.xlu1 %729  ;;  %v777_v56 = vpop.permute.xlu0 %776 }
 0x167   : > { %747 = vst.msk [vmem:[#allocation3 + $0x38] sm:$0xff] %vm739_vm9, %v730_v54  ;;  %vm1525_vm9 = vcmask 753344  }
 0x168   : > { %795 = vst.msk [vmem:[#allocation3 + $0x30] sm:$0xff] %vm788_vm10, %v777_v56  ;;  %1306 = vrot.lane.b32.xlu1 %v3999_v33, %s5467_s8  ;;  %1403 = vrot.lane.b32.xlu0 %v3928_v61, %s5461_s9 }
 0x16a   : > { %v767_v43 = vpop.permute.xlu1 %766  ;;  %v814_v57 = vpop.permute.xlu0 %813 }
 0x16b   : > { %790 = vst.msk [vmem:[#allocation3 + $0x8] sm:$0xff] %vm788_vm10, %v767_v43 }
 0x16c   : > { %838 = vst.msk [vmem:[#allocation3] sm:$0xff] %vm837_vm11, %v814_v57  ;;  %1310 = vrot.lane.b32.xlu1 %v4008_v36, %s5467_s8  ;;  %919 = vrot.lane.b32.xlu0 %v3948_v10, %s5455_s14 }
 0x16e   : > { %v771_v55 = vpop.permute.xlu1 %770  ;;  %v818_v59 = vpop.permute.xlu0 %817 }
 0x16f   : > { %792 = vst.msk [vmem:[#allocation3 + $0x18] sm:$0xff] %vm788_vm10, %v771_v55  ;;  %v4412_v55 = vld [vmem:[#allocation2 + $0x94] sm:$0xff] }
 0x170   : > { %840 = vst.msk [vmem:[#allocation3 + $0x10] sm:$0xff] %vm837_vm11, %v818_v59  ;;  %1355 = vrot.lane.b32.xlu1 %v4026_v42, %s3634_s13  ;;  %1407 = vrot.lane.b32.xlu0 %v3948_v10, %s5461_s9 }
 0x172   : > { %v775_v61 = vpop.permute.xlu1 %774  ;;  %v822_v62 = vpop.permute.xlu0 %821 }
 0x173   : > { %794 = vst.msk [vmem:[#allocation3 + $0x28] sm:$0xff] %vm788_vm10, %v775_v61 }
 0x174   : > { %842 = vst.msk [vmem:[#allocation3 + $0x20] sm:$0xff] %vm837_vm11, %v822_v62  ;;  %1359 = vrot.lane.b32.xlu1 %v4034_v44, %s3634_s13  ;;  %1452 = vrot.lane.b32.xlu0 %v3919_v58, %s5459_s29  ;;  %v1148_v62 = vld [vmem:[#allocation2 + $0xa0] sm:$0xff] }
 0x176   : > { %v779_v1 = vpop.permute.xlu1 %778  ;;  %v826_v50 = vpop.permute.xlu0 %825 }
 0x177   : > { %796 = vst.msk [vmem:[#allocation3 + $0x38] sm:$0xff] %vm788_vm10, %v779_v1  ;;  %vm1574_vm10 = vcmask 786144  }
 0x178   : > { %844 = vst.msk [vmem:[#allocation3 + $0x30] sm:$0xff] %vm837_vm11, %v826_v50  ;;  %1405 = vrot.lane.b32.xlu1 %v3939_v5, %s5461_s9  ;;  %923 = vrot.lane.b32.xlu0 %v4060_v47, %s5455_s14 }
 0x17a   : > { %v816_v10 = vpop.permute.xlu1 %815  ;;  %v863_v2 = vpop.permute.xlu0 %862 }
 0x17b   : > { %839 = vst.msk [vmem:[#allocation3 + $0x8] sm:$0xff] %vm837_vm11, %v816_v10 }
 0x17c   : > { %887 = vst.msk [vmem:[#allocation3] sm:$0xff] %vm886_vm12, %v863_v2  ;;  %921 = vrot.lane.b32.xlu1 %v3962_v16, %s5455_s14  ;;  %968 = vrot.lane.b32.xlu0 %v3943_v7, %s3626_s15 }
 0x17e   : > { %v820_v58 = vpop.permute.xlu1 %819  ;;  %v867_v3 = vpop.permute.xlu0 %866 }
 0x17f   : > { %841 = vst.msk [vmem:[#allocation3 + $0x18] sm:$0xff] %vm837_vm11, %v820_v58  ;;  %v1197_v58 = vld [vmem:[#allocation2 + $0xa1] sm:$0xff] }
 0x180   : > { %889 = vst.msk [vmem:[#allocation3 + $0x10] sm:$0xff] %vm886_vm12, %v867_v3  ;;  %1409 = vrot.lane.b32.xlu1 %v3962_v16, %s5461_s9  ;;  %1456 = vrot.lane.b32.xlu0 %v3943_v7, %s5459_s29  ;;  %v4291_v7 = vld [vmem:[#allocation2 + $0x90] sm:$0xff]  ;;  %s5465_s9 = smov 96  }
 0x182   : > { %v824_v5 = vpop.permute.xlu1 %823  ;;  %v871_v4 = vpop.permute.xlu0 %870 }
 0x183   : > { %843 = vst.msk [vmem:[#allocation3 + $0x28] sm:$0xff] %vm837_vm11, %v824_v5 }
 0x184   : > { %891 = vst.msk [vmem:[#allocation3 + $0x20] sm:$0xff] %vm886_vm12, %v871_v4  ;;  %1454 = vrot.lane.b32.xlu1 %v3932_v63, %s5459_s29  ;;  %1501 = vrot.lane.b32.xlu0 %v3969_v17, %s5463_s22 }
 0x186   : > { %v828_v6 = vpop.permute.xlu1 %827  ;;  %v875_v8 = vpop.permute.xlu0 %874 }
 0x187   : > { %845 = vst.msk [vmem:[#allocation3 + $0x38] sm:$0xff] %vm837_vm11, %v828_v6  ;;  %vm1811_vm11 = vcmask 64512  }
 0x188   : > { %893 = vst.msk [vmem:[#allocation3 + $0x30] sm:$0xff] %vm886_vm12, %v875_v8  ;;  %925 = vrot.lane.b32.xlu1 %v4291_v7, %s5455_s14  ;;  %972 = vrot.lane.b32.xlu0 %v4078_v48, %s3626_s15  ;;  %s3638_s14 = smov 92   ;;  %v1246_v8 = vld [vmem:[#allocation2 + $0xa2] sm:$0xff] }
 0x189   : > { %1815 = vst.msk [vmem:[#allocation4 + $0x10] sm:$0xff] %vm1811_vm11, %v3614_v0  ;;  %1812 = vst.msk [vmem:[#allocation4] sm:$0xff] %vm1811_vm11, %v3614_v0 }
 0x18a   : > { %v865_v63 = vpop.permute.xlu1 %864  ;;  %v912_v9 = vpop.permute.xlu0 %911  ;;  %1818 = vst.msk [vmem:[#allocation4 + $0xa0] sm:$0xff] %vm1811_vm11, %v3614_v0  ;;  %1820 = vst.msk [vmem:[#allocation4 + $0xb0] sm:$0xff] %vm1811_vm11, %v3614_v0 }
 0x18b   : > { %888 = vst.msk [vmem:[#allocation3 + $0x8] sm:$0xff] %vm886_vm12, %v865_v63 }
 0x18c   : > { %936 = vst.msk [vmem:[#allocation3] sm:$0xff] %vm935_vm13, %v912_v9  ;;  %970 = vrot.lane.b32.xlu1 %v3956_v15, %s3626_s15  ;;  %1017 = vrot.lane.b32.xlu0 %v3979_v24, %s5473_s16 }
 0x18e   : > { %v869_v17 = vpop.permute.xlu1 %868  ;;  %v916_v11 = vpop.permute.xlu0 %915 }
 0x18f   : > { %890 = vst.msk [vmem:[#allocation3 + $0x18] sm:$0xff] %vm886_vm12, %v869_v17 }
 0x190   : > { %938 = vst.msk [vmem:[#allocation3 + $0x10] sm:$0xff] %vm935_vm13, %v916_v11  ;;  %1458 = vrot.lane.b32.xlu1 %v3956_v15, %s5459_s29  ;;  %1505 = vrot.lane.b32.xlu0 %v3979_v24, %s5463_s22  ;;  %v4317_v15 = vld [vmem:[#allocation2 + $0x91] sm:$0xff]  ;;  %s5493_s29 = smov 32  }
 0x192   : > { %v873_v12 = vpop.permute.xlu1 %872  ;;  %v961_v13 = vpop.permute.xlu0 %960 }
 0x193   : > { %892 = vst.msk [vmem:[#allocation3 + $0x28] sm:$0xff] %vm886_vm12, %v873_v12  ;;  %v1391_v12 = vld [vmem:[#allocation2 + $0x80] sm:$0xff] }
 0x194   : > { %985 = vst.msk [vmem:[#allocation3] sm:$0xff] %vm984_vm14, %v961_v13  ;;  %1503 = vrot.lane.b32.xlu1 %v3981_v26, %s5463_s22  ;;  %1550 = vrot.lane.b32.xlu0 %v3999_v33, %s3638_s14  ;;  %v3528_v33 = vld [vmem:[%s5486_s1 + $0x38] sm:$0xff]   ;;  %v1295_v13 = vld [vmem:[#allocation2 + $0xa3] sm:$0xff]  ;;  %s5477_s1 = smov 112  }
 0x195   : > { %3435 = vmatprep.subr.bf16.mxu0 %v3528_v33 }
 0x196   : > { %v877_v14 = vpop.permute.xlu1 %876  ;;  %v965_v18 = vpop.permute.xlu0 %964  ;;  %3436 = vmatpush3.bf16.msra.mxu0 %v3528_v33  ;;  %v1440_v33 = vld [vmem:[#allocation2 + $0x81] sm:$0xff] }
 0x197   : > { %894 = vst.msk [vmem:[#allocation3 + $0x38] sm:$0xff] %vm886_vm12, %v877_v14  ;;  %3437 = vmatprep.subr.bf16.mxu0 %v3529_v22  ;;  %vm1813_vm12 = vcmask 60416  }
 0x198   : > { %987 = vst.msk [vmem:[#allocation3 + $0x10] sm:$0xff] %vm984_vm14, %v965_v18  ;;  %974 = vrot.lane.b32.xlu1 %v4317_v15, %s3626_s15  ;;  %1021 = vrot.lane.b32.xlu0 %v4096_v51, %s5473_s16  ;;  %s5494_s15 = smov 40  }
 0x199   : > { %1816 = vst.msk [vmem:[#allocation4 + $0x18] sm:$0xf] %vm1813_vm12, %v3614_v0  ;;  %1814 = vst.msk [vmem:[#allocation4 + $0x8] sm:$0xf] %vm1813_vm12, %v3614_v0 }
 0x19a   : > { %v914_v24 = vpop.permute.xlu1 %913  ;;  %v1010_v26 = vpop.permute.xlu0 %1009  ;;  %3438 = vmatpush3.bf16.msra.mxu0 %v3529_v22  ;;  %1819 = vst.msk [vmem:[#allocation4 + $0xa8] sm:$0xf] %vm1813_vm12, %v3614_v0  ;;  %1821 = vst.msk [vmem:[#allocation4 + $0xb8] sm:$0xf] %vm1813_vm12, %v3614_v0  ;;  %vm2493_vm12 = vcmask 917312  }
 0x19b   : > { %937 = vst.msk [vmem:[#allocation3 + $0x8] sm:$0xff] %vm935_vm13, %v914_v24  ;;  %3439 = vmatprep.subr.bf16.mxu0 %v3530_v28 }
 0x19c   : > { %1034 = vst.msk [vmem:[#allocation3] sm:$0xff] %vm1033_vm15, %v1010_v26  ;;  %1019 = vrot.lane.b32.xlu1 %v3991_v30, %s5473_s16  ;;  %1066 = vrot.lane.b32.xlu0 %v4008_v36, %s3628_s17 }
 0x19e   : > { %v918_v19 = vpop.permute.xlu1 %917  ;;  %v1014_v21 = vpop.permute.xlu0 %1013  ;;  %3440 = vmatpush3.bf16.msra.mxu0 %v3530_v28  ;;  %v1394_v28 = vld [vmem:[#allocation2 + $0xb0] sm:$0xff] }
 0x19f   : > { %939 = vst.msk [vmem:[#allocation3 + $0x18] sm:$0xff] %vm935_vm13, %v918_v19  ;;  %3441 = vmatprep.subr.bf16.mxu0 %v3531_v31  ;;  %v1344_v19 = vld [vmem:[#allocation2 + $0xa4] sm:$0xff] }
 0x1a0   : > { %1036 = vst.msk [vmem:[#allocation3 + $0x10] sm:$0xff] %vm1033_vm15, %v1014_v21  ;;  %1507 = vrot.lane.b32.xlu1 %v3991_v30, %s5463_s22  ;;  %1554 = vrot.lane.b32.xlu0 %v4008_v36, %s3638_s14  ;;  %s5492_s22 = smov 24  }
 0x1a2   : > { %v963_v27 = vpop.permute.xlu1 %962  ;;  %v1059_v53 = vpop.permute.xlu0 %1058  ;;  %3442 = vmatpush3.bf16.msra.mxu0 %v3531_v31 }
 0x1a3   : > { %986 = vst.msk [vmem:[#allocation3 + $0x8] sm:$0xff] %vm984_vm14, %v963_v27  ;;  %3443 = vmatprep.subr.bf16.mxu0 %v3532_v49 }
 0x1a4   : > { %1083 = vst.msk [vmem:[#allocation3] sm:$0xff] %vm1082_vm0, %v1059_v53  ;;  %1552 = vrot.lane.b32.xlu1 %v4010_v37, %s3638_s14  ;;  %1599 = vrot.lane.b32.xlu0 %v4026_v42, %s5465_s9 }
 0x1a6   : > { %v967_v30 = vpop.permute.xlu1 %966  ;;  %v1063_v36 = vpop.permute.xlu0 %1062  ;;  %3444 = vmatpush3.bf16.msra.mxu0 %v3532_v49 }
 0x1a7   : > { %988 = vst.msk [vmem:[#allocation3 + $0x18] sm:$0xff] %vm984_vm14, %v967_v30  ;;  %3445 = vmatprep.subr.bf16.mxu0 %v3533_v38 }
 0x1a8   : > { %1085 = vst.msk [vmem:[#allocation3 + $0x10] sm:$0xff] %vm1082_vm0, %v1063_v36  ;;  %1023 = vrot.lane.b32.xlu1 %v4352_v29, %s5473_s16  ;;  %1070 = vrot.lane.b32.xlu0 %v4116_v25, %s3628_s17 }
 0x1aa   : > { %v1012_v37 = vpop.permute.xlu1 %1011  ;;  %v1108_v42 = vpop.permute.xlu0 %1107  ;;  %3446 = vmatpush3.bf16.msra.mxu0 %v3533_v38 }
 0x1ab   : > { %1035 = vst.msk [vmem:[#allocation3 + $0x8] sm:$0xff] %vm1033_vm15, %v1012_v37  ;;  %3447 = vmatprep.subr.bf16.mxu0 %v3534_v41 }
 0x1ac   : > { %1132 = vst.msk [vmem:[#allocation3] sm:$0xff] %vm1131_vm1, %v1108_v42  ;;  %1068 = vrot.lane.b32.xlu1 %v4019_v40, %s3628_s17  ;;  %1115 = vrot.lane.b32.xlu0 %v4034_v44, %s5471_s18 }
 0x1ae   : > { %v1016_v32 = vpop.permute.xlu1 %1015  ;;  %v1112_v35 = vpop.permute.xlu0 %1111  ;;  %3448 = vmatpush3.bf16.msra.mxu0 %v3534_v41 }
 0x1af   : > { %1037 = vst.msk [vmem:[#allocation3 + $0x18] sm:$0xff] %vm1033_vm15, %v1016_v32  ;;  %3449 = vmatprep.subr.bf16.mxu0 %v3535_v34 }
 0x1b0   : > { %1134 = vst.msk [vmem:[#allocation3 + $0x10] sm:$0xff] %vm1131_vm1, %v1112_v35  ;;  %1556 = vrot.lane.b32.xlu1 %v4019_v40, %s3638_s14  ;;  %1603 = vrot.lane.b32.xlu0 %v4034_v44, %s5465_s9 }
 0x1b2   : > { %v1061_v20 = vpop.permute.xlu1 %1060  ;;  %v1158_v39 = vpop.permute.xlu0 %1157  ;;  %3450 = vmatpush3.bf16.msra.mxu0 %v3535_v34 }
 0x1b3   : > { %1084 = vst.msk [vmem:[#allocation3 + $0x8] sm:$0xff] %vm1082_vm0, %v1061_v20 }
 0x1b4   : > { %1182 = vst.msk [vmem:[#allocation3] sm:$0xff] %vm1181_vm2, %v1158_v39  ;;  %1601 = vrot.lane.b32.xlu1 %v4036_v45, %s5465_s9  ;;  %1119 = vrot.lane.b32.xlu0 %v4139_v60, %s5471_s18 }
 0x1b6   : > { %v1065_v40 = vpop.permute.xlu1 %1064  ;;  %v1162_v44 = vpop.permute.xlu0 %1161 }
 0x1b7   : > { %1086 = vst.msk [vmem:[#allocation3 + $0x18] sm:$0xff] %vm1082_vm0, %v1065_v40 }
 0x1b8   : > { %1184 = vst.msk [vmem:[#allocation3 + $0x10] sm:$0xff] %vm1181_vm2, %v1162_v44  ;;  %1072 = vrot.lane.b32.xlu1 %v4390_v23, %s3628_s17  ;;  %1165 = vrot.lane.b32.xlu0 %v3962_v16, %s3630_s19  ;;  %v1194_v16 = vld [vmem:[#allocation2 + $0x71] sm:$0xff]  ;;  %s5487_s17 = smov 80  }
 0x1b9   : > { %v1590_v44 = vld [vmem:[#allocation2 + $0xb4] sm:$0xff] }
 0x1ba   : > { %v1110_v45 = vpop.permute.xlu1 %1109  ;;  %v1207_v52 = vpop.permute.xlu0 %1206 }
 0x1bb   : > { %1133 = vst.msk [vmem:[#allocation3 + $0x8] sm:$0xff] %vm1131_vm1, %v1110_v45 }
 0x1bc   : > { %1231 = vst.msk [vmem:[#allocation3] sm:$0xff] %vm1230_vm3, %v1207_v52  ;;  %1117 = vrot.lane.b32.xlu1 %v4042_v46, %s5471_s18  ;;  %1169 = vrot.lane.b32.xlu0 %v4291_v7, %s3630_s19 }
 0x1be   : > { %v1114_v54 = vpop.permute.xlu1 %1113  ;;  %v1211_v56 = vpop.permute.xlu0 %1210 }
 0x1bf   : > { %1135 = vst.msk [vmem:[#allocation3 + $0x18] sm:$0xff] %vm1131_vm1, %v1114_v54  ;;  %v1865_v54 = vld [vmem:[#allocation4 + $0x11] sm:$0xff] }
 0x1c0   : > { %1233 = vst.msk [vmem:[#allocation3 + $0x10] sm:$0xff] %vm1230_vm3, %v1211_v56  ;;  %1605 = vrot.lane.b32.xlu1 %v4042_v46, %s5465_s9  ;;  %1214 = vrot.lane.b32.xlu0 %v1194_v16, %s5469_s21  ;;  %v1243_v46 = vld [vmem:[#allocation2 + $0x72] sm:$0xff] }
 0x1c2   : > { %v1160_v43 = vpop.permute.xlu1 %1159  ;;  %v1256_v57 = vpop.permute.xlu0 %1255 }
 0x1c3   : > { %1183 = vst.msk [vmem:[#allocation3 + $0x8] sm:$0xff] %vm1181_vm2, %v1160_v43  ;;  %v2061_v43 = vld [vmem:[#allocation4 + $0x10] sm:$0xff] }
 0x1c4   : > { %1280 = vst.msk [vmem:[#allocation3] sm:$0xff] %vm1279_vm4, %v1256_v57  ;;  %1121 = vrot.lane.b32.xlu1 %v4412_v55, %s5471_s18  ;;  %1218 = vrot.lane.b32.xlu0 %v4317_v15, %s5469_s21  ;;  %v1864_v57 = vld [vmem:[#allocation4 + $0x1] sm:$0xff] }
 0x1c5   : > { %1857 = vst.msk [vmem:[#allocation5 + $0x10] sm:$0xff] %vm1811_vm11, %v2061_v43 }
 0x1c6   : > { %v1164_v59 = vpop.permute.xlu1 %1163  ;;  %v1260_v61 = vpop.permute.xlu0 %1259 }
 0x1c7   : > { %1185 = vst.msk [vmem:[#allocation3 + $0x18] sm:$0xff] %vm1181_vm2, %v1164_v59 }
 0x1c8   : > { %1282 = vst.msk [vmem:[#allocation3 + $0x10] sm:$0xff] %vm1279_vm4, %v1260_v61  ;;  %1167 = vrot.lane.b32.xlu1 %v4060_v47, %s3630_s19  ;;  %1263 = vrot.lane.b32.xlu0 %v1243_v46, %s3632_s23  ;;  %v1292_v47 = vld [vmem:[#allocation2 + $0x73] sm:$0xff] }
 0x1c9   : > { %v1963_v46 = vld [vmem:[#allocation4 + $0x13] sm:$0xff] }
 0x1ca   : > { %v1209_v1 = vpop.permute.xlu1 %1208  ;;  %v1305_v50 = vpop.permute.xlu0 %1304 }
 0x1cb   : > { %1232 = vst.msk [vmem:[#allocation3 + $0x8] sm:$0xff] %vm1230_vm3, %v1209_v1 }
 0x1cc   : > { %1329 = vst.msk [vmem:[#allocation3] sm:$0xff] %vm1328_vm5, %v1305_v50  ;;  %1171 = vrot.lane.b32.xlu1 %v1148_v62, %s3630_s19  ;;  %1267 = vrot.lane.b32.xlu0 %v4352_v29, %s3632_s23  ;;  %s5488_s19 = smov 84   ;;  %v2012_v50 = vld [vmem:[#allocation4 + $0x14] sm:$0xff] }
 0x1ce   : > { %v1213_v10 = vpop.permute.xlu1 %1212  ;;  %v1309_v2 = vpop.permute.xlu0 %1308 }
 0x1cf   : > { %1234 = vst.msk [vmem:[#allocation3 + $0x18] sm:$0xff] %vm1230_vm3, %v1213_v10 }
 0x1d0   : > { %1331 = vst.msk [vmem:[#allocation3 + $0x10] sm:$0xff] %vm1328_vm5, %v1309_v2  ;;  %1216 = vrot.lane.b32.xlu1 %v4078_v48, %s5469_s21  ;;  %1312 = vrot.lane.b32.xlu0 %v1292_v47, %s5467_s8  ;;  %v1341_v48 = vld [vmem:[#allocation2 + $0x74] sm:$0xff] }
 0x1d2   : > { %v1258_v3 = vpop.permute.xlu1 %1257  ;;  %v1354_v5 = vpop.permute.xlu0 %1353 }
 0x1d3   : > { %1281 = vst.msk [vmem:[#allocation3 + $0x8] sm:$0xff] %vm1279_vm4, %v1258_v3 }
 0x1d4   : > { %1378 = vst.msk [vmem:[#allocation3] sm:$0xff] %vm1377_vm6, %v1354_v5  ;;  %1220 = vrot.lane.b32.xlu1 %v1197_v58, %s5469_s21  ;;  %1316 = vrot.lane.b32.xlu0 %v4390_v23, %s5467_s8 }
 0x1d6   : > { %v1262_v4 = vpop.permute.xlu1 %1261  ;;  %v1358_v6 = vpop.permute.xlu0 %1357 }
 0x1d7   : > { %1283 = vst.msk [vmem:[#allocation3 + $0x18] sm:$0xff] %vm1279_vm4, %v1262_v4 }
 0x1d8   : > { %1380 = vst.msk [vmem:[#allocation3 + $0x10] sm:$0xff] %vm1377_vm6, %v1358_v6  ;;  %1265 = vrot.lane.b32.xlu1 %v4096_v51, %s3632_s23  ;;  %1361 = vrot.lane.b32.xlu0 %v1341_v48, %s3634_s13 }
 0x1da   : > { %v1307_v63 = vpop.permute.xlu1 %1306  ;;  %v1404_v9 = vpop.permute.xlu0 %1403 }
 0x1db   : > { %1330 = vst.msk [vmem:[#allocation3 + $0x8] sm:$0xff] %vm1328_vm5, %v1307_v63 }
 0x1dc   : > { %1428 = vst.msk [vmem:[#allocation3] sm:$0xff] %vm1427_vm7, %v1404_v9  ;;  %1269 = vrot.lane.b32.xlu1 %v1246_v8, %s3632_s23  ;;  %1365 = vrot.lane.b32.xlu0 %v4412_v55, %s3634_s13  ;;  %s5489_s23 = smov 88  }
 0x1de   : > { %v1311_v17 = vpop.permute.xlu1 %1310  ;;  %v920_v11 = vpop.permute.xlu0 %919 }
 0x1df   : > { %1332 = vst.msk [vmem:[#allocation3 + $0x18] sm:$0xff] %vm1328_vm5, %v1311_v17 }
 0x1e0   : > { %940 = vst.msk [vmem:[#allocation3 + $0x20] sm:$0xff] %vm935_vm13, %v920_v11  ;;  %1314 = vrot.lane.b32.xlu1 %v4116_v25, %s5467_s8  ;;  %1411 = vrot.lane.b32.xlu0 %v1391_v12, %s5487_s17 }
 0x1e2   : > { %v1356_v14 = vpop.permute.xlu1 %1355  ;;  %v1408_v18 = vpop.permute.xlu0 %1407 }
 0x1e3   : > { %1379 = vst.msk [vmem:[#allocation3 + $0x8] sm:$0xff] %vm1377_vm6, %v1356_v14 }
 0x1e4   : > { %1430 = vst.msk [vmem:[#allocation3 + $0x10] sm:$0xff] %vm1427_vm7, %v1408_v18  ;;  %1318 = vrot.lane.b32.xlu1 %v1295_v13, %s5467_s8  ;;  %1415 = vrot.lane.b32.xlu0 %v1148_v62, %s5487_s17 }
 0x1e6   : > { %v1360_v24 = vpop.permute.xlu1 %1359  ;;  %v1453_v26 = vpop.permute.xlu0 %1452 }
 0x1e7   : > { %1381 = vst.msk [vmem:[#allocation3 + $0x18] sm:$0xff] %vm1377_vm6, %v1360_v24 }
 0x1e8   : > { %1477 = vst.msk [vmem:[#allocation3] sm:$0xff] %vm1476_vm8, %v1453_v26  ;;  %1363 = vrot.lane.b32.xlu1 %v4139_v60, %s3634_s13  ;;  %1460 = vrot.lane.b32.xlu0 %v1440_v33, %s5488_s19 }
 0x1ea   : > { %v1406_v21 = vpop.permute.xlu1 %1405  ;;  %v924_v22 = vpop.permute.xlu0 %923 }
 0x1eb   : > { %1429 = vst.msk [vmem:[#allocation3 + $0x8] sm:$0xff] %vm1427_vm7, %v1406_v21 }
 0x1ec   : > { %942 = vst.msk [vmem:[#allocation3 + $0x30] sm:$0xff] %vm935_vm13, %v924_v22  ;;  %1367 = vrot.lane.b32.xlu1 %v1344_v19, %s3634_s13  ;;  %1464 = vrot.lane.b32.xlu0 %v1197_v58, %s5488_s19  ;;  %s5491_s13 = smov 16  }
 0x1ee   : > { %v922_v27 = vpop.permute.xlu1 %921  ;;  %v969_v53 = vpop.permute.xlu0 %968 }
 0x1ef   : > { %941 = vst.msk [vmem:[#allocation3 + $0x28] sm:$0xff] %vm935_vm13, %v922_v27 }
 0x1f0   : > { %989 = vst.msk [vmem:[#allocation3 + $0x20] sm:$0xff] %vm984_vm14, %v969_v53  ;;  %1413 = vrot.lane.b32.xlu1 %v4291_v7, %s5487_s17  ;;  %1509 = vrot.lane.b32.xlu0 %v4096_v51, %s5489_s23  ;;  %v1443_v51 = vld [vmem:[#allocation2 + $0xb1] sm:$0xff] }
 0x1f2   : > { %v1410_v30 = vpop.permute.xlu1 %1409  ;;  %v1457_v36 = vpop.permute.xlu0 %1456 }
 0x1f3   : > { %1431 = vst.msk [vmem:[#allocation3 + $0x18] sm:$0xff] %vm1427_vm7, %v1410_v30 }
 0x1f4   : > { %1479 = vst.msk [vmem:[#allocation3 + $0x10] sm:$0xff] %vm1476_vm8, %v1457_v36  ;;  %1417 = vrot.lane.b32.xlu1 %v1394_v28, %s5487_s17  ;;  %1513 = vrot.lane.b32.xlu0 %v1246_v8, %s5489_s23 }
 0x1f6   : > { %v1455_v31 = vpop.permute.xlu1 %1454  ;;  %v1502_v37 = vpop.permute.xlu0 %1501 }
 0x1f7   : > { %1478 = vst.msk [vmem:[#allocation3 + $0x8] sm:$0xff] %vm1476_vm8, %v1455_v31 }
 0x1f8   : > { %1526 = vst.msk [vmem:[#allocation3] sm:$0xff] %vm1525_vm9, %v1502_v37  ;;  %1462 = vrot.lane.b32.xlu1 %v4317_v15, %s5488_s19  ;;  %1558 = vrot.lane.b32.xlu0 %v4116_v25, %s3638_s14  ;;  %v1492_v25 = vld [vmem:[#allocation2 + $0xb2] sm:$0xff] }
 0x1fa   : > { %v926_v7 = vpop.permute.xlu1 %925  ;;  %v973_v42 = vpop.permute.xlu0 %972 }
 0x1fb   : > { %943 = vst.msk [vmem:[#allocation3 + $0x38] sm:$0xff] %vm935_vm13, %v926_v7  ;;  %vm1623_vm13 = vcmask 818944  }
 0x1fc   : > { %991 = vst.msk [vmem:[#allocation3 + $0x30] sm:$0xff] %vm984_vm14, %v973_v42  ;;  %1466 = vrot.lane.b32.xlu1 %v1443_v51, %s5488_s19  ;;  %1562 = vrot.lane.b32.xlu0 %v1295_v13, %s3638_s14  ;;  %s3643_s19 = smov [#allocation6]  }
 0x1fe   : > { %v971_v49 = vpop.permute.xlu1 %970  ;;  %v1018_v32 = vpop.permute.xlu0 %1017 }
 0x1ff   : > { %990 = vst.msk [vmem:[#allocation3 + $0x28] sm:$0xff] %vm984_vm14, %v971_v49 }
 0x200   : > { %1038 = vst.msk [vmem:[#allocation3 + $0x20] sm:$0xff] %vm1033_vm15, %v1018_v32  ;;  %1511 = vrot.lane.b32.xlu1 %v4352_v29, %s5489_s23  ;;  %1607 = vrot.lane.b32.xlu0 %v4139_v60, %s5465_s9  ;;  %v1541_v60 = vld [vmem:[#allocation2 + $0xb3] sm:$0xff] }
 0x202   : > { %v1459_v15 = vpop.permute.xlu1 %1458  ;;  %v1506_v35 = vpop.permute.xlu0 %1505 }
 0x203   : > { %1480 = vst.msk [vmem:[#allocation3 + $0x18] sm:$0xff] %vm1476_vm8, %v1459_v15 }
 0x204   : > { %1528 = vst.msk [vmem:[#allocation3 + $0x10] sm:$0xff] %vm1525_vm9, %v1506_v35  ;;  %1515 = vrot.lane.b32.xlu1 %v1492_v25, %s5489_s23  ;;  %1611 = vrot.lane.b32.xlu0 %v1344_v19, %s5465_s9 }
 0x206   : > { %v1504_v38 = vpop.permute.xlu1 %1503  ;;  %v1551_v20 = vpop.permute.xlu0 %1550 }
 0x207   : > { %1527 = vst.msk [vmem:[#allocation3 + $0x8] sm:$0xff] %vm1525_vm9, %v1504_v38 }
 0x208   : > { %1575 = vst.msk [vmem:[#allocation3] sm:$0xff] %vm1574_vm10, %v1551_v20  ;;  %1560 = vrot.lane.b32.xlu1 %v4390_v23, %s3638_s14 }
 0x20a   : > { %v975_v29 = vpop.permute.xlu1 %974  ;;  %v1022_v39 = vpop.permute.xlu0 %1021 }
 0x20b   : > { %992 = vst.msk [vmem:[#allocation3 + $0x38] sm:$0xff] %vm984_vm14, %v975_v29  ;;  %vm1823_vm14 = vcmask 58368  }
 0x20c   : > { %1040 = vst.msk [vmem:[#allocation3 + $0x30] sm:$0xff] %vm1033_vm15, %v1022_v39  ;;  %1564 = vrot.lane.b32.xlu1 %v1541_v60, %s3638_s14  ;;  %s5490_s14 = smov 8  }
 0x20d   : > { %1880 = vrot.lane.b32.xlu0 %v1864_v57, %s5490_s14  ;;  %1826 = vst.msk [vmem:[#allocation4 + $0x40] sm:$0x3] %vm1823_vm14, %v3614_v0  ;;  %1824 = vst.msk [vmem:[#allocation4 + $0x20] sm:$0x3] %vm1823_vm14, %v3614_v0 }
 0x20e   : > { %v1020_v41 = vpop.permute.xlu1 %1019  ;;  %v1067_v40 = vpop.permute.xlu0 %1066  ;;  %1825 = vst.msk [vmem:[#allocation4 + $0x30] sm:$0x3] %vm1823_vm14, %v3614_v0  ;;  %1827 = vst.msk [vmem:[#allocation4 + $0x50] sm:$0x3] %vm1823_vm14, %v3614_v0 }
 0x20f   : > { %1039 = vst.msk [vmem:[#allocation3 + $0x28] sm:$0xff] %vm1033_vm15, %v1020_v41 }
 0x210   : > { %1087 = vst.msk [vmem:[#allocation3 + $0x20] sm:$0xff] %vm1082_vm0, %v1067_v40  ;;  %1609 = vrot.lane.b32.xlu1 %v4412_v55, %s5465_s9  ;;  %v1914_v55 = vld [vmem:[#allocation4 + $0x12] sm:$0xff] }
 0x211   : > { %1828 = vst.msk [vmem:[#allocation4 + $0x60] sm:$0x3] %vm1823_vm14, %v3614_v0  ;;  %1829 = vst.msk [vmem:[#allocation4 + $0x70] sm:$0x3] %vm1823_vm14, %v3614_v0 }
 0x212   : > { %v1508_v23 = vpop.permute.xlu1 %1507  ;;  %v1555_v34 = vpop.permute.xlu0 %1554  ;;  %1830 = vst.msk [vmem:[#allocation4 + $0x80] sm:$0x3] %vm1823_vm14, %v3614_v0  ;;  %1831 = vst.msk [vmem:[#allocation4 + $0x90] sm:$0x3] %vm1823_vm14, %v3614_v0 }
 0x213   : > { %1529 = vst.msk [vmem:[#allocation3 + $0x18] sm:$0xff] %vm1525_vm9, %v1508_v23 }
 0x214   : > { %1577 = vst.msk [vmem:[#allocation3 + $0x10] sm:$0xff] %vm1574_vm10, %v1555_v34  ;;  %1613 = vrot.lane.b32.xlu1 %v1590_v44, %s5465_s9  ;;  %s5498_s9 = smov 96  }
 0x215   : > { %1832 = vst.msk [vmem:[#allocation4 + $0x2a] sm:$0x3] %vm1823_vm14, %v3614_v0  ;;  %1833 = vst.msk [vmem:[#allocation4 + $0x3a] sm:$0x3] %vm1823_vm14, %v3614_v0 }
 0x216   : > { %v1553_v45 = vpop.permute.xlu1 %1552  ;;  %v1600_v52 = vpop.permute.xlu0 %1599  ;;  %1834 = vst.msk [vmem:[#allocation4 + $0x4a] sm:$0x3] %vm1823_vm14, %v3614_v0  ;;  %1835 = vst.msk [vmem:[#allocation4 + $0x5a] sm:$0x3] %vm1823_vm14, %v3614_v0 }
 0x217   : > { %1576 = vst.msk [vmem:[#allocation3 + $0x8] sm:$0xff] %vm1574_vm10, %v1553_v45 }
 0x218   : > { %1624 = vst.msk [vmem:[#allocation3] sm:$0xff] %vm1623_vm13, %v1600_v52  ;;  %1882 = vrot.lane.b32.xlu1 %v1865_v54, %s5490_s14 }
 0x219   : > { %1836 = vst.msk [vmem:[#allocation4 + $0x6a] sm:$0x3] %vm1823_vm14, %v3614_v0  ;;  %1837 = vst.msk [vmem:[#allocation4 + $0x7a] sm:$0x3] %vm1823_vm14, %v3614_v0 }
 0x21a   : > { %v1024_v56 = vpop.permute.xlu1 %1023  ;;  %v1071_v16 = vpop.permute.xlu0 %1070  ;;  %1838 = vst.msk [vmem:[#allocation4 + $0x8a] sm:$0x3] %vm1823_vm14, %v3614_v0  ;;  %1839 = vst.msk [vmem:[#allocation4 + $0x9a] sm:$0x3] %vm1823_vm14, %v3614_v0  ;;  %vm2592_vm14 = vcmask 1048512  }
 0x21b   : > { %1041 = vst.msk [vmem:[#allocation3 + $0x38] sm:$0xff] %vm1033_vm15, %v1024_v56  ;;  %vm428_vm15 = vcmask 1048128  }
 0x21c   : > { %1089 = vst.msk [vmem:[#allocation3 + $0x30] sm:$0xff] %vm1082_vm0, %v1071_v16  ;;  %1931 = vrot.lane.b32.xlu1 %v1914_v55, %s5491_s13  ;;  %v1962_v16 = vld [vmem:[#allocation4 + $0x3] sm:$0xff] }
 0x21d   : > { %430 = vst.msk [vmem:[#allocation5 + $0x18] sm:$0xff] %vm428_vm15, %v3614_v0  ;;  %429 = vst.msk [vmem:[#allocation5 + $0x8] sm:$0xff] %vm428_vm15, %v3614_v0 }
 0x21e   : > { %v1069_v59 = vpop.permute.xlu1 %1068  ;;  %v1116_v61 = vpop.permute.xlu0 %1115  ;;  %431 = vst.msk [vmem:[#allocation5 + $0x28] sm:$0xff] %vm428_vm15, %v3614_v0  ;;  %432 = vst.msk [vmem:[#allocation5 + $0x38] sm:$0xff] %vm428_vm15, %v3614_v0 }
 0x21f   : > { %1088 = vst.msk [vmem:[#allocation3 + $0x28] sm:$0xff] %vm1082_vm0, %v1069_v59  ;;  %v1632_v4 = vld [vmem:[#allocation3] sm:$0xff] }
 0x220   : > { %1136 = vst.msk [vmem:[#allocation3 + $0x20] sm:$0xff] %vm1131_vm1, %v1116_v61  ;;  %1980 = vrot.lane.b32.xlu1 %v1963_v46, %s5492_s22 }
 0x221   : > { %433 = vst.msk [vmem:[#allocation5 + $0x48] sm:$0xff] %vm428_vm15, %v3614_v0  ;;  %434 = vst.msk [vmem:[#allocation5 + $0x58] sm:$0xff] %vm428_vm15, %v3614_v0 }
 0x222   : > { %v1557_v62 = vpop.permute.xlu1 %1556  ;;  %v1604_v1 = vpop.permute.xlu0 %1603  ;;  %435 = vst.msk [vmem:[#allocation5 + $0x68] sm:$0xff] %vm428_vm15, %v3614_v0  ;;  %436 = vst.msk [vmem:[#allocation5 + $0x78] sm:$0xff] %vm428_vm15, %v3614_v0  ;;  %v1848_v0 = vld [vmem:[#allocation4] sm:$0xff] }
 0x223   : > { %1578 = vst.msk [vmem:[#allocation3 + $0x18] sm:$0xff] %vm1574_vm10, %v1557_v62 }
 0x224   : > { %1626 = vst.msk [vmem:[#allocation3 + $0x10] sm:$0xff] %vm1623_vm13, %v1604_v1  ;;  %2029 = vrot.lane.b32.xlu1 %v2012_v50, %s5493_s29 }
 0x225   : > { %1856 = vst.msk [vmem:[#allocation5] sm:$0xff] %vm1811_vm11, %v1848_v0 }
 0x226   : > { %v1602_v10 = vpop.permute.xlu1 %1601  ;;  %v1120_v2 = vpop.permute.xlu0 %1119 }
 0x227   : > { %1625 = vst.msk [vmem:[#allocation3 + $0x8] sm:$0xff] %vm1623_vm13, %v1602_v10 }
 0x228   : > { %1138 = vst.msk [vmem:[#allocation3 + $0x30] sm:$0xff] %vm1131_vm1, %v1120_v2  ;;  %2077 = vrot.lane.b32.xlu1 %v2061_v43, %s5494_s15 }
 0x22a   : > { %v1073_v47 = vpop.permute.xlu1 %1072  ;;  %v1166_v58 = vpop.permute.xlu0 %1165 }
 0x22b   : > { %1090 = vst.msk [vmem:[#allocation3 + $0x38] sm:$0xff] %vm1082_vm0, %v1073_v47  ;;  %v1634_v13 = vld [vmem:[#allocation3 + $0x10] sm:$0xff]  ;;  %vm1904_vm0 = vcmask 130112  }
 0x22c   : > { %1186 = vst.msk [vmem:[#allocation3 + $0x20] sm:$0xff] %vm1181_vm2, %v1166_v58  ;;  %2126 = vrot.lane.b32.xlu1 %v1865_v54, %s5473_s16  ;;  %v1913_v54 = vld [vmem:[#allocation4 + $0x2] sm:$0xff] }
 0x22d   : > { %1929 = vrot.lane.b32.xlu0 %v1913_v54, %s5491_s13 }
 0x22e   : > { %v1118_v3 = vpop.permute.xlu1 %1117  ;;  %v1170_v5 = vpop.permute.xlu0 %1169  ;;  %v1633_v6 = vld [vmem:[#allocation3 + $0x8] sm:$0xff] }
 0x22f   : > { %1137 = vst.msk [vmem:[#allocation3 + $0x28] sm:$0xff] %vm1131_vm1, %v1118_v3  ;;  %v1640_v48 = vpack.c.bf16 %v1633_v6, %v1632_v4 }
 0x230   : > { %1188 = vst.msk [vmem:[#allocation3 + $0x30] sm:$0xff] %vm1181_vm2, %v1170_v5  ;;  %2175 = vrot.lane.b32.xlu1 %v1914_v55, %s5471_s18  ;;  %v2011_v55 = vld [vmem:[#allocation4 + $0x4] sm:$0xff] }
 0x231   : > { %3451 = vmatprep.mubr.bf16.mxu0 %v1640_v48  ;;  %1978 = vrot.lane.b32.xlu0 %v1962_v16, %s5492_s22 }
 0x232   : > { %v1606_v8 = vpop.permute.xlu1 %1605  ;;  %v1215_v63 = vpop.permute.xlu0 %1214 }
 0x233   : > { %1627 = vst.msk [vmem:[#allocation3 + $0x18] sm:$0xff] %vm1623_vm13, %v1606_v8 }
 0x234   : > { %1235 = vst.msk [vmem:[#allocation3 + $0x20] sm:$0xff] %vm1230_vm3, %v1215_v63  ;;  %2224 = vrot.lane.b32.xlu1 %v1963_v46, %s5469_s21  ;;  %v4641_v63 = vld [vmem:[%s5495_s2] ss:$0 sm:$0xff]  ;;  %s5501_s2 = smov 64  }
 0x235   : > { %2027 = vrot.lane.b32.xlu0 %v2011_v55, %s5493_s29 }
 0x236   : > { %v1122_v9 = vpop.permute.xlu1 %1121  ;;  %v1219_v17 = vpop.permute.xlu0 %1218 }
 0x237   : > { %1139 = vst.msk [vmem:[#allocation3 + $0x38] sm:$0xff] %vm1131_vm1, %v1122_v9  ;;  %vm1953_vm1 = vcmask 195712  }
 0x238   : > { %1237 = vst.msk [vmem:[#allocation3 + $0x30] sm:$0xff] %vm1230_vm3, %v1219_v17  ;;  %2273 = vrot.lane.b32.xlu1 %v2012_v50, %s5467_s8  ;;  %s5497_s8 = smov 72  }
 0x23a   : > { %v1168_v11 = vpop.permute.xlu1 %1167  ;;  %v1264_v12 = vpop.permute.xlu0 %1263  ;;  %v1635_v14 = vld [vmem:[#allocation3 + $0x18] sm:$0xff] }
 0x23b   : > { %1187 = vst.msk [vmem:[#allocation3 + $0x28] sm:$0xff] %vm1181_vm2, %v1168_v11  ;;  %v1641_v18 = vpack.c.bf16 %v1635_v14, %v1634_v13  ;;  %v4647_v11 = vld [vmem:[%s5496_s3] ss:$0 sm:$0xff]  ;;  %s5503_s3 = smov 112  }
 0x23c   : > { %1284 = vst.msk [vmem:[#allocation3 + $0x20] sm:$0xff] %vm1279_vm4, %v1264_v12 }
 0x23d   : > { %3452 = vmatmul.mubr.bf16.vlgmr.msra.gmra.mxu0 %v1641_v18 }
 0x23e   : > { %v1172_v24 = vpop.permute.xlu1 %1171  ;;  %v1268_v26 = vpop.permute.xlu0 %1267 }
 0x23f   : > { %1189 = vst.msk [vmem:[#allocation3 + $0x38] sm:$0xff] %vm1181_vm2, %v1172_v24  ;;  %vm2002_vm2 = vcmask 261312  }
 0x240   : > { %1286 = vst.msk [vmem:[#allocation3 + $0x30] sm:$0xff] %vm1279_vm4, %v1268_v26 }
 0x242   : > { %v1217_v33 = vpop.permute.xlu1 %1216  ;;  %v1313_v19 = vpop.permute.xlu0 %1312 }
 0x243   : > { %1236 = vst.msk [vmem:[#allocation3 + $0x28] sm:$0xff] %vm1230_vm3, %v1217_v33 }
 0x244   : > { %1333 = vst.msk [vmem:[#allocation3 + $0x20] sm:$0xff] %vm1328_vm5, %v1313_v19 }
 0x246   : > { %v1221_v21 = vpop.permute.xlu1 %1220  ;;  %v1317_v22 = vpop.permute.xlu0 %1316 }
 0x247   : > { %1238 = vst.msk [vmem:[#allocation3 + $0x38] sm:$0xff] %vm1230_vm3, %v1221_v21  ;;  %vm2051_vm3 = vcmask 326912  }
 0x248   : > { %1335 = vst.msk [vmem:[#allocation3 + $0x30] sm:$0xff] %vm1328_vm5, %v1317_v22 }
 0x24a   : > { %v1266_v27 = vpop.permute.xlu1 %1265  ;;  %v1362_v53 = vpop.permute.xlu0 %1361 }
 0x24b   : > { %1285 = vst.msk [vmem:[#allocation3 + $0x28] sm:$0xff] %vm1279_vm4, %v1266_v27 }
 0x24c   : > { %1382 = vst.msk [vmem:[#allocation3 + $0x20] sm:$0xff] %vm1377_vm6, %v1362_v53 }
 0x24e   : > { %v1270_v28 = vpop.permute.xlu1 %1269  ;;  %v1366_v30 = vpop.permute.xlu0 %1365 }
 0x24f   : > { %1287 = vst.msk [vmem:[#allocation3 + $0x38] sm:$0xff] %vm1279_vm4, %v1270_v28  ;;  %vm2101_vm4 = vcmask 392512  }
 0x250   : > { %1384 = vst.msk [vmem:[#allocation3 + $0x30] sm:$0xff] %vm1377_vm6, %v1366_v30 }
 0x252   : > { %v1315_v36 = vpop.permute.xlu1 %1314  ;;  %v1412_v31 = vpop.permute.xlu0 %1411 }
 0x253   : > { %1334 = vst.msk [vmem:[#allocation3 + $0x28] sm:$0xff] %vm1328_vm5, %v1315_v36 }
 0x254   : > { %1432 = vst.msk [vmem:[#allocation3 + $0x20] sm:$0xff] %vm1427_vm7, %v1412_v31 }
 0x256   : > { %v1319_v37 = vpop.permute.xlu1 %1318  ;;  %v1416_v51 = vpop.permute.xlu0 %1415 }
 0x257   : > { %1336 = vst.msk [vmem:[#allocation3 + $0x38] sm:$0xff] %vm1328_vm5, %v1319_v37  ;;  %vm2150_vm5 = vcmask 458112  }
 0x258   : > { %1434 = vst.msk [vmem:[#allocation3 + $0x30] sm:$0xff] %vm1427_vm7, %v1416_v51 }
 0x25a   : > { %v1364_v7 = vpop.permute.xlu1 %1363  ;;  %v1461_v42 = vpop.permute.xlu0 %1460 }
 0x25b   : > { %1383 = vst.msk [vmem:[#allocation3 + $0x28] sm:$0xff] %vm1377_vm6, %v1364_v7 }
 0x25c   : > { %1481 = vst.msk [vmem:[#allocation3 + $0x20] sm:$0xff] %vm1476_vm8, %v1461_v42 }
 0x25e   : > { %v1368_v49 = vpop.permute.xlu1 %1367  ;;  %v1465_v32 = vpop.permute.xlu0 %1464 }
 0x25f   : > { %1385 = vst.msk [vmem:[#allocation3 + $0x38] sm:$0xff] %vm1377_vm6, %v1368_v49  ;;  %vm2199_vm6 = vcmask 523712  }
 0x260   : > { %1483 = vst.msk [vmem:[#allocation3 + $0x30] sm:$0xff] %vm1476_vm8, %v1465_v32 }
 0x262   : > { %v1414_v25 = vpop.permute.xlu1 %1413  ;;  %v1510_v15 = vpop.permute.xlu0 %1509 }
 0x263   : > { %1433 = vst.msk [vmem:[#allocation3 + $0x28] sm:$0xff] %vm1427_vm7, %v1414_v25 }
 0x264   : > { %1530 = vst.msk [vmem:[#allocation3 + $0x20] sm:$0xff] %vm1525_vm9, %v1510_v15 }
 0x266   : > { %v1418_v35 = vpop.permute.xlu1 %1417  ;;  %v1514_v38 = vpop.permute.xlu0 %1513 }
 0x267   : > { %1435 = vst.msk [vmem:[#allocation3 + $0x38] sm:$0xff] %vm1427_vm7, %v1418_v35  ;;  %vm2248_vm7 = vcmask 589312  }
 0x268   : > { %1532 = vst.msk [vmem:[#allocation3 + $0x30] sm:$0xff] %vm1525_vm9, %v1514_v38 }
 0x26a   : > { %v1463_v20 = vpop.permute.xlu1 %1462  ;;  %v1559_v60 = vpop.permute.xlu0 %1558 }
 0x26b   : > { %1482 = vst.msk [vmem:[#allocation3 + $0x28] sm:$0xff] %vm1476_vm8, %v1463_v20 }
 0x26c   : > { %1579 = vst.msk [vmem:[#allocation3 + $0x20] sm:$0xff] %vm1574_vm10, %v1559_v60 }
 0x26e   : > { %v1467_v29 = vpop.permute.xlu1 %1466  ;;  %v1563_v39 = vpop.permute.xlu0 %1562 }
 0x26f   : > { %1484 = vst.msk [vmem:[#allocation3 + $0x38] sm:$0xff] %vm1476_vm8, %v1467_v29  ;;  %vm2297_vm8 = vcmask 654912  }
 0x270   : > { %1581 = vst.msk [vmem:[#allocation3 + $0x30] sm:$0xff] %vm1574_vm10, %v1563_v39 }
 0x272   : > { %v1512_v41 = vpop.permute.xlu1 %1511  ;;  %v1608_v40 = vpop.permute.xlu0 %1607 }
 0x273   : > { %1531 = vst.msk [vmem:[#allocation3 + $0x28] sm:$0xff] %vm1525_vm9, %v1512_v41 }
 0x274   : > { %1628 = vst.msk [vmem:[#allocation3 + $0x20] sm:$0xff] %vm1623_vm13, %v1608_v40 }
 0x276   : > { %v1516_v44 = vpop.permute.xlu1 %1515  ;;  %v1612_v23 = vpop.permute.xlu0 %1611 }
 0x277   : > { %1533 = vst.msk [vmem:[#allocation3 + $0x38] sm:$0xff] %vm1525_vm9, %v1516_v44  ;;  %vm2346_vm9 = vcmask 720512  }
 0x278   : > { %1630 = vst.msk [vmem:[#allocation3 + $0x30] sm:$0xff] %vm1623_vm13, %v1612_v23 }
 0x27a   : > { %v1561_v34 = vpop.permute.xlu1 %1560 }
 0x27b   : > { %1580 = vst.msk [vmem:[#allocation3 + $0x28] sm:$0xff] %vm1574_vm10, %v1561_v34  ;;  %v1636_v43 = vld [vmem:[#allocation3 + $0x20] sm:$0xff] }
 0x27e   : > { %v1565_v45 = vpop.permute.xlu1 %1564 }
 0x27f   : > { %1582 = vst.msk [vmem:[#allocation3 + $0x38] sm:$0xff] %vm1574_vm10, %v1565_v45  ;;  %v1638_v61 = vld [vmem:[#allocation3 + $0x30] sm:$0xff]  ;;  %v1881_v58 = vpop.permute.xlu0 %1880  ;;  %vm2395_vm10 = vcmask 786112  }
 0x280   : > { %1905 = vst.msk [vmem:[#allocation5] sm:$0xff] %vm1904_vm0, %v1881_v58 }
 0x282   : > { %v1610_v52 = vpop.permute.xlu1 %1609 }
 0x283   : > { %1629 = vst.msk [vmem:[#allocation3 + $0x28] sm:$0xff] %vm1623_vm13, %v1610_v52 }
 0x286   : > { %v1614_v56 = vpop.permute.xlu1 %1613 }
 0x287   : > { %1631 = vst.msk [vmem:[#allocation3 + $0x38] sm:$0xff] %vm1623_vm13, %v1614_v56  ;;  %vm2542_vm13 = vcmask 982912  }
 0x28a   : > { %v1637_v57 = vld [vmem:[#allocation3 + $0x28] sm:$0xff]  ;;  %v1883_v1 = vpop.permute.xlu1 %1882 }
 0x28b   : > { %v1642_v59 = vpack.c.bf16 %v1637_v57, %v1636_v43  ;;  %1906 = vst.msk [vmem:[#allocation5 + $0x10] sm:$0xff] %vm1904_vm0, %v1883_v1 }
 0x28d   : > { %3455 = vmatprep.mubr.bf16.mxu0 %v1642_v59 }
 0x28e   : > { %v1639_v46 = vld [vmem:[#allocation3 + $0x38] sm:$0xff]  ;;  %v1932_v50 = vpop.permute.xlu1 %1931 }
 0x28f   : > { %v1643_v62 = vpack.c.bf16 %v1639_v46, %v1638_v61  ;;  %1955 = vst.msk [vmem:[#allocation5 + $0x10] sm:$0xff] %vm1953_vm1, %v1932_v50 }
 0x291   : > { %3456 = vmatmul.mubr.bf16.gmra.mxu0 %v1643_v62 }
 0x292   : > { %v1981_v10 = vpop.permute.xlu1 %1980 }
 0x293   : > { %2004 = vst.msk [vmem:[#allocation5 + $0x10] sm:$0xff] %vm2002_vm2, %v1981_v10 }
 0x296   : > { %v2030_v2 = vpop.permute.xlu1 %2029 }
 0x297   : > { %2053 = vst.msk [vmem:[#allocation5 + $0x10] sm:$0xff] %vm2051_vm3, %v2030_v2 }
 0x29a   : > { %v2078_v47 = vpop.permute.xlu1 %2077 }
 0x29e   : > { %v2127_v3 = vpop.permute.xlu1 %2126 }
 0x29f   : > { %v1930_v5 = vpop.permute.xlu0 %1929 }
 0x2a0   : > { %1954 = vst.msk [vmem:[#allocation5] sm:$0xff] %vm1953_vm1, %v1930_v5 }
 0x2a2   : > { %v2176_v4 = vpop.permute.xlu1 %2175 }
 0x2a3   : > { %v1979_v6 = vpop.permute.xlu0 %1978 }
 0x2a4   : > { %2003 = vst.msk [vmem:[#allocation5] sm:$0xff] %vm2002_vm2, %v1979_v6 }
 0x2a6   : > { %v2225_v48 = vpop.permute.xlu1 %2224 }
 0x2a7   : > { %v2028_v9 = vpop.permute.xlu0 %2027 }
 0x2a8   : > { %2052 = vst.msk [vmem:[#allocation5] sm:$0xff] %vm2051_vm3, %v2028_v9 }
 0x2a9   : > { %2102 = vst.msk [vmem:[#allocation5] sm:$0xff] %vm2101_vm4, %v2078_v47 }
 0x2aa   : > { %2151 = vst.msk [vmem:[#allocation5] sm:$0xff] %vm2150_vm5, %v2127_v3  ;;  %v2274_v19 = vpop.permute.xlu1 %2273 }
 0x2ab   : > { %2200 = vst.msk [vmem:[#allocation5] sm:$0xff] %vm2199_vm6, %v2176_v4 }
 0x2ac   : > { %2249 = vst.msk [vmem:[#allocation5] sm:$0xff] %vm2248_vm7, %v2225_v48 }
 0x2ad   : > { %2298 = vst.msk [vmem:[#allocation5] sm:$0xff] %vm2297_vm8, %v2274_v19  ;;  %v3539_v19 = vld [vmem:[%s5445_s4 + $0x30] sm:$0xff]  }
 0x2fd   : > { %v3453_v8 = vpop.f32.mrf.mxu0 }
 0x2fe   : > { %v1775_v17 = vmax.f32 %v3453_v8, 0.0 }
 0x2ff   : > { %v1742_v12 = vpop.f32.mrf.mxu0 }
 0x300   : > { %v1790_v13 = vmul.f32 %v4641_v63, %v1775_v17  ;;  %v1773_v14 = vmax.f32 %v1742_v12, 0.0 }
 0x301   : > { %v3454_v18 = vpop.f32.mrf.mxu0 }
 0x302   : > { %v1805_v24 = vadd.f32 %v4647_v11, %v1790_v13  ;;  %v1788_v26 = vmul.f32 %v4641_v63, %v1773_v14  ;;  %v1776_v33 = vmax.f32 %v3454_v18, 0.0  ;;  %v3536_v14 = vld [vmem:[%s5445_s4 + $0x78] sm:$0xff]  }
 0x303   : > { %v1745_v21 = vpop.f32.mrf.mxu0  ;;  %v3537_v18 = vld [vmem:[%s5445_s4 + $0x38] sm:$0xff]   ;;  %3395 = vmatprep.subr.bf16.mxu1 %v3536_v14 }
 0x304   : > { %1842 = vst.msk [vmem:[#allocation4 + $0x42] sm:$0xff] %vm1811_vm11, %v1805_v24  ;;  %v1803_v22 = vadd.f32 %v4647_v11, %v1788_v26  ;;  %v1791_v27 = vmul.f32 %v4641_v63, %v1776_v33  ;;  %v1774_v53 = vmax.f32 %v1745_v21, 0.0  ;;  %3396 = vmatpush3.bf16.msra.mxu1 %v3537_v18  ;;  %v3538_v33 = vld [vmem:[%s5445_s4 + $0x70] sm:$0xff]  }
 0x305   : > { %3397 = vmatprep.subr.bf16.mxu1 %v3538_v33 }
 0x306   : > { %1840 = vst.msk [vmem:[#allocation4 + $0x22] sm:$0xff] %vm1811_vm11, %v1803_v22  ;;  %v1806_v28 = vadd.f32 %v4647_v11, %v1791_v27  ;;  %v1789_v30 = vmul.f32 %v4641_v63, %v1774_v53  ;;  %v3540_v27 = vld [vmem:[%s5445_s4 + $0x68] sm:$0xff]  }
 0x307   : > { %v3541_v53 = vld [vmem:[%s5445_s4 + $0x28] sm:$0xff]  }
 0x308   : > { %1843 = vst.msk [vmem:[#allocation4 + $0x52] sm:$0xff] %vm1811_vm11, %v1806_v28  ;;  %v1804_v36 = vadd.f32 %v4647_v11, %v1789_v30  ;;  %3398 = vmatpush3.bf16.msra.mxu1 %v3539_v19 }
 0x309   : > { %3399 = vmatprep.subr.bf16.mxu1 %v3540_v27 }
 0x30a   : > { %1841 = vst.msk [vmem:[#allocation4 + $0x32] sm:$0xff] %vm1811_vm11, %v1804_v36  ;;  %v3542_v36 = vld [vmem:[%s5445_s4 + $0x60] sm:$0xff]  }
 0x30b   : > { %v4666_v31 = vld [vmem:[#allocation4 + $0x41] sm:$0xff] }
 0x30c   : > { %1888 = vrot.lane.b32.xlu0 %v4666_v31, %s5490_s14  ;;  %v4670_v37 = vld [vmem:[#allocation4 + $0x40] sm:$0xff]  ;;  %2610 = vst.msk [vmem:[#allocation5 + $0x18] sm:$0xff] %vm1811_vm11, %v4666_v31  ;;  %3400 = vmatpush3.bf16.msra.mxu1 %v3541_v53 }
 0x30d   : > { %1860 = vst.msk [vmem:[#allocation5 + $0x40] sm:$0xff] %vm1811_vm11, %v4670_v37  ;;  %v4676_v51 = vld [vmem:[#allocation4 + $0x20] sm:$0xff]  ;;  %3401 = vmatprep.subr.bf16.mxu1 %v3542_v36 }
 0x30e   : > { %v4678_v7 = vld [vmem:[#allocation4 + $0x42] sm:$0xff]  ;;  %1858 = vst.msk [vmem:[#allocation5 + $0x20] sm:$0xff] %vm1811_vm11, %v4676_v51 }
 0x30f   : > { %v4680_v42 = vld [vmem:[#allocation4 + $0x51] sm:$0xff]  ;;  %v4700_v15 = vld [vmem:[#allocation4 + $0x43] sm:$0xff] }
 0x310   : > { %1937 = vrot.lane.b32.xlu0 %v4678_v7, %s5491_s13  ;;  %1890 = vrot.lane.b32.xlu1 %v4680_v42, %s5490_s14  ;;  %v4688_v49 = vld [vmem:[#allocation4 + $0x50] sm:$0xff]  ;;  %2611 = vst.msk [vmem:[#allocation5 + $0x28] sm:$0xff] %vm1811_vm11, %v4680_v42  ;;  %v4710_v38 = vld [vmem:[#allocation4 + $0x44] sm:$0xff] }
 0x311   : > { %v4692_v32 = vld [vmem:[#allocation4 + $0x31] sm:$0xff]  ;;  %1861 = vst.msk [vmem:[#allocation5 + $0x50] sm:$0xff] %vm1811_vm11, %v4688_v49  ;;  %v4728_v29 = vld [vmem:[#allocation4 + $0x21] sm:$0xff] }
 0x312   : > { %v4696_v25 = vld [vmem:[#allocation4 + $0x30] sm:$0xff]  ;;  %2609 = vst.msk [vmem:[#allocation5 + $0x8] sm:$0xff] %vm1811_vm11, %v4692_v32  ;;  %v4736_v41 = vld [vmem:[#allocation4 + $0x22] sm:$0xff] }
 0x313   : > { %v4702_v35 = vld [vmem:[#allocation4 + $0x52] sm:$0xff]  ;;  %1859 = vst.msk [vmem:[#allocation5 + $0x30] sm:$0xff] %vm1811_vm11, %v4696_v25  ;;  %v4744_v44 = vld [vmem:[#allocation4 + $0x23] sm:$0xff] }
 0x314   : > { %1986 = vrot.lane.b32.xlu0 %v4700_v15, %s5492_s22  ;;  %1939 = vrot.lane.b32.xlu1 %v4702_v35, %s5491_s13  ;;  %v4712_v20 = vld [vmem:[#allocation4 + $0x53] sm:$0xff]  ;;  %v4750_v23 = vld [vmem:[#allocation4 + $0x24] sm:$0xff] }
 0x315   : > { %v4722_v60 = vld [vmem:[#allocation4 + $0x32] sm:$0xff] }
 0x316   : > { %v4730_v39 = vld [vmem:[#allocation4 + $0x33] sm:$0xff] }
 0x317   : > { %v4738_v40 = vld [vmem:[#allocation4 + $0x34] sm:$0xff] }
 0x318   : > { %2035 = vrot.lane.b32.xlu0 %v4710_v38, %s5493_s29  ;;  %1988 = vrot.lane.b32.xlu1 %v4712_v20, %s5492_s22 }
 0x31c   : > { %2635 = vrot.lane.b32.xlu0 %v4678_v7, %s5490_s14  ;;  %1886 = vrot.lane.b32.xlu1 %v4692_v32, %s5490_s14 }
 0x320   : > { %2683 = vrot.lane.b32.xlu0 %v4700_v15, %s5491_s13  ;;  %1935 = vrot.lane.b32.xlu1 %v4722_v60, %s5491_s13 }
 0x324   : > { %1884 = vrot.lane.b32.xlu0 %v4728_v29, %s5490_s14  ;;  %1984 = vrot.lane.b32.xlu1 %v4730_v39, %s5492_s22 }
 0x328   : > { %1933 = vrot.lane.b32.xlu0 %v4736_v41, %s5491_s13  ;;  %2033 = vrot.lane.b32.xlu1 %v4738_v40, %s5493_s29 }
 0x32c   : > { %1982 = vrot.lane.b32.xlu0 %v4744_v44, %s5492_s22  ;;  %2633 = vrot.lane.b32.xlu1 %v4722_v60, %s5490_s14 }
 0x330   : > { %2031 = vrot.lane.b32.xlu0 %v4750_v23, %s5493_s29  ;;  %2681 = vrot.lane.b32.xlu1 %v4730_v39, %s5491_s13 }
 0x334   : > { %2079 = vrot.lane.b32.xlu0 %v4676_v51, %s5494_s15  ;;  %2729 = vrot.lane.b32.xlu1 %v4738_v40, %s5492_s22 }
 0x338   : > { %2128 = vrot.lane.b32.xlu0 %v4728_v29, %s5473_s16 }
 0x33c   : > { %2177 = vrot.lane.b32.xlu0 %v4736_v41, %s5471_s18  ;;  %s3642_s18 = smov 120  }
 0x340   : > { %2226 = vrot.lane.b32.xlu0 %v4744_v44, %s5469_s21 }
 0x351   : > { %v3457_v34 = vpop.f32.mrf.mxu0 }
 0x352   : > { %v1779_v45 = vmax.f32 %v3457_v34, 0.0  ;;  %v3545_v34 = vld [vmem:[%s5445_s4 + $0x18] sm:$0xff]  }
 0x353   : > { %v1758_v52 = vpop.f32.mrf.mxu0 }
 0x354   : > { %v1794_v54 = vmul.f32 %v4641_v63, %v1779_v45  ;;  %v1777_v56 = vmax.f32 %v1758_v52, 0.0  ;;  %v3546_v52 = vld [vmem:[%s5445_s4 + $0x50] sm:$0xff]  }
 0x355   : > { %v3458_v16 = vpop.f32.mrf.mxu0 }
 0x356   : > { %v1809_v43 = vadd.f32 %v4647_v11, %v1794_v54  ;;  %v1792_v57 = vmul.f32 %v4641_v63, %v1777_v56  ;;  %v1780_v55 = vmax.f32 %v3458_v16, 0.0  ;;  %v3547_v54 = vld [vmem:[%s5445_s4 + $0x10] sm:$0xff]   ;;  %v3548_v16 = vld [vmem:[%s5445_s4 + $0x48] sm:$0xff]  }
 0x357   : > { %v1761_v59 = vpop.f32.mrf.mxu0 }
 0x358   : > { %1846 = vst.msk [vmem:[#allocation4 + $0x82] sm:$0xff] %vm1811_vm11, %v1809_v43  ;;  %v1807_v61 = vadd.f32 %v4647_v11, %v1792_v57  ;;  %v1795_v46 = vmul.f32 %v4641_v63, %v1780_v55  ;;  %v1778_v62 = vmax.f32 %v1761_v59, 0.0  ;;  %v3549_v43 = vld [vmem:[%s5445_s4 + $0x8] sm:$0xff]   ;;  %v4930_v57 = vld [vmem:[#allocation4 + $0x54] sm:$0xff] }
 0x35a   : > { %1844 = vst.msk [vmem:[#allocation4 + $0x62] sm:$0xff] %vm1811_vm11, %v1807_v61  ;;  %v1810_v1 = vadd.f32 %v4647_v11, %v1795_v46  ;;  %v1793_v50 = vmul.f32 %v4641_v63, %v1778_v62  ;;  %v3550_v61 = vld [vmem:[%s5445_s4 + $0x40] sm:$0xff]  }
 0x35b   : > { %v3551_v46 = vld [vmem:[%s5445_s4] sm:$0xff]  }
 0x35c   : > { %1847 = vst.msk [vmem:[#allocation4 + $0x92] sm:$0xff] %vm1811_vm11, %v1810_v1  ;;  %v1808_v10 = vadd.f32 %v4647_v11, %v1793_v50 }
 0x35e   : > { %1845 = vst.msk [vmem:[#allocation4 + $0x72] sm:$0xff] %vm1811_vm11, %v1808_v10 }
 0x35f   : > { %v4778_v2 = vld [vmem:[#allocation4 + $0x81] sm:$0xff] }
 0x360   : > { %2614 = vst.msk [vmem:[#allocation5 + $0x58] sm:$0xff] %vm1811_vm11, %v4778_v2 }
 0x361   : > { %v4780_v47 = vld [vmem:[#allocation4 + $0x61] sm:$0xff] }
 0x362   : > { %1892 = vrot.lane.b32.xlu0 %v4780_v47, %s5490_s14  ;;  %v4786_v0 = vld [vmem:[#allocation4 + $0x60] sm:$0xff]  ;;  %2612 = vst.msk [vmem:[#allocation5 + $0x38] sm:$0xff] %vm1811_vm11, %v4780_v47 }
 0x363   : > { %1862 = vst.msk [vmem:[#allocation5 + $0x60] sm:$0xff] %vm1811_vm11, %v4786_v0  ;;  %v4792_v58 = vld [vmem:[#allocation4 + $0x91] sm:$0xff]  ;;  %v4796_v3 = vld [vmem:[#allocation4 + $0x62] sm:$0xff] }
 0x364   : > { %2615 = vst.msk [vmem:[#allocation5 + $0x68] sm:$0xff] %vm1811_vm11, %v4792_v58  ;;  %v4809_v48 = vld [vmem:[#allocation4 + $0x63] sm:$0xff] }
 0x365   : > { %v4798_v5 = vld [vmem:[#allocation4 + $0x71] sm:$0xff] }
 0x366   : > { %1941 = vrot.lane.b32.xlu0 %v4796_v3, %s5491_s13  ;;  %1894 = vrot.lane.b32.xlu1 %v4798_v5, %s5490_s14  ;;  %v4804_v4 = vld [vmem:[#allocation4 + $0x70] sm:$0xff] }
 0x367   : > { %1863 = vst.msk [vmem:[#allocation5 + $0x70] sm:$0xff] %vm1811_vm11, %v4804_v4  ;;  %v2605_v6 = vld [vmem:[#allocation4 + $0x71] sm:$0xff] }
 0x368   : > { %2613 = vst.msk [vmem:[#allocation5 + $0x48] sm:$0xff] %vm1811_vm11, %v2605_v6  ;;  %v4811_v8 = vld [vmem:[#allocation4 + $0x72] sm:$0xff] }
 0x369   : > { %v4817_v63 = vld [vmem:[#allocation4 + $0x73] sm:$0xff] }
 0x36a   : > { %1990 = vrot.lane.b32.xlu0 %v4809_v48, %s5492_s22  ;;  %1943 = vrot.lane.b32.xlu1 %v4811_v8, %s5491_s13  ;;  %v5040_v18 = vld [vmem:[#allocation4 + $0x74] sm:$0xff] }
 0x36e   : > { %2275 = vrot.lane.b32.xlu0 %v4750_v23, %s5497_s8  ;;  %1992 = vrot.lane.b32.xlu1 %v4817_v63, %s5492_s22 }
 0x372   : > { %2731 = vrot.lane.b32.xlu0 %v4710_v38, %s5492_s22  ;;  %2322 = vrot.lane.b32.xlu1 %v4676_v51, %s5487_s17  ;;  %v3543_v51 = vld [vmem:[%s5445_s4 + $0x20] sm:$0xff]  }
 0x373   : > { %3402 = vmatpush3.bf16.msra.mxu1 %v3543_v51 }
 0x376   : > { %2324 = vrot.lane.b32.xlu0 %v4696_v25, %s5487_s17  ;;  %2778 = vrot.lane.b32.xlu1 %v4670_v37, %s5493_s29 }
 0x37a   : > { %2780 = vrot.lane.b32.xlu0 %v4688_v49, %s5493_s29  ;;  %2371 = vrot.lane.b32.xlu1 %v4728_v29, %s5489_s23 }
 0x37e   : > { %2373 = vrot.lane.b32.xlu0 %v4692_v32, %s5489_s23  ;;  %2826 = vrot.lane.b32.xlu1 %v4666_v31, %s5494_s15  ;;  %v1889_v9 = vpop.permute.xlu0 %1888 }
 0x37f   : > { %1909 = vst.msk [vmem:[#allocation5 + $0x40] sm:$0xff] %vm1904_vm0, %v1889_v9 }
 0x382   : > { %v1891_v17 = vpop.permute.xlu1 %1890  ;;  %2828 = vrot.lane.b32.xlu0 %v4680_v42, %s5494_s15  ;;  %2420 = vrot.lane.b32.xlu1 %v4736_v41, %s5498_s9  ;;  %v1938_v11 = vpop.permute.xlu0 %1937 }
 0x383   : > { %1910 = vst.msk [vmem:[#allocation5 + $0x50] sm:$0xff] %vm1904_vm0, %v1891_v17 }
 0x384   : > { %1958 = vst.msk [vmem:[#allocation5 + $0x40] sm:$0xff] %vm1953_vm1, %v1938_v11 }
 0x386   : > { %v1940_v12 = vpop.permute.xlu1 %1939  ;;  %2422 = vrot.lane.b32.xlu0 %v4722_v60, %s5498_s9  ;;  %2874 = vrot.lane.b32.xlu1 %v4678_v7, %s5473_s16  ;;  %v1987_v13 = vpop.permute.xlu0 %1986 }
 0x387   : > { %1959 = vst.msk [vmem:[#allocation5 + $0x50] sm:$0xff] %vm1953_vm1, %v1940_v12 }
 0x388   : > { %2007 = vst.msk [vmem:[#allocation5 + $0x40] sm:$0xff] %vm2002_vm2, %v1987_v13  ;;  %v5034_v13 = vld [vmem:[#allocation4 + $0xa1] sm:$0xff] }
 0x389   : > { %2616 = vst.msk [vmem:[#allocation5 + $0x78] sm:$0xff] %vm1811_vm11, %v5034_v13  ;;  %vm2444_vm11 = vcmask 851712  }
 0x38a   : > { %v1989_v24 = vpop.permute.xlu1 %1988  ;;  %2876 = vrot.lane.b32.xlu0 %v4702_v35, %s5473_s16  ;;  %2081 = vrot.lane.b32.xlu1 %v4696_v25, %s5494_s15  ;;  %v2036_v26 = vpop.permute.xlu0 %2035  ;;  %s5475_s16 = smov 104  }
 0x38b   : > { %2008 = vst.msk [vmem:[#allocation5 + $0x50] sm:$0xff] %vm2002_vm2, %v1989_v24 }
 0x38c   : > { %2056 = vst.msk [vmem:[#allocation5 + $0x40] sm:$0xff] %vm2051_vm3, %v2036_v26 }
 0x38e   : > { %v1887_v21 = vpop.permute.xlu1 %1886  ;;  %2083 = vrot.lane.b32.xlu0 %v4670_v37, %s5494_s15  ;;  %2469 = vrot.lane.b32.xlu1 %v4744_v44, %s5475_s16  ;;  %v2636_v22 = vpop.permute.xlu0 %2635  ;;  %v3544_v44 = vld [vmem:[%s5445_s4 + $0x58] sm:$0xff]  }
 0x38f   : > { %1908 = vst.msk [vmem:[#allocation5 + $0x30] sm:$0xff] %vm1904_vm0, %v1887_v21  ;;  %2658 = vst.msk [vmem:[#allocation5 + $0x18] sm:$0xff] %vm1904_vm0, %v2636_v22  ;;  %3403 = vmatprep.subr.bf16.mxu1 %v3544_v44 }
 0x390   : > { %3404 = vmatpush3.bf16.msra.mxu1 %v3545_v34 }
 0x391   : > { %3405 = vmatprep.subr.bf16.mxu1 %v3546_v52  ;;  %v5104_v52 = vld [vmem:[#allocation4 + $0x80] sm:$0xff] }
 0x392   : > { %v1936_v28 = vpop.permute.xlu1 %1935  ;;  %2471 = vrot.lane.b32.xlu0 %v4730_v39, %s5475_s16  ;;  %2922 = vrot.lane.b32.xlu1 %v4700_v15, %s5499_s0  ;;  %v2684_v30 = vpop.permute.xlu0 %2683  ;;  %s5500_s16 = smov 48  }
 0x393   : > { %1957 = vst.msk [vmem:[#allocation5 + $0x30] sm:$0xff] %vm1953_vm1, %v1936_v28  ;;  %2706 = vst.msk [vmem:[#allocation5 + $0x18] sm:$0xff] %vm1953_vm1, %v2684_v30  ;;  %v5074_v28 = vld [vmem:[#allocation4 + $0x83] sm:$0xff] }
 0x394   : > { %3406 = vmatpush3.bf16.msra.mxu1 %v3547_v54 }
 0x395   : > { %3407 = vmatprep.subr.bf16.mxu1 %v3548_v16 }
 0x396   : > { %v1985_v29 = vpop.permute.xlu1 %1984  ;;  %2924 = vrot.lane.b32.xlu0 %v4712_v20, %s5499_s0  ;;  %2130 = vrot.lane.b32.xlu1 %v4692_v32, %s5500_s16  ;;  %v1885_v41 = vpop.permute.xlu0 %1884 }
 0x397   : > { %2006 = vst.msk [vmem:[#allocation5 + $0x30] sm:$0xff] %vm2002_vm2, %v1985_v29  ;;  %v5088_v29 = vld [vmem:[#allocation4 + $0x84] sm:$0xff] }
 0x398   : > { %1907 = vst.msk [vmem:[#allocation5 + $0x20] sm:$0xff] %vm1904_vm0, %v1885_v41  ;;  %3408 = vmatpush3.bf16.msra.mxu1 %v3549_v43 }
 0x399   : > { %3409 = vmatprep.subr.bf16.mxu1 %v3550_v61 }
 0x39a   : > { %v2034_v45 = vpop.permute.xlu1 %2033  ;;  %2132 = vrot.lane.b32.xlu0 %v4666_v31, %s5500_s16  ;;  %2518 = vrot.lane.b32.xlu1 %v4750_v23, %s5477_s1  ;;  %v1934_v32 = vpop.permute.xlu0 %1933 }
 0x39b   : > { %2055 = vst.msk [vmem:[#allocation5 + $0x30] sm:$0xff] %vm2051_vm3, %v2034_v45 }
 0x39c   : > { %1956 = vst.msk [vmem:[#allocation5 + $0x20] sm:$0xff] %vm1953_vm1, %v1934_v32  ;;  %3410 = vmatpush3.bf16.msra.mxu1 %v3551_v46  ;;  %v5102_v32 = vld [vmem:[#allocation4 + $0x90] sm:$0xff] }
 0x39e   : > { %v2634_v56 = vpop.permute.xlu1 %2633  ;;  %2520 = vrot.lane.b32.xlu0 %v4738_v40, %s5477_s1  ;;  %2970 = vrot.lane.b32.xlu1 %v4710_v38, %s5501_s2  ;;  %v1983_v23 = vpop.permute.xlu0 %1982  ;;  %s5502_s1 = smov 104  }
 0x39f   : > { %2657 = vst.msk [vmem:[#allocation5 + $0x8] sm:$0xff] %vm1904_vm0, %v2634_v56 }
 0x3a0   : > { %2005 = vst.msk [vmem:[#allocation5 + $0x20] sm:$0xff] %vm2002_vm2, %v1983_v23 }
 0x3a2   : > { %v2682_v55 = vpop.permute.xlu1 %2681  ;;  %2972 = vrot.lane.b32.xlu0 %v4930_v57, %s5501_s2  ;;  %2179 = vrot.lane.b32.xlu1 %v4722_v60, %s5499_s0  ;;  %v2032_v59 = vpop.permute.xlu0 %2031 }
 0x3a3   : > { %2705 = vst.msk [vmem:[#allocation5 + $0x8] sm:$0xff] %vm1953_vm1, %v2682_v55 }
 0x3a4   : > { %2054 = vst.msk [vmem:[#allocation5 + $0x20] sm:$0xff] %vm2051_vm3, %v2032_v59 }
 0x3a6   : > { %v2730_v62 = vpop.permute.xlu1 %2729  ;;  %2181 = vrot.lane.b32.xlu0 %v4678_v7, %s5499_s0  ;;  %2568 = vrot.lane.b32.xlu1 %v4696_v25, %s3642_s18  ;;  %v2080_v60 = vpop.permute.xlu0 %2079 }
 0x3a7   : > { %2753 = vst.msk [vmem:[#allocation5 + $0x8] sm:$0xff] %vm2002_vm2, %v2730_v62 }
 0x3a8   : > { %2103 = vst.msk [vmem:[#allocation5 + $0x10] sm:$0xff] %vm2101_vm4, %v2080_v60 }
 0x3aa   : > { %2570 = vrot.lane.b32.xlu0 %v4670_v37, %s3642_s18  ;;  %2637 = vrot.lane.b32.xlu1 %v4702_v35, %s5490_s14  ;;  %v2129_v1 = vpop.permute.xlu0 %2128 }
 0x3ab   : > { %2152 = vst.msk [vmem:[#allocation5 + $0x10] sm:$0xff] %vm2150_vm5, %v2129_v1 }
 0x3ae   : > { %2639 = vrot.lane.b32.xlu0 %v4796_v3, %s5490_s14  ;;  %2228 = vrot.lane.b32.xlu1 %v4730_v39, %s5501_s2  ;;  %v2178_v25 = vpop.permute.xlu0 %2177  ;;  %v4973_v39 = vld [vmem:[#allocation4 + $0x64] sm:$0xff] }
 0x3af   : > { %2201 = vst.msk [vmem:[#allocation5 + $0x10] sm:$0xff] %vm2199_vm6, %v2178_v25  ;;  %v5136_v25 = vld [vmem:[#allocation4 + $0x92] sm:$0xff] }
 0x3b2   : > { %2230 = vrot.lane.b32.xlu0 %v4700_v15, %s5501_s2  ;;  %2685 = vrot.lane.b32.xlu1 %v4712_v20, %s5491_s13  ;;  %v2227_v50 = vpop.permute.xlu0 %2226 }
 0x3b3   : > { %2250 = vst.msk [vmem:[#allocation5 + $0x10] sm:$0xff] %vm2248_vm7, %v2227_v50 }
 0x3b6   : > { %2687 = vrot.lane.b32.xlu0 %v4809_v48, %s5491_s13  ;;  %2277 = vrot.lane.b32.xlu1 %v4738_v40, %s5497_s8 }
 0x3ba   : > { %2279 = vrot.lane.b32.xlu0 %v4710_v38, %s5497_s8  ;;  %2733 = vrot.lane.b32.xlu1 %v4930_v57, %s5492_s22 }
 0x3be   : > { %2735 = vrot.lane.b32.xlu0 %v4973_v39, %s5492_s22  ;;  %2326 = vrot.lane.b32.xlu1 %v4670_v37, %s5487_s17 }
 0x3c2   : > { %2328 = vrot.lane.b32.xlu0 %v4688_v49, %s5487_s17  ;;  %2782 = vrot.lane.b32.xlu1 %v4786_v0, %s5493_s29 }
 0x3c6   : > { %2784 = vrot.lane.b32.xlu0 %v4804_v4, %s5493_s29  ;;  %2375 = vrot.lane.b32.xlu1 %v4666_v31, %s5489_s23 }
 0x3ca   : > { %2377 = vrot.lane.b32.xlu0 %v4680_v42, %s5489_s23  ;;  %2830 = vrot.lane.b32.xlu1 %v4780_v47, %s5494_s15 }
 0x3ce   : > { %2832 = vrot.lane.b32.xlu0 %v4798_v5, %s5494_s15  ;;  %2037 = vrot.lane.b32.xlu1 %v4930_v57, %s5493_s29 }
 0x3d2   : > { %2424 = vrot.lane.b32.xlu0 %v4678_v7, %s5498_s9  ;;  %2426 = vrot.lane.b32.xlu1 %v4702_v35, %s5498_s9 }
 0x3d4   : > { %v1893_v37 = vpop.permute.xlu0 %1892 }
 0x3d5   : > { %1911 = vst.msk [vmem:[#allocation5 + $0x60] sm:$0xff] %vm1904_vm0, %v1893_v37 }
 0x3d6   : > { %2878 = vrot.lane.b32.xlu0 %v4796_v3, %s5500_s16  ;;  %2880 = vrot.lane.b32.xlu1 %v4811_v8, %s5500_s16 }
 0x3d8   : > { %v1895_v31 = vpop.permute.xlu1 %1894  ;;  %v1942_v40 = vpop.permute.xlu0 %1941 }
 0x3d9   : > { %1912 = vst.msk [vmem:[#allocation5 + $0x70] sm:$0xff] %vm1904_vm0, %v1895_v31 }
 0x3da   : > { %1960 = vst.msk [vmem:[#allocation5 + $0x60] sm:$0xff] %vm1953_vm1, %v1942_v40  ;;  %2085 = vrot.lane.b32.xlu0 %v4688_v49, %s5494_s15  ;;  %2087 = vrot.lane.b32.xlu1 %v4786_v0, %s5494_s15 }
 0x3dc   : > { %v1944_v7 = vpop.permute.xlu1 %1943  ;;  %v1991_v10 = vpop.permute.xlu0 %1990 }
 0x3dd   : > { %1961 = vst.msk [vmem:[#allocation5 + $0x70] sm:$0xff] %vm1953_vm1, %v1944_v7 }
 0x3de   : > { %2009 = vst.msk [vmem:[#allocation5 + $0x60] sm:$0xff] %vm2002_vm2, %v1991_v10  ;;  %2475 = vrot.lane.b32.xlu1 %v4712_v20, %s5502_s1  ;;  %2473 = vrot.lane.b32.xlu0 %v4700_v15, %s5502_s1 }
 0x3e0   : > { %v1993_v6 = vpop.permute.xlu1 %1992  ;;  %v2276_v9 = vpop.permute.xlu0 %2275 }
 0x3e1   : > { %2010 = vst.msk [vmem:[#allocation5 + $0x70] sm:$0xff] %vm2002_vm2, %v1993_v6  ;;  %v5156_v6 = vld [vmem:[#allocation4 + $0x93] sm:$0xff] }
 0x3e2   : > { %2299 = vst.msk [vmem:[#allocation5 + $0x10] sm:$0xff] %vm2297_vm8, %v2276_v9  ;;  %2928 = vrot.lane.b32.xlu1 %v4817_v63, %s5499_s0  ;;  %2926 = vrot.lane.b32.xlu0 %v4809_v48, %s5499_s0 }
 0x3e4   : > { %v2323_v17 = vpop.permute.xlu1 %2322  ;;  %v2732_v11 = vpop.permute.xlu0 %2731 }
 0x3e5   : > { %2347 = vst.msk [vmem:[#allocation5] sm:$0xff] %vm2346_vm9, %v2323_v17 }
 0x3e6   : > { %2754 = vst.msk [vmem:[#allocation5 + $0x18] sm:$0xff] %vm2002_vm2, %v2732_v11  ;;  %2136 = vrot.lane.b32.xlu1 %v4780_v47, %s5500_s16  ;;  %2134 = vrot.lane.b32.xlu0 %v4680_v42, %s5500_s16 }
 0x3e8   : > { %v2779_v15 = vpop.permute.xlu1 %2778  ;;  %v2325_v12 = vpop.permute.xlu0 %2324 }
 0x3e9   : > { %2802 = vst.msk [vmem:[#allocation5 + $0x8] sm:$0xff] %vm2051_vm3, %v2779_v15 }
 0x3ea   : > { %2348 = vst.msk [vmem:[#allocation5 + $0x10] sm:$0xff] %vm2346_vm9, %v2325_v12  ;;  %2524 = vrot.lane.b32.xlu1 %v4930_v57, %s5503_s3  ;;  %2522 = vrot.lane.b32.xlu0 %v4710_v38, %s5503_s3  ;;  %v5176_v12 = vld [vmem:[#allocation4 + $0x94] sm:$0xff] }
 0x3ec   : > { %v2372_v14 = vpop.permute.xlu1 %2371  ;;  %v2781_v42 = vpop.permute.xlu0 %2780 }
 0x3ed   : > { %2396 = vst.msk [vmem:[#allocation5] sm:$0xff] %vm2395_vm10, %v2372_v14 }
 0x3ee   : > { %2803 = vst.msk [vmem:[#allocation5 + $0x18] sm:$0xff] %vm2051_vm3, %v2781_v42  ;;  %2976 = vrot.lane.b32.xlu1 %v5040_v18, %s5501_s2  ;;  %2974 = vrot.lane.b32.xlu0 %v4973_v39, %s5501_s2 }
 0x3f0   : > { %v2827_v38 = vpop.permute.xlu1 %2826  ;;  %v2374_v24 = vpop.permute.xlu0 %2373 }
 0x3f1   : > { %2850 = vst.msk [vmem:[#allocation5 + $0x8] sm:$0xff] %vm2101_vm4, %v2827_v38  ;;  %v5194_v38 = vld [vmem:[#allocation4 + $0xa2] sm:$0xff] }
 0x3f2   : > { %2397 = vst.msk [vmem:[#allocation5 + $0x10] sm:$0xff] %vm2395_vm10, %v2374_v24  ;;  %2185 = vrot.lane.b32.xlu1 %v4796_v3, %s5499_s0  ;;  %2183 = vrot.lane.b32.xlu0 %v4702_v35, %s5499_s0  ;;  %v5060_v35 = vld [vmem:[#allocation4 + $0x82] sm:$0xff] }
 0x3f4   : > { %v2421_v26 = vpop.permute.xlu1 %2420  ;;  %v2829_v33 = vpop.permute.xlu0 %2828 }
 0x3f5   : > { %2445 = vst.msk [vmem:[#allocation5] sm:$0xff] %vm2444_vm11, %v2421_v26 }
 0x3f6   : > { %2851 = vst.msk [vmem:[#allocation5 + $0x18] sm:$0xff] %vm2101_vm4, %v2829_v33  ;;  %2574 = vrot.lane.b32.xlu1 %v4786_v0, %s3642_s18  ;;  %2572 = vrot.lane.b32.xlu0 %v4688_v49, %s3642_s18 }
 0x3f8   : > { %v2875_v19 = vpop.permute.xlu1 %2874  ;;  %v2423_v21 = vpop.permute.xlu0 %2422 }
 0x3f9   : > { %2898 = vst.msk [vmem:[#allocation5 + $0x8] sm:$0xff] %vm2150_vm5, %v2875_v19  ;;  %v5207_v19 = vld [vmem:[#allocation4 + $0xa3] sm:$0xff] }
 0x3fa   : > { %2446 = vst.msk [vmem:[#allocation5 + $0x10] sm:$0xff] %vm2444_vm11, %v2423_v21  ;;  %2643 = vrot.lane.b32.xlu1 %v5060_v35, %s5490_s14  ;;  %2641 = vrot.lane.b32.xlu0 %v4811_v8, %s5490_s14 }
 0x3fc   : > { %v2082_v22 = vpop.permute.xlu1 %2081  ;;  %v2877_v27 = vpop.permute.xlu0 %2876 }
 0x3fd   : > { %2104 = vst.msk [vmem:[#allocation5 + $0x20] sm:$0xff] %vm2101_vm4, %v2082_v22 }
 0x3fe   : > { %2899 = vst.msk [vmem:[#allocation5 + $0x18] sm:$0xff] %vm2150_vm5, %v2877_v27  ;;  %2234 = vrot.lane.b32.xlu1 %v4809_v48, %s5501_s2  ;;  %2232 = vrot.lane.b32.xlu0 %v4712_v20, %s5501_s2 }
 0x400   : > { %v2470_v49 = vpop.permute.xlu1 %2469  ;;  %v2084_v53 = vpop.permute.xlu0 %2083 }
 0x401   : > { %2494 = vst.msk [vmem:[#allocation5] sm:$0xff] %vm2493_vm12, %v2470_v49 }
 0x402   : > { %2105 = vst.msk [vmem:[#allocation5 + $0x30] sm:$0xff] %vm2101_vm4, %v2084_v53  ;;  %2691 = vrot.lane.b32.xlu1 %v5074_v28, %s5491_s13  ;;  %2689 = vrot.lane.b32.xlu0 %v4817_v63, %s5491_s13  ;;  %v5221_v53 = vld [vmem:[#allocation4 + $0xa4] sm:$0xff] }
 0x404   : > { %v2923_v30 = vpop.permute.xlu1 %2922  ;;  %v2472_v36 = vpop.permute.xlu0 %2471 }
 0x405   : > { %2946 = vst.msk [vmem:[#allocation5 + $0x8] sm:$0xff] %vm2199_vm6, %v2923_v30 }
 0x406   : > { %2495 = vst.msk [vmem:[#allocation5 + $0x10] sm:$0xff] %vm2493_vm12, %v2472_v36  ;;  %2283 = vrot.lane.b32.xlu1 %v4973_v39, %s5497_s8  ;;  %2281 = vrot.lane.b32.xlu0 %v4930_v57, %s5497_s8 }
 0x408   : > { %v2131_v20 = vpop.permute.xlu1 %2130  ;;  %v2925_v51 = vpop.permute.xlu0 %2924 }
 0x409   : > { %2153 = vst.msk [vmem:[#allocation5 + $0x20] sm:$0xff] %vm2150_vm5, %v2131_v20 }
 0x40a   : > { %2947 = vst.msk [vmem:[#allocation5 + $0x18] sm:$0xff] %vm2199_vm6, %v2925_v51  ;;  %2739 = vrot.lane.b32.xlu1 %v5088_v29, %s5492_s22  ;;  %2737 = vrot.lane.b32.xlu0 %v5040_v18, %s5492_s22 }
 0x40c   : > { %v2519_v41 = vpop.permute.xlu1 %2518  ;;  %v2133_v44 = vpop.permute.xlu0 %2132 }
 0x40d   : > { %2543 = vst.msk [vmem:[#allocation5] sm:$0xff] %vm2542_vm13, %v2519_v41  ;;  %v5235_v41 = vld [vmem:[#allocation4 + $0xa0] sm:$0xff] }
 0x40e   : > { %2154 = vst.msk [vmem:[#allocation5 + $0x30] sm:$0xff] %vm2150_vm5, %v2133_v44  ;;  %2332 = vrot.lane.b32.xlu1 %v4804_v4, %s5487_s17  ;;  %2330 = vrot.lane.b32.xlu0 %v4786_v0, %s5487_s17 }
 0x410   : > { %v2971_v34 = vpop.permute.xlu1 %2970  ;;  %v2521_v45 = vpop.permute.xlu0 %2520 }
 0x411   : > { %2994 = vst.msk [vmem:[#allocation5 + $0x8] sm:$0xff] %vm2248_vm7, %v2971_v34 }
 0x412   : > { %2544 = vst.msk [vmem:[#allocation5 + $0x10] sm:$0xff] %vm2542_vm13, %v2521_v45  ;;  %2788 = vrot.lane.b32.xlu1 %v5102_v32, %s5493_s29  ;;  %2786 = vrot.lane.b32.xlu0 %v5104_v52, %s5493_s29 }
 0x414   : > { %v2180_v54 = vpop.permute.xlu1 %2179  ;;  %v2973_v56 = vpop.permute.xlu0 %2972 }
 0x415   : > { %2202 = vst.msk [vmem:[#allocation5 + $0x20] sm:$0xff] %vm2199_vm6, %v2180_v54 }
 0x416   : > { %2995 = vst.msk [vmem:[#allocation5 + $0x18] sm:$0xff] %vm2248_vm7, %v2973_v56  ;;  %2381 = vrot.lane.b32.xlu1 %v4798_v5, %s5489_s23  ;;  %2379 = vrot.lane.b32.xlu0 %v4780_v47, %s5489_s23 }
 0x418   : > { %v2569_v0 = vpop.permute.xlu1 %2568  ;;  %v2182_v23 = vpop.permute.xlu0 %2181  ;;  %v3003_v57 = vld [vmem:[#allocation5 + $0x8] sm:$0xff] }
 0x419   : > { %2593 = vst.msk [vmem:[#allocation5] sm:$0xff] %vm2592_vm14, %v2569_v0 }
 0x41a   : > { %2203 = vst.msk [vmem:[#allocation5 + $0x30] sm:$0xff] %vm2199_vm6, %v2182_v23  ;;  %2836 = vrot.lane.b32.xlu1 %v4792_v58, %s5494_s15  ;;  %2834 = vrot.lane.b32.xlu0 %v4778_v2, %s5494_s15 }
 0x41c   : > { %v2638_v16 = vpop.permute.xlu1 %2637  ;;  %v2571_v43 = vpop.permute.xlu0 %2570 }
 0x41d   : > { %v3005_v55 = vld [vmem:[#allocation5 + $0x18] sm:$0xff]  ;;  %2659 = vst.msk [vmem:[#allocation5 + $0x28] sm:$0xff] %vm1904_vm0, %v2638_v16 }
 0x41e   : > { %2594 = vst.msk [vmem:[#allocation5 + $0x10] sm:$0xff] %vm2592_vm14, %v2571_v43  ;;  %v3019_v47 = vpack.c.bf16 %v3005_v55, %v3003_v57  ;;  %2041 = vrot.lane.b32.xlu1 %v5040_v18, %s5493_s29  ;;  %2039 = vrot.lane.b32.xlu0 %v4973_v39, %s5493_s29 }
 0x420   : > { %3186 = vmatprep.mubr.bf16.mxu1 %v3019_v47  ;;  %v2229_v59 = vpop.permute.xlu1 %2228  ;;  %v2640_v61 = vpop.permute.xlu0 %2639  ;;  %v3002_v60 = vld [vmem:[#allocation5] sm:$0xff] }
 0x421   : > { %2251 = vst.msk [vmem:[#allocation5 + $0x20] sm:$0xff] %vm2248_vm7, %v2229_v59 }
 0x422   : > { %2660 = vst.msk [vmem:[#allocation5 + $0x38] sm:$0xff] %vm1904_vm0, %v2640_v61  ;;  %2430 = vrot.lane.b32.xlu1 %v4811_v8, %s5498_s9  ;;  %2428 = vrot.lane.b32.xlu0 %v4796_v3, %s5498_s9 }
 0x424   : > { %v2686_v46 = vpop.permute.xlu1 %2685  ;;  %v2231_v62 = vpop.permute.xlu0 %2230 }
 0x425   : > { %v3004_v1 = vld [vmem:[#allocation5 + $0x10] sm:$0xff]  ;;  %2707 = vst.msk [vmem:[#allocation5 + $0x28] sm:$0xff] %vm1953_vm1, %v2686_v46 }
 0x426   : > { %2252 = vst.msk [vmem:[#allocation5 + $0x30] sm:$0xff] %vm2248_vm7, %v2231_v62  ;;  %v3018_v50 = vpack.c.bf16 %v3004_v1, %v3002_v60  ;;  %2884 = vrot.lane.b32.xlu1 %v5136_v25, %s5500_s16  ;;  %2882 = vrot.lane.b32.xlu0 %v5060_v35, %s5500_s16 }
 0x428   : > { %3187 = vmatmul.mubr.bf16.vlgmr.msra.gmra.mxu1 %v3018_v50  ;;  %v2278_v37 = vpop.permute.xlu1 %2277  ;;  %v2688_v3 = vpop.permute.xlu0 %2687 }
 0x429   : > { %2300 = vst.msk [vmem:[#allocation5 + $0x20] sm:$0xff] %vm2297_vm8, %v2278_v37 }
 0x42a   : > { %2708 = vst.msk [vmem:[#allocation5 + $0x38] sm:$0xff] %vm1953_vm1, %v2688_v3  ;;  %2091 = vrot.lane.b32.xlu1 %v5104_v52, %s5494_s15  ;;  %2089 = vrot.lane.b32.xlu0 %v4804_v4, %s5494_s15 }
 0x42c   : > { %v2734_v31 = vpop.permute.xlu1 %2733  ;;  %v2280_v40 = vpop.permute.xlu0 %2279 }
 0x42d   : > { %2755 = vst.msk [vmem:[#allocation5 + $0x28] sm:$0xff] %vm2002_vm2, %v2734_v31 }
 0x42e   : > { %2301 = vst.msk [vmem:[#allocation5 + $0x30] sm:$0xff] %vm2297_vm8, %v2280_v40  ;;  %2479 = vrot.lane.b32.xlu1 %v4817_v63, %s5502_s1  ;;  %2477 = vrot.lane.b32.xlu0 %v4809_v48, %s5502_s1 }
 0x430   : > { %v2327_v7 = vpop.permute.xlu1 %2326  ;;  %v2736_v10 = vpop.permute.xlu0 %2735 }
 0x431   : > { %2349 = vst.msk [vmem:[#allocation5 + $0x20] sm:$0xff] %vm2346_vm9, %v2327_v7 }
 0x432   : > { %2756 = vst.msk [vmem:[#allocation5 + $0x38] sm:$0xff] %vm2002_vm2, %v2736_v10  ;;  %2932 = vrot.lane.b32.xlu1 %v5156_v6, %s5499_s0  ;;  %2930 = vrot.lane.b32.xlu0 %v5074_v28, %s5499_s0 }
 0x434   : > { %v2783_v9 = vpop.permute.xlu1 %2782  ;;  %v2329_v17 = vpop.permute.xlu0 %2328 }
 0x435   : > { %2804 = vst.msk [vmem:[#allocation5 + $0x28] sm:$0xff] %vm2051_vm3, %v2783_v9 }
 0x436   : > { %2350 = vst.msk [vmem:[#allocation5 + $0x30] sm:$0xff] %vm2346_vm9, %v2329_v17  ;;  %2140 = vrot.lane.b32.xlu1 %v4778_v2, %s5500_s16  ;;  %2138 = vrot.lane.b32.xlu0 %v4798_v5, %s5500_s16 }
 0x438   : > { %v2376_v48 = vpop.permute.xlu1 %2375  ;;  %v2785_v63 = vpop.permute.xlu0 %2784 }
 0x439   : > { %2398 = vst.msk [vmem:[#allocation5 + $0x20] sm:$0xff] %vm2395_vm10, %v2376_v48 }
 0x43a   : > { %2805 = vst.msk [vmem:[#allocation5 + $0x38] sm:$0xff] %vm2051_vm3, %v2785_v63  ;;  %2528 = vrot.lane.b32.xlu1 %v5040_v18, %s5503_s3  ;;  %2526 = vrot.lane.b32.xlu0 %v4973_v39, %s5503_s3 }
 0x43c   : > { %v2831_v11 = vpop.permute.xlu1 %2830  ;;  %v2378_v15 = vpop.permute.xlu0 %2377 }
 0x43d   : > { %2852 = vst.msk [vmem:[#allocation5 + $0x28] sm:$0xff] %vm2101_vm4, %v2831_v11 }
 0x43e   : > { %2399 = vst.msk [vmem:[#allocation5 + $0x30] sm:$0xff] %vm2395_vm10, %v2378_v15  ;;  %2980 = vrot.lane.b32.xlu1 %v5176_v12, %s5501_s2  ;;  %2978 = vrot.lane.b32.xlu0 %v5088_v29, %s5501_s2 }
 0x440   : > { %v2038_v5 = vpop.permute.xlu1 %2037  ;;  %v2833_v14 = vpop.permute.xlu0 %2832 }
 0x441   : > { %2057 = vst.msk [vmem:[#allocation5 + $0x50] sm:$0xff] %vm2051_vm3, %v2038_v5 }
 0x442   : > { %2853 = vst.msk [vmem:[#allocation5 + $0x38] sm:$0xff] %vm2101_vm4, %v2833_v14  ;;  %2189 = vrot.lane.b32.xlu1 %v5060_v35, %s5499_s0  ;;  %2187 = vrot.lane.b32.xlu0 %v4811_v8, %s5499_s0 }
 0x444   : > { %v2427_v39 = vpop.permute.xlu1 %2426  ;;  %v2425_v42 = vpop.permute.xlu0 %2424 }
 0x445   : > { %2448 = vst.msk [vmem:[#allocation5 + $0x30] sm:$0xff] %vm2444_vm11, %v2427_v39  ;;  %2447 = vst.msk [vmem:[#allocation5 + $0x20] sm:$0xff] %vm2444_vm11, %v2425_v42 }
 0x446   : > { %2578 = vrot.lane.b32.xlu1 %v5104_v52, %s3642_s18  ;;  %2576 = vrot.lane.b32.xlu0 %v4804_v4, %s3642_s18  ;;  %v2214_v4 = vld [vmem:[#allocation4 + $0x73] sm:$0xff] }
 0x448   : > { %v2881_v24 = vpop.permute.xlu1 %2880  ;;  %v2879_v26 = vpop.permute.xlu0 %2878 }
 0x449   : > { %2901 = vst.msk [vmem:[#allocation5 + $0x38] sm:$0xff] %vm2150_vm5, %v2881_v24  ;;  %2900 = vst.msk [vmem:[#allocation5 + $0x28] sm:$0xff] %vm2150_vm5, %v2879_v26 }
 0x44a   : > { %2647 = vrot.lane.b32.xlu1 %v5194_v38, %s5490_s14  ;;  %2645 = vrot.lane.b32.xlu0 %v5136_v25, %s5490_s14 }
 0x44c   : > { %v2088_v8 = vpop.permute.xlu1 %2087  ;;  %v2086_v33 = vpop.permute.xlu0 %2085 }
 0x44d   : > { %2107 = vst.msk [vmem:[#allocation5 + $0x50] sm:$0xff] %vm2101_vm4, %v2088_v8  ;;  %2106 = vst.msk [vmem:[#allocation5 + $0x40] sm:$0xff] %vm2101_vm4, %v2086_v33 }
 0x44e   : > { %2238 = vrot.lane.b32.xlu1 %v5074_v28, %s5501_s2  ;;  %2236 = vrot.lane.b32.xlu0 %v2214_v4, %s5501_s2 }
 0x450   : > { %v2476_v21 = vpop.permute.xlu1 %2475  ;;  %v2474_v22 = vpop.permute.xlu0 %2473 }
 0x451   : > { %2497 = vst.msk [vmem:[#allocation5 + $0x30] sm:$0xff] %vm2493_vm12, %v2476_v21  ;;  %2496 = vst.msk [vmem:[#allocation5 + $0x20] sm:$0xff] %vm2493_vm12, %v2474_v22 }
 0x452   : > { %2695 = vrot.lane.b32.xlu1 %v5207_v19, %s5491_s13  ;;  %2693 = vrot.lane.b32.xlu0 %v5156_v6, %s5491_s13 }
 0x454   : > { %v2929_v27 = vpop.permute.xlu1 %2928  ;;  %v2927_v49 = vpop.permute.xlu0 %2926 }
 0x455   : > { %2949 = vst.msk [vmem:[#allocation5 + $0x38] sm:$0xff] %vm2199_vm6, %v2929_v27  ;;  %2948 = vst.msk [vmem:[#allocation5 + $0x28] sm:$0xff] %vm2199_vm6, %v2927_v49 }
 0x456   : > { %2287 = vrot.lane.b32.xlu1 %v5088_v29, %s5497_s8  ;;  %2285 = vrot.lane.b32.xlu0 %v5040_v18, %s5497_s8  ;;  %v2769_v18 = vld [vmem:[#allocation4 + $0xb0] sm:$0xff] }
 0x458   : > { %v2137_v30 = vpop.permute.xlu1 %2136  ;;  %v2135_v36 = vpop.permute.xlu0 %2134 }
 0x459   : > { %2156 = vst.msk [vmem:[#allocation5 + $0x50] sm:$0xff] %vm2150_vm5, %v2137_v30  ;;  %2155 = vst.msk [vmem:[#allocation5 + $0x40] sm:$0xff] %vm2150_vm5, %v2135_v36 }
 0x45a   : > { %2743 = vrot.lane.b32.xlu1 %v5221_v53, %s5492_s22  ;;  %2741 = vrot.lane.b32.xlu0 %v5176_v12, %s5492_s22 }
 0x45c   : > { %v2525_v20 = vpop.permute.xlu1 %2524  ;;  %v2523_v51 = vpop.permute.xlu0 %2522 }
 0x45d   : > { %2546 = vst.msk [vmem:[#allocation5 + $0x30] sm:$0xff] %vm2542_vm13, %v2525_v20  ;;  %2545 = vst.msk [vmem:[#allocation5 + $0x20] sm:$0xff] %vm2542_vm13, %v2523_v51 }
 0x45e   : > { %2336 = vrot.lane.b32.xlu1 %v5102_v32, %s5487_s17  ;;  %2334 = vrot.lane.b32.xlu0 %v5104_v52, %s5487_s17  ;;  %v2817_v52 = vld [vmem:[#allocation4 + $0xb1] sm:$0xff] }
 0x460   : > { %v2977_v44 = vpop.permute.xlu1 %2976  ;;  %v2975_v34 = vpop.permute.xlu0 %2974 }
 0x461   : > { %2997 = vst.msk [vmem:[#allocation5 + $0x38] sm:$0xff] %vm2248_vm7, %v2977_v44  ;;  %2996 = vst.msk [vmem:[#allocation5 + $0x28] sm:$0xff] %vm2248_vm7, %v2975_v34 }
 0x462   : > { %2792 = vrot.lane.b32.xlu1 %v2769_v18, %s5493_s29  ;;  %2790 = vrot.lane.b32.xlu0 %v5235_v41, %s5493_s29  ;;  %s3382_s29 = sshll.u32 %s3706_s28, 10 }
 0x463   : > { %s5392_s21 = scalar_lea.hbm %s5448_s7, %s3382_s29 }
 0x464   : > { %v2186_v45 = vpop.permute.xlu1 %2185  ;;  %v2184_v54 = vpop.permute.xlu0 %2183 }
 0x465   : > { %2205 = vst.msk [vmem:[#allocation5 + $0x50] sm:$0xff] %vm2199_vm6, %v2186_v45  ;;  %2204 = vst.msk [vmem:[#allocation5 + $0x40] sm:$0xff] %vm2199_vm6, %v2184_v54 }
 0x466   : > { %2385 = vrot.lane.b32.xlu1 %v4792_v58, %s5489_s23  ;;  %2383 = vrot.lane.b32.xlu0 %v4778_v2, %s5489_s23  ;;  %v2865_v2 = vld [vmem:[#allocation4 + $0xb2] sm:$0xff] }
 0x468   : > { %v2575_v56 = vpop.permute.xlu1 %2574  ;;  %v2573_v0 = vpop.permute.xlu0 %2572  ;;  %v3007_v23 = vld [vmem:[#allocation5 + $0x28] sm:$0xff]  ;;  %v3009_v16 = vld [vmem:[#allocation5 + $0x38] sm:$0xff] }
 0x469   : > { %2596 = vst.msk [vmem:[#allocation5 + $0x30] sm:$0xff] %vm2592_vm14, %v2575_v56  ;;  %2595 = vst.msk [vmem:[#allocation5 + $0x20] sm:$0xff] %vm2592_vm14, %v2573_v0  ;;  %v3021_v43 = vpack.c.bf16 %v3009_v16, %v3007_v23 }
 0x46a   : > { %2840 = vrot.lane.b32.xlu1 %v2817_v52, %s5494_s15  ;;  %2838 = vrot.lane.b32.xlu0 %v5034_v13, %s5494_s15 }
 0x46b   : > { %3194 = vmatprep.mubr.bf16.mxu1 %v3021_v43 }
 0x46c   : > { %v2644_v58 = vpop.permute.xlu1 %2643  ;;  %v2642_v57 = vpop.permute.xlu0 %2641 }
 0x46d   : > { %2662 = vst.msk [vmem:[#allocation5 + $0x58] sm:$0xff] %vm1904_vm0, %v2644_v58  ;;  %2661 = vst.msk [vmem:[#allocation5 + $0x48] sm:$0xff] %vm1904_vm0, %v2642_v57 }
 0x46e   : > { %2434 = vrot.lane.b32.xlu1 %v5136_v25, %s5498_s9  ;;  %2432 = vrot.lane.b32.xlu0 %v5060_v35, %s5498_s9  ;;  %v2913_v35 = vld [vmem:[#allocation4 + $0xb3] sm:$0xff] }
 0x470   : > { %v2235_v55 = vpop.permute.xlu1 %2234  ;;  %v2233_v47 = vpop.permute.xlu0 %2232  ;;  %v3006_v59 = vld [vmem:[#allocation5 + $0x20] sm:$0xff]  ;;  %v3008_v61 = vld [vmem:[#allocation5 + $0x30] sm:$0xff] }
 0x471   : > { %2254 = vst.msk [vmem:[#allocation5 + $0x50] sm:$0xff] %vm2248_vm7, %v2235_v55  ;;  %2253 = vst.msk [vmem:[#allocation5 + $0x40] sm:$0xff] %vm2248_vm7, %v2233_v47  ;;  %v3020_v13 = vpack.c.bf16 %v3008_v61, %v3006_v59 }
 0x472   : > { %2888 = vrot.lane.b32.xlu1 %v2865_v2, %s5500_s16  ;;  %2886 = vrot.lane.b32.xlu0 %v5194_v38, %s5500_s16 }
 0x473   : > { %3195 = vmatmul.mubr.bf16.gmra.mxu1 %v3020_v13 }
 0x474   : > { %v2692_v46 = vpop.permute.xlu1 %2691  ;;  %v2690_v62 = vpop.permute.xlu0 %2689 }
 0x475   : > { %2710 = vst.msk [vmem:[#allocation5 + $0x58] sm:$0xff] %vm1953_vm1, %v2692_v46  ;;  %2709 = vst.msk [vmem:[#allocation5 + $0x48] sm:$0xff] %vm1953_vm1, %v2690_v62 }
 0x476   : > { %2483 = vrot.lane.b32.xlu1 %v5156_v6, %s5502_s1  ;;  %2481 = vrot.lane.b32.xlu0 %v5074_v28, %s5502_s1  ;;  %v2961_v28 = vld [vmem:[#allocation4 + $0xb4] sm:$0xff] }
 0x478   : > { %v2284_v60 = vpop.permute.xlu1 %2283  ;;  %v2282_v1 = vpop.permute.xlu0 %2281 }
 0x479   : > { %2303 = vst.msk [vmem:[#allocation5 + $0x50] sm:$0xff] %vm2297_vm8, %v2284_v60  ;;  %2302 = vst.msk [vmem:[#allocation5 + $0x40] sm:$0xff] %vm2297_vm8, %v2282_v1 }
 0x47a   : > { %2936 = vrot.lane.b32.xlu1 %v2913_v35, %s5499_s0  ;;  %2934 = vrot.lane.b32.xlu0 %v5207_v19, %s5499_s0  ;;  %s269_s0 = sand.u32 1, %s3604_s25  }
 0x47b   : > { %s3345_s17 = sshll.u32 %s269_s0, 6  ;;  %s5400_s20 = scalar_lea.sflag [#allocation7], %s269_s0 }
 0x47c   : > { %v2740_v25 = vpop.permute.xlu1 %2739  ;;  %v2738_v50 = vpop.permute.xlu0 %2737  ;;  %s5361_s22 = scalar_lea.vmem [#allocation6], %s3345_s17 }
 0x47d   : > { %2758 = vst.msk [vmem:[#allocation5 + $0x58] sm:$0xff] %vm2002_vm2, %v2740_v25  ;;  %2757 = vst.msk [vmem:[#allocation5 + $0x48] sm:$0xff] %vm2002_vm2, %v2738_v50  ;;  %s3279_s15 = sshll.u32 %s5361_s22, 4  ;;  %s5395_s15 = int_to_ptr.vmem [resolvable:$true] %s3279_s15 }
 0x47e   : > { %2532 = vrot.lane.b32.xlu1 %v5176_v12, %s5503_s3  ;;  %2530 = vrot.lane.b32.xlu0 %v5088_v29, %s5503_s3  ;;  %s3552_s28 = scalar_lea.vmem %s5395_s15, 1024 }
 0x47f   : > { %p3553_p11 = scmp.ne.s32.totalorder %s5395_s15, %s3552_s28 }
 0x480   : > { %v2333_v37 = vpop.permute.xlu1 %2332  ;;  %v2331_v3 = vpop.permute.xlu0 %2330 }
 0x481   : > { %2352 = vst.msk [vmem:[#allocation5 + $0x50] sm:$0xff] %vm2346_vm9, %v2333_v37  ;;  %2351 = vst.msk [vmem:[#allocation5 + $0x40] sm:$0xff] %vm2346_vm9, %v2331_v3  ;;  %p3554_p12 = pnand %p3553_p11, %p3723_p5 }
 0x482   : > { %2984 = vrot.lane.b32.xlu1 %v2961_v28, %s5501_s2  ;;  %2982 = vrot.lane.b32.xlu0 %v5221_v53, %s5501_s2  ;;  %v5346_v28 = vld [vmem:[%s5446_s5] ss:$0 sm:$0xff] }
 0x483   : > { %p3555_p13 = pneg %p3554_p12 }
 0x484   : > { %v2789_v31 = vpop.permute.xlu1 %2788  ;;  %v2787_v40 = vpop.permute.xlu0 %2786 }
 0x485   : > { %2807 = vst.msk [vmem:[#allocation5 + $0x58] sm:$0xff] %vm2051_vm3, %v2789_v31  ;;  %2806 = vst.msk [vmem:[#allocation5 + $0x48] sm:$0xff] %vm2051_vm3, %v2787_v40 }
 0x486   : > { %2582 = vrot.lane.b32.xlu1 %v5235_v41, %s3642_s18  ;;  %2580 = vrot.lane.b32.xlu0 %v5102_v32, %s3642_s18  ;;  %s3556_s18 = sshll.u32 %s3643_s19, 4  ;;  %s3557_s18 = int_to_ptr.vmem [resolvable:$false] %s3556_s18 }
 0x487   : > { %s3558_s1 = scalar_lea.vmem %s3557_s18, 2048  ;;  %p3559_p0 = scmp.lt.s32.totalorder %s5395_s15, %s3557_s18 }
 0x488   : > { %v2382_v29 = vpop.permute.xlu1 %2381  ;;  %v2380_v7 = vpop.permute.xlu0 %2379  ;;  %p3560_p1 = scmp.lt.s32.totalorder %s3558_s1, %s3552_s28 }
 0x489   : > { %2401 = vst.msk [vmem:[#allocation5 + $0x50] sm:$0xff] %vm2395_vm10, %v2382_v29  ;;  %2400 = vst.msk [vmem:[#allocation5 + $0x40] sm:$0xff] %vm2395_vm10, %v2380_v7  ;;  %v5353_v29 = vld [vmem:[%s5447_s6] ss:$0 sm:$0xff] }
 0x48a   : > { %p3561_p2 = por %p3560_p1, %p3559_p0 }
 0x48c   : > { %v2837_v10 = vpop.permute.xlu1 %2836  ;;  %v2835_v6 = vpop.permute.xlu0 %2834  ;;  %p3562_p3 = pnand %p3561_p2, %p3555_p13 }
 0x48d   : > { %2855 = vst.msk [vmem:[#allocation5 + $0x58] sm:$0xff] %vm2101_vm4, %v2837_v10  ;;  %2854 = vst.msk [vmem:[#allocation5 + $0x48] sm:$0xff] %vm2101_vm4, %v2835_v6 }
 0x490   : > { %v2042_v9 = vpop.permute.xlu1 %2041  ;;  %v2040_v17 = vpop.permute.xlu0 %2039 }
 0x491   : > { %2059 = vst.msk [vmem:[#allocation5 + $0x70] sm:$0xff] %vm2051_vm3, %v2042_v9  ;;  %2058 = vst.msk [vmem:[#allocation5 + $0x60] sm:$0xff] %vm2051_vm3, %v2040_v17 }
 0x494   : > { %v2431_v48 = vpop.permute.xlu1 %2430  ;;  %v2429_v32 = vpop.permute.xlu0 %2428 }
 0x495   : > { %2450 = vst.msk [vmem:[#allocation5 + $0x50] sm:$0xff] %vm2444_vm11, %v2431_v48  ;;  %2449 = vst.msk [vmem:[#allocation5 + $0x40] sm:$0xff] %vm2444_vm11, %v2429_v32 }
 0x498   : > { %v2885_v63 = vpop.permute.xlu1 %2884  ;;  %v2883_v11 = vpop.permute.xlu0 %2882 }
 0x499   : > { %2903 = vst.msk [vmem:[#allocation5 + $0x58] sm:$0xff] %vm2150_vm5, %v2885_v63  ;;  %2902 = vst.msk [vmem:[#allocation5 + $0x48] sm:$0xff] %vm2150_vm5, %v2883_v11 }
 0x49c   : > { %v2092_v15 = vpop.permute.xlu1 %2091  ;;  %v2090_v12 = vpop.permute.xlu0 %2089 }
 0x49d   : > { %2109 = vst.msk [vmem:[#allocation5 + $0x70] sm:$0xff] %vm2101_vm4, %v2092_v15  ;;  %2108 = vst.msk [vmem:[#allocation5 + $0x60] sm:$0xff] %vm2101_vm4, %v2090_v12 }
 0x4a0   : > { %v2480_v5 = vpop.permute.xlu1 %2479  ;;  %v2478_v14 = vpop.permute.xlu0 %2477 }
 0x4a1   : > { %2499 = vst.msk [vmem:[#allocation5 + $0x50] sm:$0xff] %vm2493_vm12, %v2480_v5  ;;  %2498 = vst.msk [vmem:[#allocation5 + $0x40] sm:$0xff] %vm2493_vm12, %v2478_v14 }
 0x4a4   : > { %v2933_v39 = vpop.permute.xlu1 %2932  ;;  %v2931_v42 = vpop.permute.xlu0 %2930 }
 0x4a5   : > { %2951 = vst.msk [vmem:[#allocation5 + $0x58] sm:$0xff] %vm2199_vm6, %v2933_v39  ;;  %2950 = vst.msk [vmem:[#allocation5 + $0x48] sm:$0xff] %vm2199_vm6, %v2931_v42 }
 0x4a8   : > { %v2141_v38 = vpop.permute.xlu1 %2140  ;;  %v2139_v24 = vpop.permute.xlu0 %2138 }
 0x4a9   : > { %2158 = vst.msk [vmem:[#allocation5 + $0x70] sm:$0xff] %vm2150_vm5, %v2141_v38  ;;  %2157 = vst.msk [vmem:[#allocation5 + $0x60] sm:$0xff] %vm2150_vm5, %v2139_v24 }
 0x4ac   : > { %v2529_v26 = vpop.permute.xlu1 %2528  ;;  %v2527_v8 = vpop.permute.xlu0 %2526 }
 0x4ad   : > { %2548 = vst.msk [vmem:[#allocation5 + $0x50] sm:$0xff] %vm2542_vm13, %v2529_v26  ;;  %2547 = vst.msk [vmem:[#allocation5 + $0x40] sm:$0xff] %vm2542_vm13, %v2527_v8 }
 0x4b0   : > { %v2981_v33 = vpop.permute.xlu1 %2980  ;;  %v2979_v4 = vpop.permute.xlu0 %2978 }
 0x4b1   : > { %2999 = vst.msk [vmem:[#allocation5 + $0x58] sm:$0xff] %vm2248_vm7, %v2981_v33  ;;  %2998 = vst.msk [vmem:[#allocation5 + $0x48] sm:$0xff] %vm2248_vm7, %v2979_v4 }
 0x4b4   : > { %v2190_v19 = vpop.permute.xlu1 %2189  ;;  %v2188_v21 = vpop.permute.xlu0 %2187 }
 0x4b5   : > { %2207 = vst.msk [vmem:[#allocation5 + $0x70] sm:$0xff] %vm2199_vm6, %v2190_v19  ;;  %2206 = vst.msk [vmem:[#allocation5 + $0x60] sm:$0xff] %vm2199_vm6, %v2188_v21 }
 0x4b8   : > { %v2579_v22 = vpop.permute.xlu1 %2578  ;;  %v2577_v27 = vpop.permute.xlu0 %2576  ;;  %v3011_v49 = vld [vmem:[#allocation5 + $0x48] sm:$0xff]  ;;  %v3013_v53 = vld [vmem:[#allocation5 + $0x58] sm:$0xff] }
 0x4b9   : > { %2598 = vst.msk [vmem:[#allocation5 + $0x50] sm:$0xff] %vm2592_vm14, %v2579_v22  ;;  %2597 = vst.msk [vmem:[#allocation5 + $0x40] sm:$0xff] %vm2592_vm14, %v2577_v27  ;;  %v3023_v30 = vpack.c.bf16 %v3013_v53, %v3011_v49 }
 0x4bb   : > { %3202 = vmatprep.mubr.bf16.mxu1 %v3023_v30 }
 0x4bc   : > { %v2648_v36 = vpop.permute.xlu1 %2647  ;;  %v2646_v20 = vpop.permute.xlu0 %2645 }
 0x4bd   : > { %2664 = vst.msk [vmem:[#allocation5 + $0x78] sm:$0xff] %vm1904_vm0, %v2648_v36  ;;  %2663 = vst.msk [vmem:[#allocation5 + $0x68] sm:$0xff] %vm1904_vm0, %v2646_v20 }
 0x4c0   : > { %v2239_v51 = vpop.permute.xlu1 %2238  ;;  %v2237_v18 = vpop.permute.xlu0 %2236  ;;  %v3010_v41 = vld [vmem:[#allocation5 + $0x40] sm:$0xff]  ;;  %v3012_v44 = vld [vmem:[#allocation5 + $0x50] sm:$0xff] }
 0x4c1   : > { %2256 = vst.msk [vmem:[#allocation5 + $0x70] sm:$0xff] %vm2248_vm7, %v2239_v51  ;;  %2255 = vst.msk [vmem:[#allocation5 + $0x60] sm:$0xff] %vm2248_vm7, %v2237_v18  ;;  %v3022_v34 = vpack.c.bf16 %v3012_v44, %v3010_v41 }
 0x4c3   : > { %3203 = vmatmul.mubr.bf16.gmra.mxu1 %v3022_v34 }
 0x4c4   : > { %v2696_v45 = vpop.permute.xlu1 %2695  ;;  %v2694_v54 = vpop.permute.xlu0 %2693 }
 0x4c5   : > { %2712 = vst.msk [vmem:[#allocation5 + $0x78] sm:$0xff] %vm1953_vm1, %v2696_v45  ;;  %2711 = vst.msk [vmem:[#allocation5 + $0x68] sm:$0xff] %vm1953_vm1, %v2694_v54 }
 0x4c8   : > { %v2288_v52 = vpop.permute.xlu1 %2287  ;;  %v2286_v56 = vpop.permute.xlu0 %2285 }
 0x4c9   : > { %2305 = vst.msk [vmem:[#allocation5 + $0x70] sm:$0xff] %vm2297_vm8, %v2288_v52  ;;  %2304 = vst.msk [vmem:[#allocation5 + $0x60] sm:$0xff] %vm2297_vm8, %v2286_v56 }
 0x4cc   : > { %v2744_v0 = vpop.permute.xlu1 %2743  ;;  %v2742_v23 = vpop.permute.xlu0 %2741 }
 0x4cd   : > { %2760 = vst.msk [vmem:[#allocation5 + $0x78] sm:$0xff] %vm2002_vm2, %v2744_v0  ;;  %2759 = vst.msk [vmem:[#allocation5 + $0x68] sm:$0xff] %vm2002_vm2, %v2742_v23 }
 0x4d0   : > { %v2337_v16 = vpop.permute.xlu1 %2336  ;;  %v2335_v43 = vpop.permute.xlu0 %2334 }
 0x4d1   : > { %2354 = vst.msk [vmem:[#allocation5 + $0x70] sm:$0xff] %vm2346_vm9, %v2337_v16  ;;  %2353 = vst.msk [vmem:[#allocation5 + $0x60] sm:$0xff] %vm2346_vm9, %v2335_v43 }
 0x4d4   : > { %v2793_v58 = vpop.permute.xlu1 %2792  ;;  %v2791_v57 = vpop.permute.xlu0 %2790 }
 0x4d5   : > { %2809 = vst.msk [vmem:[#allocation5 + $0x78] sm:$0xff] %vm2051_vm3, %v2793_v58  ;;  %2808 = vst.msk [vmem:[#allocation5 + $0x68] sm:$0xff] %vm2051_vm3, %v2791_v57 }
 0x4d8   : > { %v2386_v2 = vpop.permute.xlu1 %2385  ;;  %v2384_v55 = vpop.permute.xlu0 %2383 }
 0x4d9   : > { %2403 = vst.msk [vmem:[#allocation5 + $0x70] sm:$0xff] %vm2395_vm10, %v2386_v2  ;;  %2402 = vst.msk [vmem:[#allocation5 + $0x60] sm:$0xff] %vm2395_vm10, %v2384_v55 }
 0x4dc   : > { %v2841_v47 = vpop.permute.xlu1 %2840  ;;  %v2839_v59 = vpop.permute.xlu0 %2838 }
 0x4dd   : > { %2857 = vst.msk [vmem:[#allocation5 + $0x78] sm:$0xff] %vm2101_vm4, %v2841_v47  ;;  %2856 = vst.msk [vmem:[#allocation5 + $0x68] sm:$0xff] %vm2101_vm4, %v2839_v59 }
 0x4e0   : > { %v2435_v61 = vpop.permute.xlu1 %2434  ;;  %v2433_v13 = vpop.permute.xlu0 %2432 }
 0x4e1   : > { %2452 = vst.msk [vmem:[#allocation5 + $0x70] sm:$0xff] %vm2444_vm11, %v2435_v61  ;;  %2451 = vst.msk [vmem:[#allocation5 + $0x60] sm:$0xff] %vm2444_vm11, %v2433_v13 }
 0x4e4   : > { %v2889_v46 = vpop.permute.xlu1 %2888  ;;  %v2887_v62 = vpop.permute.xlu0 %2886 }
 0x4e5   : > { %2905 = vst.msk [vmem:[#allocation5 + $0x78] sm:$0xff] %vm2150_vm5, %v2889_v46  ;;  %2904 = vst.msk [vmem:[#allocation5 + $0x68] sm:$0xff] %vm2150_vm5, %v2887_v62 }
 0x4e8   : > { %v3411_v35 = vpop.f32.mrf.mxu1  ;;  %v2484_v60 = vpop.permute.xlu1 %2483 }
 0x4e9   : > { %v2482_v1 = vpop.permute.xlu0 %2481  ;;  %2501 = vst.msk [vmem:[#allocation5 + $0x70] sm:$0xff] %vm2493_vm12, %v2484_v60 }
 0x4ea   : > { %2500 = vst.msk [vmem:[#allocation5 + $0x60] sm:$0xff] %vm2493_vm12, %v2482_v1  ;;  %v3412_v25 = vpop.f32.mrf.mxu1 }
 0x4eb   : > { %v3413_v50 = vadd.f32 %v3412_v25, %v3411_v35 }
 0x4ec   : > { %v3414_v37 = vpop.f32.mrf.mxu1  ;;  %v2937_v31 = vpop.permute.xlu1 %2936 }
 0x4ed   : > { %v3219_v3 = vmax.f32 %v3413_v50, 0.0  ;;  %v2935_v40 = vpop.permute.xlu0 %2934  ;;  %2953 = vst.msk [vmem:[#allocation5 + $0x78] sm:$0xff] %vm2199_vm6, %v2937_v31 }
 0x4ee   : > { %2952 = vst.msk [vmem:[#allocation5 + $0x68] sm:$0xff] %vm2199_vm6, %v2935_v40  ;;  %v3415_v7 = vpop.f32.mrf.mxu1 }
 0x4ef   : > { %v3234_v10 = vmul.f32 %v5346_v28, %v3219_v3  ;;  %v3416_v6 = vadd.f32 %v3415_v7, %v3414_v37 }
 0x4f0   : > { %v2533_v48 = vpop.permute.xlu1 %2532 }
 0x4f1   : > { %v3249_v9 = vadd.f32 %v5353_v29, %v3234_v10  ;;  %v3220_v17 = vmax.f32 %v3416_v6, 0.0  ;;  %v2531_v32 = vpop.permute.xlu0 %2530  ;;  %2550 = vst.msk [vmem:[#allocation5 + $0x70] sm:$0xff] %vm2542_vm13, %v2533_v48 }
 0x4f2   : > { %2549 = vst.msk [vmem:[#allocation5 + $0x60] sm:$0xff] %vm2542_vm13, %v2531_v32 }
 0x4f3   : > { %3257 = vst [vmem:[%s5361_s22] sm:$0xff] %v3249_v9  ;;  %v3235_v63 = vmul.f32 %v5346_v28, %v3220_v17 }
 0x4f4   : > { %v2985_v15 = vpop.permute.xlu1 %2984 }
 0x4f5   : > { %v3250_v11 = vadd.f32 %v5353_v29, %v3235_v63  ;;  %v2983_v12 = vpop.permute.xlu0 %2982  ;;  %3001 = vst.msk [vmem:[#allocation5 + $0x78] sm:$0xff] %vm2248_vm7, %v2985_v15 }
 0x4f6   : > { %3000 = vst.msk [vmem:[#allocation5 + $0x68] sm:$0xff] %vm2248_vm7, %v2983_v12 }
 0x4f7   : > { %3258 = vst [vmem:[%s5361_s22 + $0x8] sm:$0xff] %v3250_v11 }
 0x4f8   : > { %v2583_v5 = vpop.permute.xlu1 %2582 }
 0x4f9   : > { %v2581_v14 = vpop.permute.xlu0 %2580  ;;  %2600 = vst.msk [vmem:[#allocation5 + $0x70] sm:$0xff] %vm2592_vm14, %v2583_v5 }
 0x4fa   : > { %2599 = vst.msk [vmem:[#allocation5 + $0x60] sm:$0xff] %vm2592_vm14, %v2581_v14 }
 0x4fc   : > { %v3017_v42 = vld [vmem:[#allocation5 + $0x78] sm:$0xff] }
 0x4fd   : > { %v3015_v39 = vld [vmem:[#allocation5 + $0x68] sm:$0xff] }
 0x4fe   : > { %v3025_v38 = vpack.c.bf16 %v3017_v42, %v3015_v39 }
 0x500   : > { %3210 = vmatprep.mubr.bf16.mxu1 %v3025_v38  ;;  %v3016_v26 = vld [vmem:[#allocation5 + $0x70] sm:$0xff] }
 0x501   : > { %v3014_v24 = vld [vmem:[#allocation5 + $0x60] sm:$0xff] }
 0x502   : > { %v3024_v8 = vpack.c.bf16 %v3016_v26, %v3014_v24 }
 0x504   : > { %3211 = vmatmul.mubr.bf16.gmra.mxu1 %v3024_v8 }
 0x533   : > { %v3417_v33 = vpop.f32.mrf.mxu1 }
 0x535   : > { %v3418_v4 = vpop.f32.mrf.mxu1 }
 0x536   : > { %v3419_v19 = vadd.f32 %v3418_v4, %v3417_v33 }
 0x537   : > { %v3420_v21 = vpop.f32.mrf.mxu1 }
 0x538   : > { %v3221_v22 = vmax.f32 %v3419_v19, 0.0 }
 0x539   : > { %v3421_v27 = vpop.f32.mrf.mxu1 }
 0x53a   : > { %v3236_v49 = vmul.f32 %v5346_v28, %v3221_v22  ;;  %v3422_v53 = vadd.f32 %v3421_v27, %v3420_v21 }
 0x53c   : > { %v3251_v30 = vadd.f32 %v5353_v29, %v3236_v49  ;;  %v3222_v36 = vmax.f32 %v3422_v53, 0.0 }
 0x53e   : > { %3259 = vst [vmem:[%s5361_s22 + $0x10] sm:$0xff] %v3251_v30  ;;  %v3237_v20 = vmul.f32 %v5346_v28, %v3222_v36 }
 0x540   : > { %v3252_v51 = vadd.f32 %v5353_v29, %v3237_v20 }
 0x542   : > { %3260 = vst [vmem:[%s5361_s22 + $0x18] sm:$0xff] %v3252_v51 }
 0x583   : > { %v3423_v18 = vpop.f32.mrf.mxu1 }
 0x585   : > { %v3424_v41 = vpop.f32.mrf.mxu1 }
 0x586   : > { %v3425_v44 = vadd.f32 %v3424_v41, %v3423_v18 }
 0x587   : > { %v3426_v34 = vpop.f32.mrf.mxu1 }
 0x588   : > { %v3223_v45 = vmax.f32 %v3425_v44, 0.0 }
 0x589   : > { %v3427_v54 = vpop.f32.mrf.mxu1 }
 0x58a   : > { %v3238_v52 = vmul.f32 %v5346_v28, %v3223_v45  ;;  %v3428_v56 = vadd.f32 %v3427_v54, %v3426_v34 }
 0x58c   : > { %v3253_v0 = vadd.f32 %v5353_v29, %v3238_v52  ;;  %v3224_v23 = vmax.f32 %v3428_v56, 0.0 }
 0x58e   : > { %3261 = vst [vmem:[%s5361_s22 + $0x20] sm:$0xff] %v3253_v0  ;;  %v3239_v16 = vmul.f32 %v5346_v28, %v3224_v23 }
 0x590   : > { %v3254_v43 = vadd.f32 %v5353_v29, %v3239_v16 }
 0x592   : > { %3262 = vst [vmem:[%s5361_s22 + $0x28] sm:$0xff] %v3254_v43 }
 0x5c4   : > { %v3429_v58 = vpop.f32.mrf.mxu1 }
 0x5c6   : > { %v3430_v57 = vpop.f32.mrf.mxu1 }
 0x5c7   : > { %v3431_v2 = vadd.f32 %v3430_v57, %v3429_v58 }
 0x5c8   : > { %v3432_v55 = vpop.f32.mrf.mxu1 }
 0x5c9   : > { %v3225_v47 = vmax.f32 %v3431_v2, 0.0 }
 0x5ca   : > { %v3433_v59 = vpop.f32.mrf.mxu1 }
 0x5cb   : > { %v3240_v61 = vmul.f32 %v5346_v28, %v3225_v47  ;;  %v3434_v13 = vadd.f32 %v3433_v59, %v3432_v55 }
 0x5cd   : > { %v3255_v46 = vadd.f32 %v5353_v29, %v3240_v61  ;;  %v3226_v62 = vmax.f32 %v3434_v13, 0.0 }
 0x5cf   : > { %3263 = vst [vmem:[%s5361_s22 + $0x30] sm:$0xff] %v3255_v46  ;;  %v3241_v35 = vmul.f32 %v5346_v28, %v3226_v62 }
 0x5d1   : > { %v3256_v60 = vadd.f32 %v5353_v29, %v3241_v35 }
 0x5d3   : > { %3264 = vst [vmem:[%s5361_s22 + $0x38] sm:$0xff] %v3256_v60 }
 0x5d4   : > { %3565 = shalt.err (!%p3562_p3)
}
 0x5d5   : > { %s3566_s3 = scalar_lea.hbm %s5392_s21, 1024  ;;  %s3570_s16 = scalar_lea.hbm %s5448_s7, 2048 }
 0x5d6   : > { %p3567_p4 = scmp.ne.s32.totalorder %s5392_s21, %s3566_s3  ;;  %p3571_p9 = scmp.lt.s32.totalorder %s5392_s21, %s5448_s7 }
 0x5d7   : > { %p3572_p10 = scmp.lt.s32.totalorder %s3570_s16, %s3566_s3 }
 0x5d8   : > { %p3568_p7 = pnand %p3567_p4, %p3723_p5 }
 0x5d9   : > { %p3573_p11 = por %p3572_p10, %p3571_p9 }
 0x5da   : > { %p3569_p8 = pneg %p3568_p7 }
 0x5dc   : > { %p3574_p12 = pnand %p3573_p11, %p3569_p8 }
 0x5de   : > { %3577 = shalt.err (!%p3574_p12)
}
 0x5df   : > { %s3644_s13 = smov 128  }
 0x5e0   : > { %3459 = dma.vmem_to_hbm [thread:$0]  (%p3723_p5), %s5395_s15, 1024, %s5392_s21, %s5400_s20, %s3644_s13, %s3644_s13, %s5490_s14  }
 0x5e1 PF: > { %p3465_p13 = scmp.ge.s32.totalorder %s3612_s27, 2  ;;  %s3294_s22 = sand.u32 1, %s3600_s24  }
 0x5e2   : > { %s3295_s29 = scalar_lea.sflag [#allocation7], %s3294_s22 }
 0x5e3   : > { %p3462_p0 = pnand %p3465_p13, %p3727_p6 }
 0x5e5   : > { %p3463_p1 = pneg %p3462_p0 }
 0x5e7   : > { %3595 = dma.done.wait (%p3463_p1), %s3295_s29, 1024  }
 0x5e8   : > { %3597 = vsyncadd (%p3463_p1), %s3295_s29, 4294966272  ;;  %p17_p2 = scmp.ge.s32.totalorder %s3710_s30, 4   ;;  %s5504_s24 = smov %s3604_s25 }
 0x5e9   : > { %s5505_s25 = smov %s3608_s26  ;;  %s5506_s26 = smov %s3721_s10 }
 0x5ea   : > { %s5507_s27 = smov %s3710_s30  ;;  %19 = sbr.rel (!%p17_p2) target bundleno = 8 (0x8), region = 93 }
 0x5ef   :  { %3300 = vsyncpa [#allocation7], 1 }
 0x5f0   :  { %3302 = vsyncpa [#allocation7 + $0x1], 1 }

</bundles_post_ra>
